<compile_context>
chip_gen: v6e
topology: v6e:2x2x1
jax: 0.10.0
libtpu: 0.0.40
codegen_flags: <defaults>
</compile_context>

<pallas_src>
import jax
import jax.numpy as jnp
from jax.experimental import pallas as pl
from jax.experimental.pallas import tpu as pltpu


# --------------------------------------------------------------------------
# Geometry constants
# --------------------------------------------------------------------------
_H1, _W1, _C1 = 28, 28, 6        # conv1 output (per sample)
_H2, _W2, _C2 = 14, 14, 16       # conv2 output (per sample)
_HH2, _WW2 = 7, 7                # pool2 output (per sample)
_RPS1 = 32                       # padded rows / sample in the conv1 stage (8-aligned)
_RPS2 = 16                       # padded rows / sample in the conv2 stage (8-aligned)
_NHID = 512                      # 480 padded to lane-friendly 512
_NOUT = 128                      # 10 logits padded to one lane group
_TB = 8                          # batch tile (samples per grid step)


# --------------------------------------------------------------------------
# Fused Pallas kernel (one grid step == one batch tile of _TB samples)
# --------------------------------------------------------------------------
def _mnist_fused_kernel(x_ref,                                    # (TB*32, 28) bf16
                        m1_ref, cb1_ref,                          # conv1 bands / bias
                        m2_ref, cb2_ref,                          # conv2 bands / bias
                        w1_ref, b1_ref, w2_ref, b2_ref, w3_ref, b3_ref,
                        out_ref,                                  # (TB, 128) logits
                        xpad_ref, c1_ref, x2p_ref, c2_ref):       # VMEM scratch
    f32, bf16 = jnp.float32, jnp.bfloat16
    tb = out_ref.shape[0]
    r1 = tb * _RPS1                       # conv1 row stack (28 valid + 4 pad / sample)
    r2 = tb * _RPS2                       # conv2 row stack (14 valid + 2 pad / sample)

    # Stage the (wrapper-padded) conv1 input with an 8-row zero tail so the
    # +1 / +2 row taps of the last sample in the tile stay in bounds.
    xpad_ref[pl.ds(0, r1), :] = x_ref[...]
    xpad_ref[pl.ds(r1, 8), :] = jnp.zeros((8, _W1), bf16)

    # ---- conv1 + bias + ReLU: ONE matmul over the whole tile, 3 dy taps
    #      stacked along K (K = 3*28 = 84, N = 6*28 = 168).
    t1 = jnp.concatenate([xpad_ref[pl.ds(dy, r1), :] for dy in range(3)], axis=1)
    a1 = jnp.dot(t1, m1_ref[...], preferred_element_type=f32) + cb1_ref[...]
    a1 = jnp.maximum(a1, 0.0)                                     # (r1, 168)

    # ---- pool1 column max (band columns pre-permuted: [0:84)=even, [84:)=odd)
    c1_ref[...] = jnp.maximum(a1[:, :_C1 * _W2], a1[:, _C1 * _W2:])

    # ---- pool1 row max via even/odd sublane-strided loads; the two garbage
    #      pooled rows per sample are zeroed and become the conv2 H padding.
    p1 = jnp.maximum(c1_ref[pl.ds(0, r2, stride=2), :],
                     c1_ref[pl.ds(1, r2, stride=2), :])           # (r2, 84)
    g = jax.lax.broadcasted_iota(jnp.int32, (r2, 1), 0)
    p1 = jnp.where(g % _RPS2 < _H2, p1, 0.0)
    x2p_ref[pl.ds(0, 8), :] = jnp.zeros((8, _C1 * _W2), bf16)        # leading pad
    x2p_ref[pl.ds(8 + r2, 8), :] = jnp.zeros((8, _C1 * _W2), bf16)   # trailing pad
    x2p_ref[pl.ds(8, r2), :] = p1.astype(bf16)                       # aligned store

    # ---- conv2 + bias + ReLU: ONE matmul (K = 3*84 = 252, N = 16*14 = 224).
    t2 = jnp.concatenate([x2p_ref[pl.ds(7 + dy, r2), :] for dy in range(3)], axis=1)
    a2 = jnp.dot(t2, m2_ref[...], preferred_element_type=f32) + cb2_ref[...]
    a2 = jnp.maximum(a2, 0.0)                                     # (r2, 224)

    # ---- pool2 column max
    c2_ref[...] = jnp.maximum(a2[:, :_C2 * _WW2], a2[:, _C2 * _WW2:])

    # ---- pool2 row max fused into the flatten: chunk hh = max(row 2hh, 2hh+1)
    #      of every sample (stride-16 gathers), each chunk padded 112 -> 128
    #      lanes so the feature vector is lane-aligned for linear1.
    zpad = jnp.zeros((tb, 128 - _C2 * _WW2), f32)
    chunks = []
    for hh in range(_HH2):
        e = c2_ref[pl.ds(2 * hh, tb, stride=_RPS2), :]
        o = c2_ref[pl.ds(2 * hh + 1, tb, stride=_RPS2), :]
        chunks.append(jnp.maximum(e, o))
        chunks.append(zpad)
    flat = jnp.concatenate(chunks, axis=1)                        # (tb, 896)

    # ---- linear1 -> relu -> linear2 -> relu -> linear3 (logits padded to 128)
    h = jnp.dot(flat.astype(bf16), w1_ref[...], preferred_element_type=f32) + b1_ref[...]
    h = jnp.maximum(h, 0.0)
    h = jnp.dot(h.astype(bf16), w2_ref[...], preferred_element_type=f32) + b2_ref[...]
    h = jnp.maximum(h, 0.0)
    logits = jnp.dot(h.astype(bf16), w3_ref[...], preferred_element_type=f32) + b3_ref[...]
    out_ref[...] = logits.astype(out_ref.dtype)


# --------------------------------------------------------------------------
# One-time parameter repacking (outside the jitted forward)
# --------------------------------------------------------------------------
def _conv_band_matrix(w, b, width):
    """(Cout, Cin, 3, 3) conv weight -> K-stacked, pool-permuted band matrix.

    Returns (m, bias):
      m[(dy*Cin + ci)*width + w_in, col]  with output columns permuted so the
      even pooled columns occupy lanes [0, Cout*width/2) and the odd ones the
      rest (ReLU commutes with the permutation, so 2x2 pooling over width
      becomes max(left half, right half) in the kernel).
    """
    cout, cin = w.shape[0], w.shape[1]
    wi = jnp.arange(width)[:, None]
    wo = jnp.arange(width)[None, :]
    dx = wi - wo + 1
    valid = (dx >= 0) & (dx <= 2)
    taps = w[:, :, :, jnp.clip(dx, 0, 2)]                 # (Cout, Cin, 3, Win, Wout)
    taps = jnp.where(valid[None, None, None], taps, 0.0)
    m = taps.transpose(2, 1, 3, 0, 4).reshape(3 * cin * width, cout * width)
    half = width // 2
    co = jnp.arange(cout)[:, None]
    k = jnp.arange(half)[None, :]
    perm = jnp.concatenate([(co * width + 2 * k).reshape(-1),
                            (co * width + 2 * k + 1).reshape(-1)])
    bias = jnp.repeat(b, width)[perm].reshape(1, cout * width)
    return m[:, perm], bias


def prepare_params(p):
    """Repack PyTorch-layout parameters into kernel-ready constants (run once)."""
    bf16 = jnp.bfloat16
    m1, cb1 = _conv_band_matrix(p["conv1_w"], p["conv1_b"], _W1)   # (84, 168)
    m2, cb2 = _conv_band_matrix(p["conv2_w"], p["conv2_b"], _W2)   # (252, 224)
    # linear1: PyTorch flatten order is (c, h, w); kernel features are 7 chunks
    # of 128 lanes, chunk h -> lane c*7 + w plus 16 zero pad lanes.
    w1 = p["lin1_w"].reshape(480, _C2, _HH2, _WW2).transpose(2, 1, 3, 0)
    w1 = w1.reshape(_HH2, _C2 * _WW2, 480)
    w1 = jnp.pad(w1, ((0, 0), (0, 128 - _C2 * _WW2), (0, _NHID - 480)))
    w1 = w1.reshape(_HH2 * 128, _NHID)                              # (896, 512)
    b1 = jnp.pad(p["lin1_b"], (0, _NHID - 480)).reshape(1, _NHID)
    w2 = jnp.pad(p["lin2_w"].T, ((0, _NHID - 480), (0, _NHID - 480)))  # (512, 512)
    b2 = jnp.pad(p["lin2_b"], (0, _NHID - 480)).reshape(1, _NHID)
    w3 = jnp.pad(p["lin3_w"].T, ((0, _NHID - 480), (0, _NOUT - 10)))   # (512, 128)
    b3 = jnp.pad(p["lin3_b"], (0, _NOUT - 10)).reshape(1, _NOUT)
    return {"M1": m1.astype(bf16), "cb1": cb1,
            "M2": m2.astype(bf16), "cb2": cb2,
            "W1": w1.astype(bf16), "b1": b1,
            "W2": w2.astype(bf16), "b2": b2,
            "W3": w3.astype(bf16), "b3": b3}


_ARG_ORDER = ("M1", "cb1", "M2", "cb2", "W1", "b1", "W2", "b2", "W3", "b3")


# --------------------------------------------------------------------------
# Forward pass (single fused pallas_call, batch tiled over a parallel grid)
# --------------------------------------------------------------------------
@jax.jit
def mnist_net_forward(prepped, x):
    B = x.shape[0]
    n_tiles = pl.cdiv(B, _TB)
    b_pad = n_tiles * _TB
    # Per-sample H padding to 32 aligned rows ([zero, 28 rows, zero, zero, zero])
    # and batch padding to a whole number of tiles; cast to bf16 once in HBM.
    xp = jnp.pad(x.reshape(B, _H1, _W1).astype(jnp.bfloat16),
                 ((0, b_pad - B), (1, _RPS1 - _H1 - 1), (0, 0)))
    xp = xp.reshape(b_pad * _RPS1, _W1)

    weights = [prepped[k] for k in _ARG_ORDER]
    in_specs = [pl.BlockSpec((_TB * _RPS1, _W1), lambda i: (i, 0))] + \
               [pl.BlockSpec(w.shape, lambda i: (0, 0)) for w in weights]

    flops = int(n_tiles * (
        2 * _TB * _RPS1 * (3 * _W1) * (_C1 * _W1)
        + 2 * _TB * _RPS2 * (3 * _C1 * _W2) * (_C2 * _W2)
        + 2 * _TB * (_HH2 * 128 * _NHID + _NHID * _NHID + _NHID * _NOUT)))
    bytes_accessed = int(xp.size * xp.dtype.itemsize
                         + sum(w.size * w.dtype.itemsize for w in weights)
                         + b_pad * _NOUT * 4)

    out = pl.pallas_call(
        _mnist_fused_kernel,
        out_shape=jax.ShapeDtypeStruct((b_pad, _NOUT), jnp.float32),
        grid=(n_tiles,),
        in_specs=in_specs,
        out_specs=pl.BlockSpec((_TB, _NOUT), lambda i: (i, 0)),
        scratch_shapes=[
            pltpu.VMEM((_TB * _RPS1 + 8, _W1), jnp.bfloat16),        # conv1 taps
            pltpu.VMEM((_TB * _RPS1, _C1 * _W2), jnp.float32),       # pool1 col-max
            pltpu.VMEM((_TB * _RPS2 + 16, _C1 * _W2), jnp.bfloat16),  # conv2 input
            pltpu.VMEM((_TB * _RPS2, _C2 * _WW2), jnp.float32),      # pool2 col-max
        ],
        compiler_params=pltpu.CompilerParams(
            dimension_semantics=("parallel",)),
        cost_estimate=pl.CostEstimate(flops=flops, transcendentals=0,
                                      bytes_accessed=bytes_accessed),
    )(xp, *weights)
    return out[:B, :10]


# --------------------------------------------------------------------------
# Parameters & pure-JAX reference
# --------------------------------------------------------------------------
def init_params(key):
    ks = jax.random.split(key, 10)
    s = 0.05
    return {
        "conv1_w": jax.random.normal(ks[0], (6, 1, 3, 3), jnp.float32) * s,
        "conv1_b": jax.random.normal(ks[1], (6,), jnp.float32) * s,
        "conv2_w": jax.random.normal(ks[2], (16, 6, 3, 3), jnp.float32) * s,
        "conv2_b": jax.random.normal(ks[3], (16,), jnp.float32) * s,
        "lin1_w": jax.random.normal(ks[4], (480, 16 * 7 * 7), jnp.float32) * s,
        "lin1_b": jax.random.normal(ks[5], (480,), jnp.float32) * s,
        "lin2_w": jax.random.normal(ks[6], (480, 480), jnp.float32) * s,
        "lin2_b": jax.random.normal(ks[7], (480,), jnp.float32) * s,
        "lin3_w": jax.random.normal(ks[8], (10, 480), jnp.float32) * s,
        "lin3_b": jax.random.normal(ks[9], (10,), jnp.float32) * s,
    }


def mnist_net_reference(params, x):
    def conv(x, w, b):
        y = jax.lax.conv_general_dilated(
            x, w, window_strides=(1, 1), padding=((1, 1), (1, 1)),
            dimension_numbers=("NCHW", "OIHW", "NCHW"))
        return jax.nn.relu(y + b[None, :, None, None])

    def pool(x):
        B, C, H, W = x.shape
        return jnp.max(x.reshape(B, C, H // 2, 2, W // 2, 2), axis=(3, 5))

    x = pool(conv(x, params["conv1_w"], params["conv1_b"]))
    x = pool(conv(x, params["conv2_w"], params["conv2_b"]))
    x = x.reshape(x.shape[0], -1)
    x = jax.nn.relu(x @ params["lin1_w"].T + params["lin1_b"])
    x = jax.nn.relu(x @ params["lin2_w"].T + params["lin2_b"])
    return x @ params["lin3_w"].T + params["lin3_b"]


if __name__ == "__main__":
    key = jax.random.PRNGKey(0)
    k_in, k_param = jax.random.split(key)
    x = jax.random.normal(k_in, (2, 1, 28, 28), jnp.float32)   # batch=2, MNIST
    params = init_params(k_param)
    prepped = prepare_params(params)            # one-time repack, outside jit

    out = mnist_net_forward(prepped, x)
    out = jax.block_until_ready(out)
    assert out.shape == (2, 10), out.shape

    ref = mnist_net_reference(params, x)
    # Loose tolerance: kernel runs the MXU in bf16 (weights + activations) with
    # f32 accumulation; reference is full f32.
    err = float(jnp.max(jnp.abs(out - ref)))
    assert jnp.allclose(out, ref, rtol=5e-2, atol=5e-2), err

    print("KERNEL_OK")
</pallas_src>

<mosaic_0001>
module attributes {stable_mosaic.version = 11 : i64} {
  func.func @_mnist_fused_kernel(%arg0: i32, %arg1: memref<256x28xbf16, #tpu.memory_space<vmem>>, %arg2: memref<84x168xbf16, #tpu.memory_space<vmem>>, %arg3: memref<1x168xf32, #tpu.memory_space<vmem>>, %arg4: memref<252x224xbf16, #tpu.memory_space<vmem>>, %arg5: memref<1x224xf32, #tpu.memory_space<vmem>>, %arg6: memref<896x512xbf16, #tpu.memory_space<vmem>>, %arg7: memref<1x512xf32, #tpu.memory_space<vmem>>, %arg8: memref<512x512xbf16, #tpu.memory_space<vmem>>, %arg9: memref<1x512xf32, #tpu.memory_space<vmem>>, %arg10: memref<512x128xbf16, #tpu.memory_space<vmem>>, %arg11: memref<1x128xf32, #tpu.memory_space<vmem>>, %arg12: memref<8x128xf32, #tpu.memory_space<vmem>>, %arg13: memref<264x28xbf16, #tpu.memory_space<vmem>>, %arg14: memref<256x84xf32, #tpu.memory_space<vmem>>, %arg15: memref<144x84xbf16, #tpu.memory_space<vmem>>, %arg16: memref<128x112xf32, #tpu.memory_space<vmem>>) attributes {dimension_semantics = [#tpu.dimension_semantics<parallel>], iteration_bounds = array<i64: 1>, scalar_prefetch = 0 : i64, scratch_operands = 4 : i64, tpu.core_type = #tpu.core_type<tc>, window_params = [{transform_indices = @transform_0, window_bounds = array<i64: 256, 28>}, {pipeline_mode = #tpu.pipeline_mode<synchronous>, transform_indices = @transform_1, window_bounds = array<i64: 84, 168>}, {pipeline_mode = #tpu.pipeline_mode<synchronous>, transform_indices = @transform_2, window_bounds = array<i64: 1, 168>}, {pipeline_mode = #tpu.pipeline_mode<synchronous>, transform_indices = @transform_3, window_bounds = array<i64: 252, 224>}, {pipeline_mode = #tpu.pipeline_mode<synchronous>, transform_indices = @transform_4, window_bounds = array<i64: 1, 224>}, {pipeline_mode = #tpu.pipeline_mode<synchronous>, transform_indices = @transform_5, window_bounds = array<i64: 896, 512>}, {pipeline_mode = #tpu.pipeline_mode<synchronous>, transform_indices = @transform_6, window_bounds = array<i64: 1, 512>}, {pipeline_mode = #tpu.pipeline_mode<synchronous>, transform_indices = @transform_7, window_bounds = array<i64: 512, 512>}, {pipeline_mode = #tpu.pipeline_mode<synchronous>, transform_indices = @transform_8, window_bounds = array<i64: 1, 512>}, {pipeline_mode = #tpu.pipeline_mode<synchronous>, transform_indices = @transform_9, window_bounds = array<i64: 512, 128>}, {pipeline_mode = #tpu.pipeline_mode<synchronous>, transform_indices = @transform_10, window_bounds = array<i64: 1, 128>}, {transform_indices = @transform_11, window_bounds = array<i64: 8, 128>}]} {
    %c0 = arith.constant 0 : index
    %c0_0 = arith.constant 0 : index
    %0 = vector.load %arg1[%c0, %c0_0] : memref<256x28xbf16, #tpu.memory_space<vmem>>, vector<256x28xbf16>
    %c0_1 = arith.constant 0 : index
    %c0_2 = arith.constant 0 : index
    %1 = vector.load %arg13[%c0_1, %c0_2] : memref<264x28xbf16, #tpu.memory_space<vmem>>, vector<256x28xbf16>
    tpu.vector_store %arg13[%c0_1, %c0_2], %0 {strides = array<i32>} : memref<264x28xbf16, #tpu.memory_space<vmem>>, vector<256x28xbf16>,
    %cst = arith.constant 0.000000e+00 : bf16
    %2 = vector.broadcast %cst : bf16 to vector<8x28xbf16>
    %c256 = arith.constant 256 : index
    %c0_3 = arith.constant 0 : index
    %3 = vector.load %arg13[%c256, %c0_3] : memref<264x28xbf16, #tpu.memory_space<vmem>>, vector<8x28xbf16>
    tpu.vector_store %arg13[%c256, %c0_3], %2 {strides = array<i32>} : memref<264x28xbf16, #tpu.memory_space<vmem>>, vector<8x28xbf16>,
    %c0_4 = arith.constant 0 : index
    %c0_5 = arith.constant 0 : index
    %4 = vector.load %arg13[%c0_4, %c0_5] : memref<264x28xbf16, #tpu.memory_space<vmem>>, vector<256x28xbf16>
    %c1 = arith.constant 1 : index
    %c0_6 = arith.constant 0 : index
    %5 = vector.load %arg13[%c1, %c0_6] : memref<264x28xbf16, #tpu.memory_space<vmem>>, vector<256x28xbf16>
    %c2 = arith.constant 2 : index
    %c0_7 = arith.constant 0 : index
    %6 = vector.load %arg13[%c2, %c0_7] : memref<264x28xbf16, #tpu.memory_space<vmem>>, vector<256x28xbf16>
    %7 = tpu.concatenate %4, %5, %6 in 1 : vector<256x28xbf16>, vector<256x28xbf16>, vector<256x28xbf16> -> vector<256x84xbf16>
    %c0_8 = arith.constant 0 : index
    %c0_9 = arith.constant 0 : index
    %8 = vector.load %arg2[%c0_8, %c0_9] : memref<84x168xbf16, #tpu.memory_space<vmem>>, vector<84x168xbf16>
    %cst_10 = arith.constant dense<0.000000e+00> : vector<256x168xf32>
    %9 = tpu.matmul %7, %8, %cst_10 {dimension_numbers = #tpu.dot_dimension_numbers<[1], [0], [0], [1], [0, 0, 1, 1], [], []>} : vector<256x84xbf16>, vector<84x168xbf16>, vector<256x168xf32> -> vector<256x168xf32>
    %c0_11 = arith.constant 0 : index
    %c0_12 = arith.constant 0 : index
    %10 = vector.load %arg3[%c0_11, %c0_12] : memref<1x168xf32, #tpu.memory_space<vmem>>, vector<1x168xf32>
    %11 = vector.broadcast %10 : vector<1x168xf32> to vector<256x168xf32>
    %12 = arith.addf %9, %11 : vector<256x168xf32>
    %cst_13 = arith.constant 0.000000e+00 : f32
    %13 = vector.broadcast %cst_13 : f32 to vector<256x168xf32>
    %14 = arith.maximumf %12, %13 : vector<256x168xf32>
    %15 = vector.extract_strided_slice %14 {offsets = [0, 0], sizes = [256, 84], strides = [1, 1]} : vector<256x168xf32> to vector<256x84xf32>
    %16 = vector.extract_strided_slice %14 {offsets = [0, 84], sizes = [256, 84], strides = [1, 1]} : vector<256x168xf32> to vector<256x84xf32>
    %17 = arith.maximumf %15, %16 : vector<256x84xf32>
    %c0_14 = arith.constant 0 : index
    %c0_15 = arith.constant 0 : index
    %18 = vector.load %arg14[%c0_14, %c0_15] : memref<256x84xf32, #tpu.memory_space<vmem>>, vector<256x84xf32>
    tpu.vector_store %arg14[%c0_14, %c0_15], %17 {strides = array<i32>} : memref<256x84xf32, #tpu.memory_space<vmem>>, vector<256x84xf32>,
    %c0_16 = arith.constant 0 : index
    %c0_17 = arith.constant 0 : index
    %19 = tpu.strided_load %arg14[%c0_16, %c0_17] {strides = array<i32: 2, 1>} : memref<256x84xf32, #tpu.memory_space<vmem>>, vector<128x84xf32>
    %c1_18 = arith.constant 1 : index
    %c0_19 = arith.constant 0 : index
    %20 = tpu.strided_load %arg14[%c1_18, %c0_19] {strides = array<i32: 2, 1>} : memref<256x84xf32, #tpu.memory_space<vmem>>, vector<128x84xf32>
    %21 = arith.maximumf %19, %20 : vector<128x84xf32>
    %22 = tpu.iota {dimensions = array<i32: 0>} : vector<128x1xi32>
    %c16_i32 = arith.constant 16 : i32
    %c0_i32 = arith.constant 0 : i32
    %23 = arith.cmpi eq, %c16_i32, %c0_i32 : i32
    %c1_i32 = arith.constant 1 : i32
    %24 = arith.select %23, %c1_i32, %c16_i32 : i32
    %25 = vector.broadcast %24 : i32 to vector<128x1xi32>
    %26 = arith.remsi %22, %25 : vector<128x1xi32>
    %c0_i32_20 = arith.constant 0 : i32
    %27 = vector.broadcast %c0_i32_20 : i32 to vector<128x1xi32>
    %28 = arith.cmpi ne, %26, %27 : vector<128x1xi32>
    %c0_i32_21 = arith.constant 0 : i32
    %29 = vector.broadcast %c0_i32_21 : i32 to vector<128x1xi32>
    %30 = arith.cmpi slt, %26, %29 : vector<128x1xi32>
    %c0_i32_22 = arith.constant 0 : i32
    %31 = arith.cmpi slt, %24, %c0_i32_22 : i32
    %32 = vector.broadcast %31 : i1 to vector<128x1xi1>
    %33 = vector.broadcast %32 : vector<128x1xi1> to vector<128x1xi1>
    %34 = arith.xori %30, %33 : vector<128x1xi1>
    %35 = arith.andi %34, %28 : vector<128x1xi1>
    %36 = vector.broadcast %24 : i32 to vector<128x1xi32>
    %37 = arith.addi %26, %36 : vector<128x1xi32>
    %38 = arith.select %35, %37, %26 : vector<128x1xi1>, vector<128x1xi32>
    %c14_i32 = arith.constant 14 : i32
    %39 = vector.broadcast %c14_i32 : i32 to vector<128x1xi32>
    %40 = arith.cmpi slt, %38, %39 : vector<128x1xi32>
    %cst_23 = arith.constant 0.000000e+00 : f32
    %41 = vector.shape_cast %40 : vector<128x1xi1> to vector<128x1xi1>
    %42 = vector.broadcast %41 : vector<128x1xi1> to vector<128x84xi1>
    %43 = vector.broadcast %cst_23 : f32 to vector<128x84xf32>
    %44 = arith.select %42, %21, %43 : vector<128x84xi1>, vector<128x84xf32>
    %cst_24 = arith.constant 0.000000e+00 : bf16
    %45 = vector.broadcast %cst_24 : bf16 to vector<8x84xbf16>
    %c0_25 = arith.constant 0 : index
    %c0_26 = arith.constant 0 : index
    %46 = vector.load %arg15[%c0_25, %c0_26] : memref<144x84xbf16, #tpu.memory_space<vmem>>, vector<8x84xbf16>
    tpu.vector_store %arg15[%c0_25, %c0_26], %45 {strides = array<i32>} : memref<144x84xbf16, #tpu.memory_space<vmem>>, vector<8x84xbf16>,
    %cst_27 = arith.constant 0.000000e+00 : bf16
    %47 = vector.broadcast %cst_27 : bf16 to vector<8x84xbf16>
    %c136 = arith.constant 136 : index
    %c0_28 = arith.constant 0 : index
    %48 = vector.load %arg15[%c136, %c0_28] : memref<144x84xbf16, #tpu.memory_space<vmem>>, vector<8x84xbf16>
    tpu.vector_store %arg15[%c136, %c0_28], %47 {strides = array<i32>} : memref<144x84xbf16, #tpu.memory_space<vmem>>, vector<8x84xbf16>,
    %49 = arith.truncf %44 : vector<128x84xf32> to vector<128x84xbf16>
    %c8 = arith.constant 8 : index
    %c0_29 = arith.constant 0 : index
    %50 = vector.load %arg15[%c8, %c0_29] : memref<144x84xbf16, #tpu.memory_space<vmem>>, vector<128x84xbf16>
    tpu.vector_store %arg15[%c8, %c0_29], %49 {strides = array<i32>} : memref<144x84xbf16, #tpu.memory_space<vmem>>, vector<128x84xbf16>,
    %c7 = arith.constant 7 : index
    %c0_30 = arith.constant 0 : index
    %51 = vector.load %arg15[%c7, %c0_30] : memref<144x84xbf16, #tpu.memory_space<vmem>>, vector<128x84xbf16>
    %c8_31 = arith.constant 8 : index
    %c0_32 = arith.constant 0 : index
    %52 = vector.load %arg15[%c8_31, %c0_32] : memref<144x84xbf16, #tpu.memory_space<vmem>>, vector<128x84xbf16>
    %c9 = arith.constant 9 : index
    %c0_33 = arith.constant 0 : index
    %53 = vector.load %arg15[%c9, %c0_33] : memref<144x84xbf16, #tpu.memory_space<vmem>>, vector<128x84xbf16>
    %54 = tpu.concatenate %51, %52, %53 in 1 : vector<128x84xbf16>, vector<128x84xbf16>, vector<128x84xbf16> -> vector<128x252xbf16>
    %c0_34 = arith.constant 0 : index
    %c0_35 = arith.constant 0 : index
    %55 = vector.load %arg4[%c0_34, %c0_35] : memref<252x224xbf16, #tpu.memory_space<vmem>>, vector<252x224xbf16>
    %cst_36 = arith.constant dense<0.000000e+00> : vector<128x224xf32>
    %56 = tpu.matmul %54, %55, %cst_36 {dimension_numbers = #tpu.dot_dimension_numbers<[1], [0], [0], [1], [0, 0, 1, 1], [], []>} : vector<128x252xbf16>, vector<252x224xbf16>, vector<128x224xf32> -> vector<128x224xf32>
    %c0_37 = arith.constant 0 : index
    %c0_38 = arith.constant 0 : index
    %57 = vector.load %arg5[%c0_37, %c0_38] : memref<1x224xf32, #tpu.memory_space<vmem>>, vector<1x224xf32>
    %58 = vector.broadcast %57 : vector<1x224xf32> to vector<128x224xf32>
    %59 = arith.addf %56, %58 : vector<128x224xf32>
    %cst_39 = arith.constant 0.000000e+00 : f32
    %60 = vector.broadcast %cst_39 : f32 to vector<128x224xf32>
    %61 = arith.maximumf %59, %60 : vector<128x224xf32>
    %62 = vector.extract_strided_slice %61 {offsets = [0, 0], sizes = [128, 112], strides = [1, 1]} : vector<128x224xf32> to vector<128x112xf32>
    %63 = vector.extract_strided_slice %61 {offsets = [0, 112], sizes = [128, 112], strides = [1, 1]} : vector<128x224xf32> to vector<128x112xf32>
    %64 = arith.maximumf %62, %63 : vector<128x112xf32>
    %c0_40 = arith.constant 0 : index
    %c0_41 = arith.constant 0 : index
    %65 = vector.load %arg16[%c0_40, %c0_41] : memref<128x112xf32, #tpu.memory_space<vmem>>, vector<128x112xf32>
    tpu.vector_store %arg16[%c0_40, %c0_41], %64 {strides = array<i32>} : memref<128x112xf32, #tpu.memory_space<vmem>>, vector<128x112xf32>,
    %cst_42 = arith.constant 0.000000e+00 : f32
    %66 = vector.broadcast %cst_42 : f32 to vector<8x16xf32>
    %c0_43 = arith.constant 0 : index
    %c0_44 = arith.constant 0 : index
    %67 = tpu.strided_load %arg16[%c0_43, %c0_44] {strides = array<i32: 16, 1>} : memref<128x112xf32, #tpu.memory_space<vmem>>, vector<8x112xf32>
    %c1_45 = arith.constant 1 : index
    %c0_46 = arith.constant 0 : index
    %68 = tpu.strided_load %arg16[%c1_45, %c0_46] {strides = array<i32: 16, 1>} : memref<128x112xf32, #tpu.memory_space<vmem>>, vector<8x112xf32>
    %69 = arith.maximumf %67, %68 : vector<8x112xf32>
    %c2_47 = arith.constant 2 : index
    %c0_48 = arith.constant 0 : index
    %70 = tpu.strided_load %arg16[%c2_47, %c0_48] {strides = array<i32: 16, 1>} : memref<128x112xf32, #tpu.memory_space<vmem>>, vector<8x112xf32>
    %c3 = arith.constant 3 : index
    %c0_49 = arith.constant 0 : index
    %71 = tpu.strided_load %arg16[%c3, %c0_49] {strides = array<i32: 16, 1>} : memref<128x112xf32, #tpu.memory_space<vmem>>, vector<8x112xf32>
    %72 = arith.maximumf %70, %71 : vector<8x112xf32>
    %c4 = arith.constant 4 : index
    %c0_50 = arith.constant 0 : index
    %73 = tpu.strided_load %arg16[%c4, %c0_50] {strides = array<i32: 16, 1>} : memref<128x112xf32, #tpu.memory_space<vmem>>, vector<8x112xf32>
    %c5 = arith.constant 5 : index
    %c0_51 = arith.constant 0 : index
    %74 = tpu.strided_load %arg16[%c5, %c0_51] {strides = array<i32: 16, 1>} : memref<128x112xf32, #tpu.memory_space<vmem>>, vector<8x112xf32>
    %75 = arith.maximumf %73, %74 : vector<8x112xf32>
    %c6 = arith.constant 6 : index
    %c0_52 = arith.constant 0 : index
    %76 = tpu.strided_load %arg16[%c6, %c0_52] {strides = array<i32: 16, 1>} : memref<128x112xf32, #tpu.memory_space<vmem>>, vector<8x112xf32>
    %c7_53 = arith.constant 7 : index
    %c0_54 = arith.constant 0 : index
    %77 = tpu.strided_load %arg16[%c7_53, %c0_54] {strides = array<i32: 16, 1>} : memref<128x112xf32, #tpu.memory_space<vmem>>, vector<8x112xf32>
    %78 = arith.maximumf %76, %77 : vector<8x112xf32>
    %c8_55 = arith.constant 8 : index
    %c0_56 = arith.constant 0 : index
    %79 = tpu.strided_load %arg16[%c8_55, %c0_56] {strides = array<i32: 16, 1>} : memref<128x112xf32, #tpu.memory_space<vmem>>, vector<8x112xf32>
    %c9_57 = arith.constant 9 : index
    %c0_58 = arith.constant 0 : index
    %80 = tpu.strided_load %arg16[%c9_57, %c0_58] {strides = array<i32: 16, 1>} : memref<128x112xf32, #tpu.memory_space<vmem>>, vector<8x112xf32>
    %81 = arith.maximumf %79, %80 : vector<8x112xf32>
    %c10 = arith.constant 10 : index
    %c0_59 = arith.constant 0 : index
    %82 = tpu.strided_load %arg16[%c10, %c0_59] {strides = array<i32: 16, 1>} : memref<128x112xf32, #tpu.memory_space<vmem>>, vector<8x112xf32>
    %c11 = arith.constant 11 : index
    %c0_60 = arith.constant 0 : index
    %83 = tpu.strided_load %arg16[%c11, %c0_60] {strides = array<i32: 16, 1>} : memref<128x112xf32, #tpu.memory_space<vmem>>, vector<8x112xf32>
    %84 = arith.maximumf %82, %83 : vector<8x112xf32>
    %c12 = arith.constant 12 : index
    %c0_61 = arith.constant 0 : index
    %85 = tpu.strided_load %arg16[%c12, %c0_61] {strides = array<i32: 16, 1>} : memref<128x112xf32, #tpu.memory_space<vmem>>, vector<8x112xf32>
    %c13 = arith.constant 13 : index
    %c0_62 = arith.constant 0 : index
    %86 = tpu.strided_load %arg16[%c13, %c0_62] {strides = array<i32: 16, 1>} : memref<128x112xf32, #tpu.memory_space<vmem>>, vector<8x112xf32>
    %87 = arith.maximumf %85, %86 : vector<8x112xf32>
    %88 = tpu.concatenate %69, %66, %72, %66, %75, %66, %78, %66, %81, %66, %84, %66, %87, %66 in 1 : vector<8x112xf32>, vector<8x16xf32>, vector<8x112xf32>, vector<8x16xf32>, vector<8x112xf32>, vector<8x16xf32>, vector<8x112xf32>, vector<8x16xf32>, vector<8x112xf32>, vector<8x16xf32>, vector<8x112xf32>, vector<8x16xf32>, vector<8x112xf32>, vector<8x16xf32> -> vector<8x896xf32>
    %89 = arith.truncf %88 : vector<8x896xf32> to vector<8x896xbf16>
    %c0_63 = arith.constant 0 : index
    %c0_64 = arith.constant 0 : index
    %90 = vector.load %arg6[%c0_63, %c0_64] : memref<896x512xbf16, #tpu.memory_space<vmem>>, vector<896x512xbf16>
    %cst_65 = arith.constant dense<0.000000e+00> : vector<8x512xf32>
    %91 = tpu.matmul %89, %90, %cst_65 {dimension_numbers = #tpu.dot_dimension_numbers<[1], [0], [0], [1], [0, 0, 1, 1], [], []>} : vector<8x896xbf16>, vector<896x512xbf16>, vector<8x512xf32> -> vector<8x512xf32>
    %c0_66 = arith.constant 0 : index
    %c0_67 = arith.constant 0 : index
    %92 = vector.load %arg7[%c0_66, %c0_67] : memref<1x512xf32, #tpu.memory_space<vmem>>, vector<1x512xf32>
    %93 = vector.broadcast %92 : vector<1x512xf32> to vector<8x512xf32>
    %94 = arith.addf %91, %93 : vector<8x512xf32>
    %cst_68 = arith.constant 0.000000e+00 : f32
    %95 = vector.broadcast %cst_68 : f32 to vector<8x512xf32>
    %96 = arith.maximumf %94, %95 : vector<8x512xf32>
    %97 = arith.truncf %96 : vector<8x512xf32> to vector<8x512xbf16>
    %c0_69 = arith.constant 0 : index
    %c0_70 = arith.constant 0 : index
    %98 = vector.load %arg8[%c0_69, %c0_70] : memref<512x512xbf16, #tpu.memory_space<vmem>>, vector<512x512xbf16>
    %cst_71 = arith.constant dense<0.000000e+00> : vector<8x512xf32>
    %99 = tpu.matmul %97, %98, %cst_71 {dimension_numbers = #tpu.dot_dimension_numbers<[1], [0], [0], [1], [0, 0, 1, 1], [], []>} : vector<8x512xbf16>, vector<512x512xbf16>, vector<8x512xf32> -> vector<8x512xf32>
    %c0_72 = arith.constant 0 : index
    %c0_73 = arith.constant 0 : index
    %100 = vector.load %arg9[%c0_72, %c0_73] : memref<1x512xf32, #tpu.memory_space<vmem>>, vector<1x512xf32>
    %101 = vector.broadcast %100 : vector<1x512xf32> to vector<8x512xf32>
    %102 = arith.addf %99, %101 : vector<8x512xf32>
    %cst_74 = arith.constant 0.000000e+00 : f32
    %103 = vector.broadcast %cst_74 : f32 to vector<8x512xf32>
    %104 = arith.maximumf %102, %103 : vector<8x512xf32>
    %105 = arith.truncf %104 : vector<8x512xf32> to vector<8x512xbf16>
    %c0_75 = arith.constant 0 : index
    %c0_76 = arith.constant 0 : index
    %106 = vector.load %arg10[%c0_75, %c0_76] : memref<512x128xbf16, #tpu.memory_space<vmem>>, vector<512x128xbf16>
    %cst_77 = arith.constant dense<0.000000e+00> : vector<8x128xf32>
    %107 = tpu.matmul %105, %106, %cst_77 {dimension_numbers = #tpu.dot_dimension_numbers<[1], [0], [0], [1], [0, 0, 1, 1], [], []>} : vector<8x512xbf16>, vector<512x128xbf16>, vector<8x128xf32> -> vector<8x128xf32>
    %c0_78 = arith.constant 0 : index
    %c0_79 = arith.constant 0 : index
    %108 = vector.load %arg11[%c0_78, %c0_79] : memref<1x128xf32, #tpu.memory_space<vmem>>, vector<1x128xf32>
    %109 = vector.broadcast %108 : vector<1x128xf32> to vector<8x128xf32>
    %110 = arith.addf %107, %109 : vector<8x128xf32>
    %c0_80 = arith.constant 0 : index
    %c0_81 = arith.constant 0 : index
    %111 = vector.load %arg12[%c0_80, %c0_81] : memref<8x128xf32, #tpu.memory_space<vmem>>, vector<8x128xf32>
    tpu.vector_store %arg12[%c0_80, %c0_81], %110 {strides = array<i32>} : memref<8x128xf32, #tpu.memory_space<vmem>>, vector<8x128xf32>,
    return
  }
  func.func @transform_0(%arg0: i32) -> (i32, i32) {
    %c0_i32 = arith.constant 0 : i32
    %c0_i32_0 = arith.constant 0 : i32
    return %arg0, %c0_i32 : i32, i32
  }
  func.func @transform_1(%arg0: i32) -> (i32, i32) {
    %c0_i32 = arith.constant 0 : i32
    %c0_i32_0 = arith.constant 0 : i32
    %c0_i32_1 = arith.constant 0 : i32
    return %c0_i32, %c0_i32_0 : i32, i32
  }
  func.func @transform_2(%arg0: i32) -> (i32, i32) {
    %c0_i32 = arith.constant 0 : i32
    %c0_i32_0 = arith.constant 0 : i32
    %c0_i32_1 = arith.constant 0 : i32
    return %c0_i32, %c0_i32_0 : i32, i32
  }
  func.func @transform_3(%arg0: i32) -> (i32, i32) {
    %c0_i32 = arith.constant 0 : i32
    %c0_i32_0 = arith.constant 0 : i32
    %c0_i32_1 = arith.constant 0 : i32
    return %c0_i32, %c0_i32_0 : i32, i32
  }
  func.func @transform_4(%arg0: i32) -> (i32, i32) {
    %c0_i32 = arith.constant 0 : i32
    %c0_i32_0 = arith.constant 0 : i32
    %c0_i32_1 = arith.constant 0 : i32
    return %c0_i32, %c0_i32_0 : i32, i32
  }
  func.func @transform_5(%arg0: i32) -> (i32, i32) {
    %c0_i32 = arith.constant 0 : i32
    %c0_i32_0 = arith.constant 0 : i32
    %c0_i32_1 = arith.constant 0 : i32
    return %c0_i32, %c0_i32_0 : i32, i32
  }
  func.func @transform_6(%arg0: i32) -> (i32, i32) {
    %c0_i32 = arith.constant 0 : i32
    %c0_i32_0 = arith.constant 0 : i32
    %c0_i32_1 = arith.constant 0 : i32
    return %c0_i32, %c0_i32_0 : i32, i32
  }
  func.func @transform_7(%arg0: i32) -> (i32, i32) {
    %c0_i32 = arith.constant 0 : i32
    %c0_i32_0 = arith.constant 0 : i32
    %c0_i32_1 = arith.constant 0 : i32
    return %c0_i32, %c0_i32_0 : i32, i32
  }
  func.func @transform_8(%arg0: i32) -> (i32, i32) {
    %c0_i32 = arith.constant 0 : i32
    %c0_i32_0 = arith.constant 0 : i32
    %c0_i32_1 = arith.constant 0 : i32
    return %c0_i32, %c0_i32_0 : i32, i32
  }
  func.func @transform_9(%arg0: i32) -> (i32, i32) {
    %c0_i32 = arith.constant 0 : i32
    %c0_i32_0 = arith.constant 0 : i32
    %c0_i32_1 = arith.constant 0 : i32
    return %c0_i32, %c0_i32_0 : i32, i32
  }
  func.func @transform_10(%arg0: i32) -> (i32, i32) {
    %c0_i32 = arith.constant 0 : i32
    %c0_i32_0 = arith.constant 0 : i32
    %c0_i32_1 = arith.constant 0 : i32
    return %c0_i32, %c0_i32_0 : i32, i32
  }
  func.func @transform_11(%arg0: i32) -> (i32, i32) {
    %c0_i32 = arith.constant 0 : i32
    %c0_i32_0 = arith.constant 0 : i32
    return %arg0, %c0_i32 : i32, i32
  }
}

</mosaic_0001>

<bundles_post_ra>
// kernel: mnist_net_forward.1
= control target key start
LH: loop header
LB: loop body
LE: loop exit
PB: predicated region body
PF: predicated region fallthrough
CT: control target
= control target key end

     0   :  { %16 = vsyncpa [#allocation7], 0  ;;  %s9010_s0 = inlined_call_operand.vmem [shape: bf16[256,28], index: 0, kind: input, shape index: {}]   ;;  %s9011_s1 = inlined_call_operand.vmem [shape: bf16[84,168], index: 1, kind: input, shape index: {}]   ;;  %s9012_s2 = inlined_call_operand.vmem [shape: f32[1,168], index: 2, kind: input, shape index: {}]   ;;  %s9013_s3 = inlined_call_operand.vmem [shape: bf16[252,224], index: 3, kind: input, shape index: {}]   ;;  %s9014_s4 = inlined_call_operand.vmem [shape: f32[1,224], index: 4, kind: input, shape index: {}]   ;;  %s9015_s5 = inlined_call_operand.hbm [shape: bf16[896,512], index: 5, kind: input, shape index: {}]   ;;  %s9016_s6 = inlined_call_operand.vmem [shape: f32[1,512], index: 6, kind: input, shape index: {}]   ;;  %s9017_s7 = inlined_call_operand.vmem [shape: bf16[512,512], index: 7, kind: input, shape index: {}]   ;;  %s9018_s8 = inlined_call_operand.vmem [shape: f32[1,512], index: 8, kind: input, shape index: {}]   ;;  %s9019_s9 = inlined_call_operand.hbm [shape: bf16[512,128], index: 9, kind: input, shape index: {}]   ;;  %s9020_s10 = inlined_call_operand.vmem [shape: f32[1,128], index: 10, kind: input, shape index: {}]   ;;  %s9021_s11 = inlined_call_operand.vmem [shape: f32[8,128], index: 11, kind: output, shape index: {}]  }
   0x1   :  { %17 = vsyncpa [#allocation9], 0  ;;  %s7097_s17 = smov [#allocation6]  }
   0x2   :  { %s33_s18 = sshll.u32 %s7097_s17, 4  ;;  %s34_s18 = int_to_ptr.vmem [resolvable:$true] %s33_s18 }
   0x3   :  { %s7061_s19 = scalar_lea.vmem %s34_s18, 28672  ;;  %p7066_p1 = scmp.lt.s32.totalorder %s34_s18, %s34_s18 }
   0x4   :  { %p7062_p0 = scmp.ne.s32.totalorder %s34_s18, %s7061_s19  ;;  %p7067_p2 = scmp.lt.s32.totalorder %s7061_s19, %s7061_s19 }
   0x6   :  { %p7068_p3 = por %p7067_p2, %p7066_p1 }
   0x8   :  { %p7069_p4 = pnand %p7068_p3, %p7062_p0 }
   0xa   :  { %7072 = shalt.err (!%p7069_p4)
}
   0xb   :  { %s7098_s20 = smov 256   ;;  %s7099_s21 = smov 16  }
   0xc   :  { %39 = dma.hbm_to_vmem [thread:$0]  %s9015_s5, 28672, %s34_s18, [#allocation7], %s7098_s20, %s7098_s20, %s7099_s21  }
   0xd   :  { %s7100_s24 = smov [#allocation8]  }
   0xe   :  { %s51_s25 = sshll.u32 %s7100_s24, 4  ;;  %s52_s25 = int_to_ptr.vmem [resolvable:$true] %s51_s25 }
   0xf   :  { %s7081_s26 = scalar_lea.vmem %s52_s25, 4096  ;;  %p7086_p6 = scmp.lt.s32.totalorder %s52_s25, %s52_s25 }
  0x10   :  { %p7082_p5 = scmp.ne.s32.totalorder %s52_s25, %s7081_s26  ;;  %p7087_p7 = scmp.lt.s32.totalorder %s7081_s26, %s7081_s26 }
  0x12   :  { %p7088_p8 = por %p7087_p7, %p7086_p6 }
  0x14   :  { %p7089_p9 = pnand %p7088_p8, %p7082_p5 }
  0x16   :  { %7092 = shalt.err (!%p7089_p9)
}
  0x17   :  { %s7101_s27 = smov 64   ;;  %s7102_s28 = smov 4  }
  0x18   :  { %57 = dma.hbm_to_vmem [thread:$0]  %s9019_s9, 4096, %s52_s25, [#allocation9], %s7101_s27, %s7101_s27, %s7102_s28  }
  0x19   :  { %7093 = dma.done.wait [#allocation7], 28672  }
  0x1a   :  { %7094 = vsyncadd [#allocation7], 4294938624 }
  0x1b   :  { %7095 = dma.done.wait [#allocation9], 4096  }
  0x1c   :  { %7096 = vsyncadd [#allocation9], 4294963200  ;;  %vm99_vm0 = vcmask 224256   ;;  %v9022_v0 = vmov 0   ;;  %v67_v1 = vld [vmem:[%s9010_s0] sm:$0xf] }
  0x1d   :  { %700 = vmatprep.mubr.bf16.mxu0 %v9022_v0  ;;  %132 = vst.msk [vmem:[#allocation2 + $0x80] sm:$0xf] %vm99_vm0, %v9022_v0  ;;  %v68_v2 = vld [vmem:[%s9010_s0 + $0x4] sm:$0xf]  ;;  %v69_v3 = vld [vmem:[%s9010_s0 + $0x8] sm:$0xf] }
  0x1e   :  { %v70_v4 = vld [vmem:[%s9010_s0 + $0xc] sm:$0xf]  ;;  %100 = vst.msk [vmem:[#allocation2] sm:$0xf] %vm99_vm0, %v67_v1  ;;  %101 = vst.msk [vmem:[#allocation2 + $0x4] sm:$0xf] %vm99_vm0, %v68_v2 }
  0x1f   :  { %102 = vst.msk [vmem:[#allocation2 + $0x8] sm:$0xf] %vm99_vm0, %v69_v3  ;;  %v71_v5 = vld [vmem:[%s9010_s0 + $0x10] sm:$0xf]  ;;  %v72_v6 = vld [vmem:[%s9010_s0 + $0x14] sm:$0xf] }
  0x20   :  { %103 = vst.msk [vmem:[#allocation2 + $0xc] sm:$0xf] %vm99_vm0, %v70_v4  ;;  %104 = vst.msk [vmem:[#allocation2 + $0x10] sm:$0xf] %vm99_vm0, %v71_v5  ;;  %v73_v7 = vld [vmem:[%s9010_s0 + $0x18] sm:$0xf] }
  0x21   :  { %105 = vst.msk [vmem:[#allocation2 + $0x14] sm:$0xf] %vm99_vm0, %v72_v6  ;;  %v74_v8 = vld [vmem:[%s9010_s0 + $0x1c] sm:$0xf]  ;;  %v75_v9 = vld [vmem:[%s9010_s0 + $0x20] sm:$0xf] }
  0x22   :  { %106 = vst.msk [vmem:[#allocation2 + $0x18] sm:$0xf] %vm99_vm0, %v73_v7  ;;  %107 = vst.msk [vmem:[#allocation2 + $0x1c] sm:$0xf] %vm99_vm0, %v74_v8  ;;  %v76_v10 = vld [vmem:[%s9010_s0 + $0x24] sm:$0xf] }
  0x23   :  { %108 = vst.msk [vmem:[#allocation2 + $0x20] sm:$0xf] %vm99_vm0, %v75_v9  ;;  %v77_v11 = vld [vmem:[%s9010_s0 + $0x28] sm:$0xf]  ;;  %v78_v12 = vld [vmem:[%s9010_s0 + $0x2c] sm:$0xf] }
  0x24   :  { %109 = vst.msk [vmem:[#allocation2 + $0x24] sm:$0xf] %vm99_vm0, %v76_v10  ;;  %110 = vst.msk [vmem:[#allocation2 + $0x28] sm:$0xf] %vm99_vm0, %v77_v11  ;;  %v79_v13 = vld [vmem:[%s9010_s0 + $0x30] sm:$0xf] }
  0x25   :  { %111 = vst.msk [vmem:[#allocation2 + $0x2c] sm:$0xf] %vm99_vm0, %v78_v12  ;;  %v80_v14 = vld [vmem:[%s9010_s0 + $0x34] sm:$0xf]  ;;  %v81_v15 = vld [vmem:[%s9010_s0 + $0x38] sm:$0xf] }
  0x26   :  { %112 = vst.msk [vmem:[#allocation2 + $0x30] sm:$0xf] %vm99_vm0, %v79_v13  ;;  %113 = vst.msk [vmem:[#allocation2 + $0x34] sm:$0xf] %vm99_vm0, %v80_v14  ;;  %v82_v16 = vld [vmem:[%s9010_s0 + $0x3c] sm:$0xf] }
  0x27   :  { %114 = vst.msk [vmem:[#allocation2 + $0x38] sm:$0xf] %vm99_vm0, %v81_v15  ;;  %v83_v17 = vld [vmem:[%s9010_s0 + $0x40] sm:$0xf]  ;;  %v84_v18 = vld [vmem:[%s9010_s0 + $0x44] sm:$0xf] }
  0x28   :  { %vm250_vm1 = vsmask.f32 7424  ;;  %115 = vst.msk [vmem:[#allocation2 + $0x3c] sm:$0xf] %vm99_vm0, %v82_v16  ;;  %116 = vst.msk [vmem:[#allocation2 + $0x40] sm:$0xf] %vm99_vm0, %v83_v17 }
  0x29   :  { %117 = vst.msk [vmem:[#allocation2 + $0x44] sm:$0xf] %vm99_vm0, %v84_v18  ;;  %v85_v19 = vld [vmem:[%s9010_s0 + $0x48] sm:$0xf]  ;;  %v86_v20 = vld [vmem:[%s9010_s0 + $0x4c] sm:$0xf] }
  0x2a   :  { %v87_v21 = vld [vmem:[%s9010_s0 + $0x50] sm:$0xf]  ;;  %118 = vst.msk [vmem:[#allocation2 + $0x48] sm:$0xf] %vm99_vm0, %v85_v19  ;;  %119 = vst.msk [vmem:[#allocation2 + $0x4c] sm:$0xf] %vm99_vm0, %v86_v20 }
  0x2b   :  { %v88_v22 = vld [vmem:[%s9010_s0 + $0x54] sm:$0xf]  ;;  %120 = vst.msk [vmem:[#allocation2 + $0x50] sm:$0xf] %vm99_vm0, %v87_v21  ;;  %v89_v23 = vld [vmem:[%s9010_s0 + $0x58] sm:$0xf] }
  0x2c   :  { %v90_v24 = vld [vmem:[%s9010_s0 + $0x5c] sm:$0xf]  ;;  %v133_v25 = vld [vmem:[#allocation2] sm:$0xf]  ;;  %v134_v26 = vld [vmem:[#allocation2 + $0x4] sm:$0xf] }
  0x2d   :  { %121 = vst.msk [vmem:[#allocation2 + $0x54] sm:$0xf] %vm99_vm0, %v88_v22  ;;  %122 = vst.msk [vmem:[#allocation2 + $0x58] sm:$0xf] %vm99_vm0, %v89_v23  ;;  %v7275_v27 = vcombine.low %v133_v25, %v134_v26  ;;  %v6385_v28 = vld [vmem:[#allocation2 + $0x8] sm:$0xff]   ;;  %v6387_v31 = vld [vmem:[#allocation2 + $0x10] sm:$0xff]  }
  0x2e   :  { %123 = vst.msk [vmem:[#allocation2 + $0x5c] sm:$0xf] %vm99_vm0, %v90_v24  ;;  %v166_v29 = vld [vmem:[#allocation2] sm:$0xe]  ;;  %v259_v34 = vshll.u32 %v6385_v28, 16  ;;  %vm418_vm2 = vcmask 1046528  }
  0x2f   :  { %v5780_v30 = vcombine.low %v166_v29, %v134_v26  ;;  %v252_v32 = vshrl.u32 %v7275_v27, 16  ;;  %v254_v33 = vshll.u32 %v7275_v27, 16  ;;  %v420_v36 = vrot.slane %v6385_v28, 1  ;;  %v6388_v42 = vld [vmem:[#allocation2 + $0x18] sm:$0xff]   ;;  %v6389_v44 = vld [vmem:[#allocation2 + $0x20] sm:$0xff]   ;;  %s7104_s18 = smov 28  }
  0x30   :  { %v263_v37 = vshrl.u32 %v6385_v28, 16  ;;  %v267_v38 = vshll.u32 %v6387_v31, 16  ;;  %v261_v40 = vrot.slane %v259_v34, 1  ;;  %v422_v41 = vrot.slane %v6387_v31, 1  ;;  %v6390_v54 = vld [vmem:[#allocation2 + $0x28] sm:$0xff]   ;;  %s7105_s19 = smov 56  }
  0x31   :  { %v419_v35 = vrot.slane %v5780_v30, 1  ;;  %v256_v39 = vrot.slane %v254_v33, 1  ;;  %v271_v47 = vshrl.u32 %v6387_v31, 16  ;;  %v275_v48 = vshll.u32 %v6388_v42, 16  ;;  %v7289_v3 = vld [vmem:[#allocation2 + $0x30] sm:$0xff]   ;;  %v7297_v6 = vld [vmem:[#allocation2 + $0x38] sm:$0xff]  }
  0x32   :  { %v269_v43 = vrot.slane %v267_v38, 1  ;;  %v265_v46 = vor.u32 %v263_v37, %v261_v40  ;;  %v424_v52 = vrot.slane %v6388_v42, 1  ;;  %v283_v53 = vshll.u32 %v6389_v44, 16  ;;  %v91_v4 = vld [vmem:[%s9010_s0 + $0x60] sm:$0xf]  ;;  %s7107_s25 = smov 84  }
  0x33   :  { %v257_v45 = vor.u32 %v256_v39, %v252_v32  ;;  %v421_v51 = vsel %vm418_vm2, %v419_v35, %v420_v36  ;;  %v423_v55 = vsel %vm418_vm2, %v420_v36, %v422_v41  ;;  %v277_v57 = vrot.slane %v275_v48, 1  ;;  %v92_v5 = vld [vmem:[%s9010_s0 + $0x64] sm:$0xf]  ;;  %124 = vst.msk [vmem:[#allocation2 + $0x60] sm:$0xf] %vm99_vm0, %v91_v4  ;;  %v6394_v39 = vld [vmem:[#allocation2 + $0x48] sm:$0xff]  }
  0x34   :  { %v270_v50 = vsel %vm250_vm1, %v265_v46, %v269_v43  ;;  %v273_v56 = vor.u32 %v271_v47, %v269_v43  ;;  %v279_v58 = vshrl.u32 %v6388_v42, 16  ;;  %v425_v59 = vsel %vm418_vm2, %v422_v41, %v424_v52  ;;  %125 = vst.msk [vmem:[#allocation2 + $0x64] sm:$0xf] %vm99_vm0, %v92_v5  ;;  %v93_v7 = vld [vmem:[%s9010_s0 + $0x68] sm:$0xf]  ;;  %v7318_v18 = vld [vmem:[#allocation2 + $0x40] sm:$0xff]  }
  0x35   :  { %v262_v49 = vsel %vm250_vm1, %v257_v45, %v261_v40  ;;  %385 = vrot.lane.b32.xlu1 %v270_v50, %s7104_s18  ;;  %v285_v60 = vrot.slane %v283_v53, 1  ;;  %v426_v61 = vrot.slane %v6389_v44, 1  ;;  %v287_v1 = vshrl.u32 %v6389_v44, 16  ;;  %v94_v11 = vld [vmem:[%s9010_s0 + $0x6c] sm:$0xf]  ;;  %v6395_v44 = vld [vmem:[#allocation2 + $0x50] sm:$0xff]  }
  0x36   :  { %383 = vrot.lane.b32.xlu0 %v262_v49, %s7104_s18  ;;  %v278_v62 = vsel %vm250_vm1, %v273_v56, %v277_v57  ;;  %v281_v63 = vor.u32 %v279_v58, %v277_v57  ;;  %v291_v2 = vshll.u32 %v6390_v54, 16  ;;  %v428_v9 = vrot.slane %v6390_v54, 1  ;;  %126 = vst.msk [vmem:[#allocation2 + $0x68] sm:$0xf] %vm99_vm0, %v93_v7  ;;  %v560_v16 = vld [vmem:[%s9011_s1 + $0x50] sm:$0x33] }
  0x37   :  { %v427_v8 = vsel %vm418_vm2, %v424_v52, %v426_v61  ;;  %v295_v10 = vshrl.u32 %v6390_v54, 16  ;;  %v289_v13 = vor.u32 %v287_v1, %v285_v60  ;;  %v299_v15 = vshll.u32 %v7289_v3, 16  ;;  %127 = vst.msk [vmem:[#allocation2 + $0x6c] sm:$0xf] %vm99_vm0, %v94_v11  ;;  %v95_v23 = vld [vmem:[%s9010_s0 + $0x70] sm:$0xf] }
  0x38   :  { %v286_v12 = vsel %vm250_vm1, %v281_v63, %v285_v60  ;;  %v293_v14 = vrot.slane %v291_v2, 1  ;;  %v430_v17 = vrot.slane %v7289_v3, 1  ;;  %vm661_vm3 = vcmask 1041408   ;;  %v96_v24 = vld [vmem:[%s9010_s0 + $0x74] sm:$0xf]  ;;  %v6396_v54 = vld [vmem:[#allocation2 + $0x58] sm:$0xff]  }
  0x39   :  { %454 = vrot.lane.b32.xlu1 %v423_v55, %s7105_s19  ;;  %v429_v19 = vsel %vm418_vm2, %v426_v61, %v428_v9  ;;  %v303_v20 = vshrl.u32 %v7289_v3, 16  ;;  %v307_v21 = vshll.u32 %v7297_v6, 16  ;;  %v5792_v22 = vcombine.high %v560_v16, %v560_v16  ;;  %128 = vst.msk [vmem:[#allocation2 + $0x70] sm:$0xf] %vm99_vm0, %v95_v23  ;;  %129 = vst.msk [vmem:[#allocation2 + $0x74] sm:$0xf] %vm99_vm0, %v96_v24 }
  0x3a   :  { %452 = vrot.lane.b32.xlu0 %v421_v51, %s7105_s19  ;;  %v294_v25 = vsel %vm250_vm1, %v289_v13, %v293_v14  ;;  %v297_v26 = vor.u32 %v295_v10, %v293_v14  ;;  %v301_v28 = vrot.slane %v299_v15, 1  ;;  %v5791_v29 = vcombine.low %v560_v16, %v560_v16  ;;  %v6401_v30 = vld [vmem:[%s9011_s1 + $0x44] ss:$8 sps:$4 sm:$0xff]   ;;  %v6403_v40 = vld [vmem:[%s9011_s1 + $0x40] ss:$8 sps:$4 sm:$0xff]  }
  0x3b   :  { %5793 = vmatprep.subr.msk.bf16.mxu0 %vm661_vm3, %v5792_v22  ;;  %v431_v32 = vsel %vm418_vm2, %v428_v9, %v430_v17  ;;  %v309_v33 = vrot.slane %v307_v21, 1  ;;  %v315_v34 = vshll.u32 %v7318_v18, 16  ;;  %v432_v37 = vrot.slane %v7297_v6, 1  ;;  %v6404_v41 = vld [vmem:[%s9011_s1 + $0x34] ss:$8 sps:$4 sm:$0xff]   ;;  %v6397_v1 = vld [vmem:[#allocation2 + $0x60] sm:$0xff]  }
  0x3c   :  { %v663_v31 = vsel %vm661_vm3, %v5791_v29, 0  ;;  %v302_v35 = vsel %vm250_vm1, %v297_v26, %v301_v28  ;;  %v305_v36 = vor.u32 %v303_v20, %v301_v28  ;;  %v311_v38 = vshrl.u32 %v7297_v6, 16  ;;  %v97_v42 = vld [vmem:[%s9010_s0 + $0x78] sm:$0xf]  ;;  %v98_v45 = vld [vmem:[%s9010_s0 + $0x7c] sm:$0xf] }
  0x3d   :  { %456 = vrot.lane.b32.xlu1 %v425_v59, %s7105_s19  ;;  %673 = vmatpush1.bf16.msra.mxu0 %v663_v31  ;;  %v434_v43 = vrot.slane %v7318_v18, 1  ;;  %130 = vst.msk [vmem:[#allocation2 + $0x78] sm:$0xf] %vm99_vm0, %v97_v42  ;;  %v317_v46 = vrot.slane %v315_v34, 1  ;;  %v319_v47 = vshrl.u32 %v7318_v18, 16  ;;  %v433_v49 = vsel %vm418_vm2, %v430_v17, %v432_v37  ;;  %s7108_s0 = smov 40  }
  0x3e   :  { %387 = vrot.lane.b32.xlu0 %v278_v62, %s7104_s18  ;;  %674 = vmatprep.subr.bf16.mxu0 %v6401_v30  ;;  %131 = vst.msk [vmem:[#allocation2 + $0x7c] sm:$0xf] %vm99_vm0, %v98_v45  ;;  %v310_v48 = vsel %vm250_vm1, %v305_v36, %v309_v33  ;;  %v313_v50 = vor.u32 %v311_v38, %v309_v33  ;;  %v323_v51 = vshll.u32 %v6394_v39, 16  ;;  %v6406_v52 = vld [vmem:[%s9011_s1 + $0x30] ss:$8 sps:$4 sm:$0xff]   ;;  %v436_v57 = vrot.slane %v6394_v39, 1 }
  0x3f   :  { %v6408_v53 = vld [vmem:[%s9011_s1 + $0x24] ss:$8 sps:$4 sm:$0xff]   ;;  %v6410_v55 = vld [vmem:[%s9011_s1 + $0x20] ss:$8 sps:$4 sm:$0xff]   ;;  %v435_v56 = vsel %vm418_vm2, %v432_v37, %v434_v43  ;;  %v327_v58 = vshrl.u32 %v6394_v39, 16  ;;  %v321_v61 = vor.u32 %v319_v47, %v317_v46  ;;  %v331_v63 = vshll.u32 %v6395_v44, 16 }
  0x40   :  { %v6411_v59 = vld [vmem:[%s9011_s1 + $0x14] ss:$8 sps:$4 sm:$0xff]   ;;  %v318_v60 = vsel %vm250_vm1, %v313_v50, %v317_v46  ;;  %v325_v62 = vrot.slane %v323_v51, 1  ;;  %v6413_v2 = vld [vmem:[%s9011_s1 + $0x10] ss:$8 sps:$4 sm:$0xff]   ;;  %v437_v3 = vsel %vm418_vm2, %v434_v43, %v436_v57  ;;  %v438_v4 = vrot.slane %v6395_v44, 1 }
  0x41   :  { %458 = vrot.lane.b32.xlu1 %v427_v8, %s7105_s19  ;;  %675 = vmatpush1.bf16.msra.mxu0 %v6403_v40  ;;  %v335_v5 = vshrl.u32 %v6395_v44, 16  ;;  %v6415_v6 = vld [vmem:[%s9011_s1 + $0x4] ss:$8 sps:$4 sm:$0xff]   ;;  %v333_v9 = vrot.slane %v331_v63, 1  ;;  %v339_v10 = vshll.u32 %v6396_v54, 16  ;;  %v440_v14 = vrot.slane %v6396_v54, 1 }
  0x42   :  { %389 = vrot.lane.b32.xlu0 %v286_v12, %s7104_s18  ;;  %676 = vmatprep.subr.bf16.mxu0 %v6404_v41  ;;  %v326_v7 = vsel %vm250_vm1, %v321_v61, %v325_v62  ;;  %v329_v8 = vor.u32 %v327_v58, %v325_v62  ;;  %v6400_v11 = vld [vmem:[#allocation2 + $0x68] sm:$0xff]   ;;  %v439_v13 = vsel %vm418_vm2, %v436_v57, %v438_v4  ;;  %v343_v15 = vshrl.u32 %v6396_v54, 16  ;;  %v6407_v20 = vld [vmem:[#allocation2 + $0x70] sm:$0xff]   ;;  %v6418_v37 = vld [vmem:[#allocation2 + $0x80] ss:$0 sps:$4 sm:$0x11]  }
  0x43   :  { %v6417_v12 = vld [vmem:[%s9011_s1] ss:$8 sps:$4 sm:$0xff]   ;;  %v337_v17 = vor.u32 %v335_v5, %v333_v9  ;;  %v341_v18 = vrot.slane %v339_v10, 1  ;;  %v441_v21 = vsel %vm418_vm2, %v438_v4, %v440_v14  ;;  %v442_v23 = vrot.slane %v6397_v1, 1 }
  0x44   :  { %v334_v16 = vsel %vm250_vm1, %v329_v8, %v333_v9  ;;  %v351_v26 = vshrl.u32 %v6397_v1, 16  ;;  %v355_v28 = vshll.u32 %v6400_v11, 16  ;;  %v359_v31 = vshrl.u32 %v6400_v11, 16  ;;  %v7038_v4 = vld [vmem:[#allocation2 + $0x8] sm:$0xff]  }
  0x45   :  { %460 = vrot.lane.b32.xlu1 %v429_v19, %s7105_s19  ;;  %677 = vmatpush1.bf16.msra.mxu0 %v6406_v52  ;;  %v347_v19 = vshll.u32 %v6397_v1, 16  ;;  %v345_v22 = vor.u32 %v343_v15, %v341_v18  ;;  %v342_v24 = vsel %vm250_vm1, %v337_v17, %v341_v18  ;;  %v6414_v29 = vld [vmem:[#allocation2 + $0x78] sm:$0xff]   ;;  %v443_v30 = vsel %vm418_vm2, %v440_v14, %v442_v23 }
  0x46   :  { %391 = vrot.lane.b32.xlu0 %v294_v25, %s7104_s18  ;;  %678 = vmatprep.subr.bf16.mxu0 %v6408_v53  ;;  %v444_v36 = vrot.slane %v6400_v11, 1  ;;  %v446_v40 = vrot.slane %v6407_v20, 1  ;;  %v367_v43 = vshrl.u32 %v6407_v20, 16  ;;  %v371_v44 = vshll.u32 %v6414_v29, 16  ;;  %v7040_v15 = vld [vmem:[#allocation2 + $0x18] sm:$0xff]  }
  0x47   :  { %v349_v25 = vrot.slane %v347_v19, 1  ;;  %v379_v47 = vshll.u32 %v6418_v37, 16  ;;  %v448_v50 = vrot.slane %v6414_v29, 1  ;;  %v375_v51 = vshrl.u32 %v6414_v29, 16 }
  0x48   :  { %v445_v42 = vsel %vm418_vm2, %v442_v23, %v444_v36  ;;  %v447_v46 = vsel %vm418_vm2, %v444_v36, %v446_v40  ;;  %v450_v52 = vrot.slane %v6418_v37, 1  ;;  %vm484_vm4 = vcmask 228352   ;;  %v7044_v36 = vld [vmem:[#allocation2 + $0x28] sm:$0xff]  }
  0x49   :  { %462 = vrot.lane.b32.xlu1 %v431_v32, %s7105_s19  ;;  %679 = vmatpush1.bf16.msra.mxu0 %v6410_v55  ;;  %v363_v32 = vshll.u32 %v6407_v20, 16  ;;  %v350_v33 = vsel %vm250_vm1, %v345_v22, %v349_v25  ;;  %v353_v34 = vor.u32 %v351_v26, %v349_v25  ;;  %v449_v54 = vsel %vm418_vm2, %v446_v40, %v448_v50  ;;  %v7041_v22 = vld [vmem:[#allocation2 + $0x20] sm:$0xff]   ;;  %v7045_v40 = vld [vmem:[#allocation2 + $0x50] sm:$0xff]  }
  0x4a   :  { %393 = vrot.lane.b32.xlu0 %v302_v35, %s7104_s18  ;;  %680 = vmatprep.subr.bf16.mxu0 %v6411_v59  ;;  %v357_v35 = vrot.slane %v355_v28, 1  ;;  %v451_v58 = vsel %vm418_vm2, %v448_v50, %v450_v52  ;;  %vm517_vm5 = vcmask 457728   ;;  %vm628_vm6 = vcmask 687104   ;;  %v7042_v26 = vld [vmem:[#allocation2 + $0x40] sm:$0xff]  }
  0x4b   :  { %v365_v39 = vrot.slane %v363_v32, 1  ;;  %vm1598_vm7 = vcmask 683008   ;;  %vm1117_vm8 = vcmask 359424   ;;  %vm2303_vm10 = vcmask 1045504  }
  0x4c   :  { %v361_v38 = vor.u32 %v359_v31, %v357_v35  ;;  %v358_v41 = vsel %vm250_vm1, %v353_v34, %v357_v35  ;;  %1599 = vst.msk [vmem:[#allocation4] sm:$0xf] %vm1598_vm7, %v9022_v0  ;;  %1600 = vst.msk [vmem:[#allocation4 + $0x44] sm:$0xf] %vm1598_vm7, %v9022_v0  ;;  %vm1750_vm13 = vsmask.f32 3328 }
  0x4d   :  { %464 = vrot.lane.b32.xlu1 %v433_v49, %s7105_s19  ;;  %681 = vmatpush1.bf16.msra.mxu0 %v6413_v2  ;;  %v373_v49 = vrot.slane %v371_v44, 1  ;;  %vm1843_vm14 = vcmask 1042432  }
  0x4e   :  { %395 = vrot.lane.b32.xlu0 %v310_v48, %s7104_s18  ;;  %682 = vmatprep.subr.bf16.mxu0 %v6415_v6  ;;  %v366_v45 = vsel %vm250_vm1, %v361_v38, %v365_v39  ;;  %v369_v48 = vor.u32 %v367_v43, %v365_v39 }
  0x4f   :  { %v377_v55 = vor.u32 %v375_v51, %v373_v49 }
  0x50   :  { %v374_v53 = vsel %vm250_vm1, %v369_v48, %v373_v49  ;;  %v7047_v49 = vld [vmem:[#allocation2 + $0x30] sm:$0xff]  }
  0x51   :  { %466 = vrot.lane.b32.xlu1 %v435_v56, %s7105_s19  ;;  %683 = vmatpush1.bf16.msra.mxu0 %v6417_v12  ;;  %v381_v56 = vrot.slane %v379_v47, 1 }
  0x52   :  { %397 = vrot.lane.b32.xlu0 %v318_v60, %s7104_s18 }
  0x53   :  { %v382_v57 = vsel %vm250_vm1, %v377_v55, %v381_v56 }
  0x55   :  { %468 = vrot.lane.b32.xlu1 %v437_v3, %s7105_s19 }
  0x56   :  { %399 = vrot.lane.b32.xlu0 %v326_v7, %s7104_s18 }
  0x59   :  { %470 = vrot.lane.b32.xlu1 %v439_v13, %s7105_s19 }
  0x5a   :  { %401 = vrot.lane.b32.xlu0 %v334_v16, %s7104_s18 }
  0x5d   :  { %472 = vrot.lane.b32.xlu1 %v441_v21, %s7105_s19 }
  0x5e   :  { %403 = vrot.lane.b32.xlu0 %v342_v24, %s7104_s18 }
  0x61   :  { %474 = vrot.lane.b32.xlu1 %v443_v30, %s7105_s19 }
  0x62   :  { %405 = vrot.lane.b32.xlu0 %v350_v33, %s7104_s18  ;;  %v7043_v33 = vld [vmem:[#allocation2 + $0x48] sm:$0xff]  }
  0x65   :  { %476 = vrot.lane.b32.xlu1 %v445_v42, %s7105_s19 }
  0x66   :  { %407 = vrot.lane.b32.xlu0 %v358_v41, %s7104_s18 }
  0x69   :  { %478 = vrot.lane.b32.xlu1 %v447_v46, %s7105_s19  ;;  %v7046_v46 = vld [vmem:[#allocation2 + $0x58] sm:$0xff]  }
  0x6a   :  { %409 = vrot.lane.b32.xlu0 %v366_v45, %s7104_s18 }
  0x6d   :  { %480 = vrot.lane.b32.xlu1 %v449_v54, %s7105_s19 }
  0x6e   :  { %411 = vrot.lane.b32.xlu0 %v374_v53, %s7104_s18  ;;  %v7048_v53 = vld [vmem:[#allocation2 + $0x60] sm:$0xff]  }
  0x71   :  { %482 = vrot.lane.b32.xlu1 %v451_v58, %s7105_s19 }
  0x72   :  { %413 = vrot.lane.b32.xlu0 %v382_v57, %s7104_s18 }
  0xa7   :  { %v386_v60 = vpop.permute.xlu1 %385 }
  0xa8   :  { %v384_v59 = vpop.permute.xlu0 %383  ;;  %v488_v5 = vsel %vm484_vm4, %v7038_v4, %v386_v60 }
  0xa9   :  { %v486_v61 = vsel %vm484_vm4, %v7275_v27, %v384_v59  ;;  %v7039_v27 = vld [vmem:[#allocation2 + $0x10] sm:$0xff]   ;;  %v7049_v59 = vld [vmem:[#allocation2 + $0x68] sm:$0xff]  }
  0xab   :  { %v455_v63 = vpop.permute.xlu1 %454 }
  0xac   :  { %v453_v62 = vpop.permute.xlu0 %452  ;;  %v521_v8 = vsel %vm517_vm5, %v488_v5, %v455_v63 }
  0xad   :  { %v519_v1 = vsel %vm517_vm5, %v486_v61, %v453_v62  ;;  %v7050_v62 = vld [vmem:[#allocation2 + $0x38] sm:$0xff]  }
  0xae   :  { %5794 = vmatmul.mubr.msk.bf16.vlgmr.msra.gmra.mxu0 %vm628_vm6, %v519_v1 }
  0xaf   :  { %710 = vmatprep.mubr.bf16.mxu0 %v9022_v0  ;;  %v457_v3 = vpop.permute.xlu1 %456 }
  0xb0   :  { %v388_v2 = vpop.permute.xlu0 %387 }
  0xb1   :  { %v490_v9 = vsel %vm484_vm4, %v7039_v27, %v388_v2  ;;  %v7052_v27 = vld [vmem:[#allocation2 + $0x78] sm:$0xff]  }
  0xb2   :  { %v523_v12 = vsel %vm517_vm5, %v490_v9, %v457_v3  ;;  %v7051_v3 = vld [vmem:[#allocation2 + $0x70] sm:$0xff]  }
  0xb3   :  { %v459_v7 = vpop.permute.xlu1 %458 }
  0xb4   :  { %v390_v6 = vpop.permute.xlu0 %389 }
  0xb5   :  { %v492_v16 = vsel %vm484_vm4, %v7040_v15, %v390_v6 }
  0xb6   :  { %5795 = vmatmul.mubr.msk.bf16.gmra.mxu0 %vm628_vm6, %v521_v8  ;;  %v525_v19 = vsel %vm517_vm5, %v492_v16, %v459_v7 }
  0xb7   :  { %720 = vmatprep.mubr.bf16.mxu0 %v9022_v0  ;;  %v461_v11 = vpop.permute.xlu1 %460 }
  0xb8   :  { %v392_v10 = vpop.permute.xlu0 %391 }
  0xb9   :  { %v494_v23 = vsel %vm484_vm4, %v7041_v22, %v392_v10 }
  0xba   :  { %v527_v30 = vsel %vm517_vm5, %v494_v23, %v461_v11  ;;  %v563_v11 = vlaneseq }
  0xbb   :  { %v463_v14 = vpop.permute.xlu1 %462 }
  0xbc   :  { %v394_v13 = vpop.permute.xlu0 %393 }
  0xbd   :  { %v496_v37 = vsel %vm484_vm4, %v7044_v36, %v394_v13 }
  0xbe   :  { %5796 = vmatmul.mubr.msk.bf16.gmra.mxu0 %vm628_vm6, %v523_v12  ;;  %v529_v43 = vsel %vm517_vm5, %v496_v37, %v463_v14  ;;  %v7489_v12 = vshrl.u32 %v563_v11, 7  ;;  %v561_v14 = vld [vmem:[%s9012_s2] sm:$0x3]  ;;  %s7106_s2 = smov 44  }
  0xbf   :  { %730 = vmatprep.mubr.bf16.mxu0 %v9022_v0  ;;  %v465_v18 = vpop.permute.xlu1 %464 }
  0xc0   :  { %v396_v17 = vpop.permute.xlu0 %395  ;;  %v7492_v13 = vsub.s32 0, %v7489_v12  ;;  %v7498_v15 = vsub.s32 1, %v7489_v12 }
  0xc1   :  { %v498_v50 = vsel %vm484_vm4, %v7047_v49, %v396_v17 }
  0xc2   :  { %v531_v56 = vsel %vm517_vm5, %v498_v50, %v465_v18  ;;  %v7501_v16 = vrot.slane %v561_v14, %v7492_v13  ;;  %v7504_v17 = vrot.slane %v561_v14, %v7498_v15 }
  0xc3   :  { %v467_v21 = vpop.permute.xlu1 %466 }
  0xc4   :  { %v398_v20 = vpop.permute.xlu0 %397 }
  0xc5   :  { %v500_v63 = vsel %vm484_vm4, %v7050_v62, %v398_v20 }
  0xc6   :  { %5797 = vmatmul.mubr.msk.bf16.gmra.mxu0 %vm628_vm6, %v525_v19  ;;  %v533_v6 = vsel %vm517_vm5, %v500_v63, %v467_v21 }
  0xc7   :  { %740 = vmatprep.mubr.bf16.mxu0 %v9022_v0  ;;  %v469_v25 = vpop.permute.xlu1 %468 }
  0xc8   :  { %v400_v24 = vpop.permute.xlu0 %399 }
  0xc9   :  { %v502_v28 = vsel %vm484_vm4, %v7042_v26, %v400_v24 }
  0xca   :  { %v535_v29 = vsel %vm517_vm5, %v502_v28, %v469_v25 }
  0xcb   :  { %v471_v32 = vpop.permute.xlu1 %470 }
  0xcc   :  { %v402_v31 = vpop.permute.xlu0 %401 }
  0xcd   :  { %v504_v34 = vsel %vm484_vm4, %v7043_v33, %v402_v31 }
  0xce   :  { %5798 = vmatmul.mubr.msk.bf16.gmra.mxu0 %vm628_vm6, %v527_v30  ;;  %v537_v35 = vsel %vm517_vm5, %v504_v34, %v471_v32 }
  0xcf   :  { %750 = vmatprep.mubr.bf16.mxu0 %v9022_v0  ;;  %v473_v39 = vpop.permute.xlu1 %472 }
  0xd0   :  { %v404_v38 = vpop.permute.xlu0 %403 }
  0xd1   :  { %v506_v41 = vsel %vm484_vm4, %v7045_v40, %v404_v38 }
  0xd2   :  { %v539_v42 = vsel %vm517_vm5, %v506_v41, %v473_v39 }
  0xd3   :  { %v475_v45 = vpop.permute.xlu1 %474 }
  0xd4   :  { %v406_v44 = vpop.permute.xlu0 %405 }
  0xd5   :  { %v508_v47 = vsel %vm484_vm4, %v7046_v46, %v406_v44 }
  0xd6   :  { %5799 = vmatmul.mubr.msk.bf16.gmra.mxu0 %vm628_vm6, %v529_v43  ;;  %v541_v48 = vsel %vm517_vm5, %v508_v47, %v475_v45 }
  0xd7   :  { %760 = vmatprep.mubr.bf16.mxu0 %v9022_v0  ;;  %v477_v52 = vpop.permute.xlu1 %476 }
  0xd8   :  { %v408_v51 = vpop.permute.xlu0 %407 }
  0xd9   :  { %v510_v54 = vsel %vm484_vm4, %v7048_v53, %v408_v51 }
  0xda   :  { %v543_v55 = vsel %vm517_vm5, %v510_v54, %v477_v52 }
  0xdb   :  { %v479_v58 = vpop.permute.xlu1 %478 }
  0xdc   :  { %v410_v57 = vpop.permute.xlu0 %409 }
  0xdd   :  { %v512_v60 = vsel %vm484_vm4, %v7049_v59, %v410_v57 }
  0xde   :  { %5800 = vmatmul.mubr.msk.bf16.gmra.mxu0 %vm628_vm6, %v531_v56  ;;  %v545_v61 = vsel %vm517_vm5, %v512_v60, %v479_v58 }
  0xdf   :  { %770 = vmatprep.mubr.bf16.mxu0 %v9022_v0  ;;  %v481_v2 = vpop.permute.xlu1 %480 }
  0xe0   :  { %v412_v1 = vpop.permute.xlu0 %411 }
  0xe1   :  { %v514_v4 = vsel %vm484_vm4, %v7051_v3, %v412_v1 }
  0xe2   :  { %v547_v5 = vsel %vm517_vm5, %v514_v4, %v481_v2 }
  0xe3   :  { %v483_v8 = vpop.permute.xlu1 %482 }
  0xe4   :  { %v414_v7 = vpop.permute.xlu0 %413 }
  0xe5   :  { %v516_v9 = vsel %vm484_vm4, %v7052_v27, %v414_v7  ;;  %vm1906_vm4 = vcmask 326656  }
  0xe6   :  { %5801 = vmatmul.mubr.msk.bf16.gmra.mxu0 %vm628_vm6, %v533_v6  ;;  %v549_v10 = vsel %vm517_vm5, %v516_v9, %v483_v8  ;;  %vm1969_vm5 = vsmask.f32 4352 }
  0xe7   :  { %780 = vmatprep.mubr.bf16.mxu0 %v9022_v0 }
  0xee   :  { %5802 = vmatmul.mubr.msk.bf16.gmra.mxu0 %vm628_vm6, %v535_v29 }
  0xef   :  { %790 = vmatprep.mubr.bf16.mxu0 %v9022_v0 }
  0xf6   :  { %5803 = vmatmul.mubr.msk.bf16.gmra.mxu0 %vm628_vm6, %v537_v35 }
  0xf7   :  { %800 = vmatprep.mubr.bf16.mxu0 %v9022_v0 }
  0xfe   :  { %5804 = vmatmul.mubr.msk.bf16.gmra.mxu0 %vm628_vm6, %v539_v42 }
  0xff   :  { %810 = vmatprep.mubr.bf16.mxu0 %v9022_v0 }
 0x106   :  { %5805 = vmatmul.mubr.msk.bf16.gmra.mxu0 %vm628_vm6, %v541_v48 }
 0x107   :  { %820 = vmatprep.mubr.bf16.mxu0 %v9022_v0 }
 0x10e   :  { %5806 = vmatmul.mubr.msk.bf16.gmra.mxu0 %vm628_vm6, %v543_v55 }
 0x10f   :  { %830 = vmatprep.mubr.bf16.mxu0 %v9022_v0 }
 0x116   :  { %5807 = vmatmul.mubr.msk.bf16.gmra.mxu0 %vm628_vm6, %v545_v61 }
 0x117   :  { %840 = vmatprep.mubr.bf16.mxu0 %v9022_v0 }
 0x11e   :  { %5808 = vmatmul.mubr.msk.bf16.gmra.mxu0 %vm628_vm6, %v547_v5 }
 0x11f   :  { %850 = vmatprep.mubr.bf16.mxu0 %v9022_v0 }
 0x126   :  { %5809 = vmatmul.mubr.msk.bf16.gmra.mxu0 %vm628_vm6, %v549_v10 }
 0x16e   :  { %v702_v18 = vpop.f32.mrf.mxu0 }
 0x16f   :  { %v7507_v19 = vadd.f32 %v702_v18, %v7501_v16 }
 0x170   :  { %v704_v20 = vpop.f32.mrf.mxu0 }
 0x171   :  { %v861_v21 = vmax.f32 %v7507_v19, 0.0  ;;  %v705_v22 = vadd.f32 %v704_v20, %v7504_v17 }
 0x172   :  { %v706_v23 = vpop.f32.mrf.mxu0 }
 0x173   :  { %v862_v24 = vmax.f32 %v705_v22, 0.0  ;;  %v7512_v25 = vadd.f32 %v706_v23, %v7501_v16  ;;  %989 = vrot.lane.b32.xlu0 %v861_v21, %s7106_s2 }
 0x174   :  { %v708_v26 = vpop.f32.mrf.mxu0 }
 0x175   :  { %v863_v28 = vmax.f32 %v7512_v25, 0.0  ;;  %v709_v29 = vadd.f32 %v708_v26, %v7504_v17  ;;  %991 = vrot.lane.b32.xlu1 %v862_v24, %s7106_s2 }
 0x176   :  { %v712_v30 = vpop.f32.mrf.mxu0 }
 0x177   :  { %v864_v31 = vmax.f32 %v709_v29, 0.0  ;;  %v7521_v32 = vadd.f32 %v712_v30, %v7501_v16  ;;  %993 = vrot.lane.b32.xlu0 %v863_v28, %s7106_s2 }
 0x178   :  { %v714_v33 = vpop.f32.mrf.mxu0 }
 0x179   :  { %v865_v34 = vmax.f32 %v7521_v32, 0.0  ;;  %v715_v35 = vadd.f32 %v714_v33, %v7504_v17  ;;  %995 = vrot.lane.b32.xlu1 %v864_v31, %s7106_s2 }
 0x17a   :  { %v716_v36 = vpop.f32.mrf.mxu0 }
 0x17b   :  { %v866_v37 = vmax.f32 %v715_v35, 0.0  ;;  %v7530_v38 = vadd.f32 %v716_v36, %v7501_v16  ;;  %997 = vrot.lane.b32.xlu0 %v865_v34, %s7106_s2 }
 0x17c   :  { %v718_v39 = vpop.f32.mrf.mxu0 }
 0x17d   :  { %v867_v40 = vmax.f32 %v7530_v38, 0.0  ;;  %v719_v41 = vadd.f32 %v718_v39, %v7504_v17  ;;  %999 = vrot.lane.b32.xlu1 %v866_v37, %s7106_s2  ;;  %v6441_v38 = vld [vmem:[%s9013_s3 + $0x24] ss:$8 sps:$4 sm:$0xff]  }
 0x17e   :  { %v722_v42 = vpop.f32.mrf.mxu0 }
 0x17f   :  { %v868_v43 = vmax.f32 %v719_v41, 0.0  ;;  %v7543_v44 = vadd.f32 %v722_v42, %v7501_v16  ;;  %1001 = vrot.lane.b32.xlu0 %v867_v40, %s7106_s2 }
 0x180   :  { %v724_v45 = vpop.f32.mrf.mxu0 }
 0x181   :  { %v869_v46 = vmax.f32 %v7543_v44, 0.0  ;;  %v725_v47 = vadd.f32 %v724_v45, %v7504_v17  ;;  %1003 = vrot.lane.b32.xlu1 %v868_v43, %s7106_s2  ;;  %v6447_v44 = vld [vmem:[%s9013_s3 + $0x4] ss:$8 sps:$4 sm:$0xff]  }
 0x182   :  { %v726_v48 = vpop.f32.mrf.mxu0 }
 0x183   :  { %v870_v49 = vmax.f32 %v725_v47, 0.0  ;;  %v7552_v50 = vadd.f32 %v726_v48, %v7501_v16  ;;  %1005 = vrot.lane.b32.xlu0 %v869_v46, %s7106_s2 }
 0x184   :  { %v728_v51 = vpop.f32.mrf.mxu0 }
 0x185   :  { %v871_v52 = vmax.f32 %v7552_v50, 0.0  ;;  %v729_v53 = vadd.f32 %v728_v51, %v7504_v17  ;;  %1007 = vrot.lane.b32.xlu1 %v870_v49, %s7106_s2 }
 0x186   :  { %v732_v54 = vpop.f32.mrf.mxu0 }
 0x187   :  { %v872_v55 = vmax.f32 %v729_v53, 0.0  ;;  %v7561_v56 = vadd.f32 %v732_v54, %v7501_v16  ;;  %1009 = vrot.lane.b32.xlu0 %v871_v52, %s7106_s2 }
 0x188   :  { %v734_v57 = vpop.f32.mrf.mxu0 }
 0x189   :  { %v873_v58 = vmax.f32 %v7561_v56, 0.0  ;;  %v735_v59 = vadd.f32 %v734_v57, %v7504_v17  ;;  %1011 = vrot.lane.b32.xlu1 %v872_v55, %s7106_s2 }
 0x18a   :  { %v736_v60 = vpop.f32.mrf.mxu0 }
 0x18b   :  { %v874_v61 = vmax.f32 %v735_v59, 0.0  ;;  %v7570_v62 = vadd.f32 %v736_v60, %v7501_v16  ;;  %1013 = vrot.lane.b32.xlu0 %v873_v58, %s7106_s2 }
 0x18c   :  { %v738_v63 = vpop.f32.mrf.mxu0 }
 0x18d   :  { %v875_v1 = vmax.f32 %v7570_v62, 0.0  ;;  %v739_v2 = vadd.f32 %v738_v63, %v7504_v17  ;;  %1015 = vrot.lane.b32.xlu1 %v874_v61, %s7106_s2  ;;  %v6455_v62 = vld [vmem:[%s9013_s3 + $0xe4] ss:$8 sps:$4 sm:$0xff]  }
 0x18e   :  { %v742_v3 = vpop.f32.mrf.mxu0 }
 0x18f   :  { %v876_v4 = vmax.f32 %v739_v2, 0.0  ;;  %v7579_v5 = vadd.f32 %v742_v3, %v7501_v16  ;;  %1017 = vrot.lane.b32.xlu0 %v875_v1, %s7106_s2 }
 0x190   :  { %v744_v6 = vpop.f32.mrf.mxu0 }
 0x191   :  { %v877_v7 = vmax.f32 %v7579_v5, 0.0  ;;  %v745_v8 = vadd.f32 %v744_v6, %v7504_v17  ;;  %1019 = vrot.lane.b32.xlu1 %v876_v4, %s7106_s2 }
 0x192   :  { %v746_v27 = vpop.f32.mrf.mxu0 }
 0x193   :  { %v878_v9 = vmax.f32 %v745_v8, 0.0  ;;  %v7588_v10 = vadd.f32 %v746_v27, %v7501_v16  ;;  %1021 = vrot.lane.b32.xlu0 %v877_v7, %s7106_s2 }
 0x194   :  { %v748_v11 = vpop.f32.mrf.mxu0 }
 0x195   :  { %v879_v14 = vmax.f32 %v7588_v10, 0.0  ;;  %v749_v18 = vadd.f32 %v748_v11, %v7504_v17  ;;  %1023 = vrot.lane.b32.xlu1 %v878_v9, %s7106_s2  ;;  %v6461_v10 = vld [vmem:[%s9013_s3 + $0xc4] ss:$8 sps:$4 sm:$0xff]  }
 0x196   :  { %v752_v20 = vpop.f32.mrf.mxu0 }
 0x197   :  { %v880_v22 = vmax.f32 %v749_v18, 0.0  ;;  %v7597_v23 = vadd.f32 %v752_v20, %v7501_v16  ;;  %1025 = vrot.lane.b32.xlu0 %v879_v14, %s7106_s2 }
 0x198   :  { %v754_v24 = vpop.f32.mrf.mxu0 }
 0x199   :  { %v881_v26 = vmax.f32 %v7597_v23, 0.0  ;;  %v755_v29 = vadd.f32 %v754_v24, %v7504_v17  ;;  %1027 = vrot.lane.b32.xlu1 %v880_v22, %s7106_s2 }
 0x19a   :  { %v756_v30 = vpop.f32.mrf.mxu0 }
 0x19b   :  { %v882_v31 = vmax.f32 %v755_v29, 0.0  ;;  %v7606_v33 = vadd.f32 %v756_v30, %v7501_v16  ;;  %1029 = vrot.lane.b32.xlu0 %v881_v26, %s7106_s2 }
 0x19c   :  { %v758_v35 = vpop.f32.mrf.mxu0 }
 0x19d   :  { %v883_v36 = vmax.f32 %v7606_v33, 0.0  ;;  %v759_v37 = vadd.f32 %v758_v35, %v7504_v17  ;;  %1031 = vrot.lane.b32.xlu1 %v882_v31, %s7106_s2  ;;  %v6467_v33 = vld [vmem:[%s9013_s3 + $0xa4] ss:$8 sps:$4 sm:$0xff]  }
 0x19e   :  { %v762_v39 = vpop.f32.mrf.mxu0 }
 0x19f   :  { %v884_v41 = vmax.f32 %v759_v37, 0.0  ;;  %v7615_v42 = vadd.f32 %v762_v39, %v7501_v16  ;;  %1033 = vrot.lane.b32.xlu0 %v883_v36, %s7106_s2 }
 0x1a0   :  { %v764_v43 = vpop.f32.mrf.mxu0 }
 0x1a1   :  { %v885_v45 = vmax.f32 %v7615_v42, 0.0  ;;  %v765_v47 = vadd.f32 %v764_v43, %v7504_v17  ;;  %1035 = vrot.lane.b32.xlu1 %v884_v41, %s7106_s2  ;;  %v6470_v42 = vld [vmem:[%s9013_s3 + $0x94] ss:$8 sps:$4 sm:$0xff]  }
 0x1a2   :  { %v766_v48 = vpop.f32.mrf.mxu0 }
 0x1a3   :  { %v886_v49 = vmax.f32 %v765_v47, 0.0  ;;  %v7624_v51 = vadd.f32 %v766_v48, %v7501_v16  ;;  %1037 = vrot.lane.b32.xlu0 %v885_v45, %s7106_s2 }
 0x1a4   :  { %v768_v53 = vpop.f32.mrf.mxu0 }
 0x1a5   :  { %v887_v54 = vmax.f32 %v7624_v51, 0.0  ;;  %v769_v55 = vadd.f32 %v768_v53, %v7504_v17  ;;  %1039 = vrot.lane.b32.xlu1 %v886_v49, %s7106_s2  ;;  %v6473_v51 = vld [vmem:[%s9013_s3 + $0x84] ss:$8 sps:$4 sm:$0xff]  }
 0x1a6   :  { %v772_v57 = vpop.f32.mrf.mxu0 }
 0x1a7   :  { %v888_v59 = vmax.f32 %v769_v55, 0.0  ;;  %v7633_v60 = vadd.f32 %v772_v57, %v7501_v16  ;;  %1041 = vrot.lane.b32.xlu0 %v887_v54, %s7106_s2 }
 0x1a8   :  { %v774_v61 = vpop.f32.mrf.mxu0 }
 0x1a9   :  { %v889_v63 = vmax.f32 %v7633_v60, 0.0  ;;  %v775_v2 = vadd.f32 %v774_v61, %v7504_v17  ;;  %1043 = vrot.lane.b32.xlu1 %v888_v59, %s7106_s2 }
 0x1aa   :  { %v776_v3 = vpop.f32.mrf.mxu0 }
 0x1ab   :  { %v890_v4 = vmax.f32 %v775_v2, 0.0  ;;  %v7642_v6 = vadd.f32 %v776_v3, %v7501_v16  ;;  %1045 = vrot.lane.b32.xlu0 %v889_v63, %s7106_s2 }
 0x1ac   :  { %v778_v8 = vpop.f32.mrf.mxu0 }
 0x1ad   :  { %v9037_v27 = vmax.f32 %v7642_v6, 0.0  ;;  %v779_v9 = vadd.f32 %v778_v8, %v7504_v17  ;;  %1047 = vrot.lane.b32.xlu1 %v890_v4, %s7106_s2 }
 0x1ae   :  { %v782_v11 = vpop.f32.mrf.mxu0 }
 0x1af   :  { %v892_v18 = vmax.f32 %v779_v9, 0.0  ;;  %v7651_v20 = vadd.f32 %v782_v11, %v7501_v16  ;;  %1049 = vrot.lane.b32.xlu0 %v9037_v27, %s7106_s2 }
 0x1b0   :  { %v784_v22 = vpop.f32.mrf.mxu0 }
 0x1b1   :  { %v9036_v24 = vmax.f32 %v7651_v20, 0.0  ;;  %v785_v29 = vadd.f32 %v784_v22, %v7504_v17  ;;  %1051 = vrot.lane.b32.xlu1 %v892_v18, %s7106_s2 }
 0x1b2   :  { %v786_v30 = vpop.f32.mrf.mxu0 }
 0x1b3   :  { %v894_v31 = vmax.f32 %v785_v29, 0.0  ;;  %v7660_v35 = vadd.f32 %v786_v30, %v7501_v16  ;;  %1053 = vrot.lane.b32.xlu0 %v9036_v24, %s7106_s2 }
 0x1b4   :  { %v788_v37 = vpop.f32.mrf.mxu0 }
 0x1b5   :  { %v9035_v39 = vmax.f32 %v7660_v35, 0.0  ;;  %v789_v41 = vadd.f32 %v788_v37, %v7504_v17  ;;  %1055 = vrot.lane.b32.xlu1 %v894_v31, %s7106_s2 }
 0x1b6   :  { %v792_v43 = vpop.f32.mrf.mxu0 }
 0x1b7   :  { %v896_v47 = vmax.f32 %v789_v41, 0.0  ;;  %v7669_v48 = vadd.f32 %v792_v43, %v7501_v16  ;;  %1057 = vrot.lane.b32.xlu0 %v9035_v39, %s7106_s2 }
 0x1b8   :  { %v794_v49 = vpop.f32.mrf.mxu0 }
 0x1b9   :  { %v9034_v53 = vmax.f32 %v7669_v48, 0.0  ;;  %v795_v55 = vadd.f32 %v794_v49, %v7504_v17  ;;  %1059 = vrot.lane.b32.xlu1 %v896_v47, %s7106_s2 }
 0x1ba   :  { %v796_v57 = vpop.f32.mrf.mxu0 }
 0x1bb   :  { %v898_v59 = vmax.f32 %v795_v55, 0.0  ;;  %v7678_v61 = vadd.f32 %v796_v57, %v7501_v16  ;;  %1061 = vrot.lane.b32.xlu0 %v9034_v53, %s7106_s2 }
 0x1bc   :  { %v798_v2 = vpop.f32.mrf.mxu0 }
 0x1bd   :  { %v9033_v3 = vmax.f32 %v7678_v61, 0.0  ;;  %v799_v4 = vadd.f32 %v798_v2, %v7504_v17  ;;  %1063 = vrot.lane.b32.xlu1 %v898_v59, %s7106_s2 }
 0x1be   :  { %v802_v8 = vpop.f32.mrf.mxu0 }
 0x1bf   :  { %v900_v9 = vmax.f32 %v799_v4, 0.0  ;;  %v7687_v11 = vadd.f32 %v802_v8, %v7501_v16  ;;  %1065 = vrot.lane.b32.xlu0 %v9033_v3, %s7106_s2 }
 0x1c0   :  { %v804_v18 = vpop.f32.mrf.mxu0 }
 0x1c1   :  { %v9030_v22 = vmax.f32 %v7687_v11, 0.0  ;;  %v805_v29 = vadd.f32 %v804_v18, %v7504_v17  ;;  %1067 = vrot.lane.b32.xlu1 %v900_v9, %s7106_s2 }
 0x1c2   :  { %v806_v30 = vpop.f32.mrf.mxu0 }
 0x1c3   :  { %v902_v31 = vmax.f32 %v805_v29, 0.0  ;;  %v7696_v37 = vadd.f32 %v806_v30, %v7501_v16  ;;  %1069 = vrot.lane.b32.xlu0 %v9030_v22, %s7106_s2 }
 0x1c4   :  { %v808_v41 = vpop.f32.mrf.mxu0 }
 0x1c5   :  { %v9028_v43 = vmax.f32 %v7696_v37, 0.0  ;;  %v809_v47 = vadd.f32 %v808_v41, %v7504_v17  ;;  %1071 = vrot.lane.b32.xlu1 %v902_v31, %s7106_s2 }
 0x1c6   :  { %v812_v49 = vpop.f32.mrf.mxu0 }
 0x1c7   :  { %v904_v55 = vmax.f32 %v809_v47, 0.0  ;;  %v7705_v57 = vadd.f32 %v812_v49, %v7501_v16  ;;  %1073 = vrot.lane.b32.xlu0 %v9028_v43, %s7106_s2 }
 0x1c8   :  { %v814_v59 = vpop.f32.mrf.mxu0 }
 0x1c9   :  { %v9026_v2 = vmax.f32 %v7705_v57, 0.0  ;;  %v815_v4 = vadd.f32 %v814_v59, %v7504_v17  ;;  %1075 = vrot.lane.b32.xlu1 %v904_v55, %s7106_s2 }
 0x1ca   :  { %v816_v8 = vpop.f32.mrf.mxu0 }
 0x1cb   :  { %v906_v9 = vmax.f32 %v815_v4, 0.0  ;;  %v7714_v18 = vadd.f32 %v816_v8, %v7501_v16  ;;  %1077 = vrot.lane.b32.xlu0 %v9026_v2, %s7106_s2 }
 0x1cc   :  { %v818_v29 = vpop.f32.mrf.mxu0 }
 0x1cd   :  { %v9024_v30 = vmax.f32 %v7714_v18, 0.0  ;;  %v819_v31 = vadd.f32 %v818_v29, %v7504_v17  ;;  %1079 = vrot.lane.b32.xlu1 %v906_v9, %s7106_s2 }
 0x1ce   :  { %v822_v41 = vpop.f32.mrf.mxu0 }
 0x1cf   :  { %v908_v47 = vmax.f32 %v819_v31, 0.0  ;;  %v7723_v49 = vadd.f32 %v822_v41, %v7501_v16  ;;  %1081 = vrot.lane.b32.xlu0 %v9024_v30, %s7106_s2 }
 0x1d0   :  { %v824_v55 = vpop.f32.mrf.mxu0 }
 0x1d1   :  { %v9025_v59 = vmax.f32 %v7723_v49, 0.0  ;;  %v825_v4 = vadd.f32 %v824_v55, %v7504_v17  ;;  %1083 = vrot.lane.b32.xlu1 %v908_v47, %s7106_s2 }
 0x1d2   :  { %v826_v8 = vpop.f32.mrf.mxu0 }
 0x1d3   :  { %v910_v29 = vmax.f32 %v825_v4, 0.0  ;;  %v7732_v9 = vadd.f32 %v826_v8, %v7501_v16  ;;  %1085 = vrot.lane.b32.xlu0 %v9025_v59, %s7106_s2 }
 0x1d4   :  { %v828_v31 = vpop.f32.mrf.mxu0 }
 0x1d5   :  { %v9027_v41 = vmax.f32 %v7732_v9, 0.0  ;;  %v829_v0 = vadd.f32 %v828_v31, %v7504_v17  ;;  %1087 = vrot.lane.b32.xlu1 %v910_v29, %s7106_s2 }
 0x1d6   :  { %v832_v30 = vpop.f32.mrf.mxu0 }
 0x1d7   :  { %v912_v55 = vmax.f32 %v829_v0, 0.0  ;;  %v7741_v47 = vadd.f32 %v832_v30, %v7501_v16  ;;  %1089 = vrot.lane.b32.xlu0 %v9027_v41, %s7106_s2 }
 0x1d8   :  { %v834_v4 = vpop.f32.mrf.mxu0 }
 0x1d9   :  { %v9029_v8 = vmax.f32 %v7741_v47, 0.0  ;;  %v835_v59 = vadd.f32 %v834_v4, %v7504_v17  ;;  %1091 = vrot.lane.b32.xlu1 %v912_v55, %s7106_s2 }
 0x1da   :  { %v836_v2 = vpop.f32.mrf.mxu0 }
 0x1db   :  { %v914_v31 = vmax.f32 %v835_v59, 0.0  ;;  %v7750_v29 = vadd.f32 %v836_v2, %v7501_v16  ;;  %1093 = vrot.lane.b32.xlu0 %v9029_v8, %s7106_s2 }
 0x1dc   :  { %v838_v0 = vpop.f32.mrf.mxu0 }
 0x1dd   :  { %v9031_v30 = vmax.f32 %v7750_v29, 0.0  ;;  %v839_v41 = vadd.f32 %v838_v0, %v7504_v17  ;;  %1095 = vrot.lane.b32.xlu1 %v914_v31, %s7106_s2 }
 0x1de   :  { %v842_v43 = vpop.f32.mrf.mxu0 }
 0x1df   :  { %v916_v4 = vmax.f32 %v839_v41, 0.0  ;;  %v7759_v55 = vadd.f32 %v842_v43, %v7501_v16  ;;  %1097 = vrot.lane.b32.xlu0 %v9031_v30, %s7106_s2  ;;  %v6425_v43 = vld [vmem:[%s9013_s3 + $0x74] ss:$8 sps:$4 sm:$0xff]  }
 0x1e0   :  { %v844_v2 = vpop.f32.mrf.mxu0  ;;  %2310 = vmatprep.subr.bf16.mxu1 %v6425_v43 }
 0x1e1   :  { %v9032_v59 = vmax.f32 %v7759_v55, 0.0  ;;  %v845_v8 = vadd.f32 %v844_v2, %v7504_v17  ;;  %1099 = vrot.lane.b32.xlu1 %v916_v4, %s7106_s2  ;;  %v6427_v2 = vld [vmem:[%s9013_s3 + $0x70] ss:$8 sps:$4 sm:$0xff]  }
 0x1e2   :  { %v846_v22 = vpop.f32.mrf.mxu0  ;;  %2311 = vmatpush1.bf16.msra.mxu1 %v6427_v2 }
 0x1e3   :  { %v918_v0 = vmax.f32 %v845_v8, 0.0  ;;  %1101 = vrot.lane.b32.xlu0 %v9032_v59, %s7106_s2 }
 0x1e4   :  { %v848_v41 = vpop.f32.mrf.mxu0 }
 0x1e5   :  { %1103 = vrot.lane.b32.xlu1 %v918_v0, %s7106_s2  ;;  %v990_v31 = vpop.permute.xlu0 %989  ;;  %v6428_v0 = vld [vmem:[%s9013_s3 + $0x64] ss:$8 sps:$4 sm:$0xff]  }
 0x1e6   :  { %v852_v4 = vpop.f32.mrf.mxu0  ;;  %2312 = vmatprep.subr.bf16.mxu1 %v6428_v0 }
 0x1e7   :  { %v7778_v8 = vadd.f32 %v852_v4, %v7501_v16  ;;  %v992_v30 = vpop.permute.xlu1 %991  ;;  %v6430_v4 = vld [vmem:[%s9013_s3 + $0x60] ss:$8 sps:$4 sm:$0xff]  }
 0x1e8   :  { %v1118_v59 = vsel %vm1117_vm8, %v990_v31, %v992_v30  ;;  %v854_v3 = vpop.f32.mrf.mxu0  ;;  %2313 = vmatpush1.bf16.msra.mxu1 %v6430_v4 }
 0x1e9   :  { %v921_v53 = vmax.f32 %v7778_v8, 0.0  ;;  %v1182_v39 = vmax.f32 %v861_v21, %v1118_v59  ;;  %v855_v24 = vadd.f32 %v854_v3, %v7504_v17  ;;  %v994_v43 = vpop.permute.xlu0 %993  ;;  %v6431_v3 = vld [vmem:[%s9013_s3 + $0x54] ss:$8 sps:$4 sm:$0xff]   ;;  %v7803_v59 = vadd.f32 %v846_v22, %v7501_v16 }
 0x1ea   :  { %v856_v2 = vpop.f32.mrf.mxu0  ;;  %2314 = vmatprep.subr.bf16.mxu1 %v6431_v3 }
 0x1eb   :  { %1214 = vst.msk [vmem:[#allocation3] sm:$0xff] %vm628_vm6, %v1182_v39  ;;  %v922_v30 = vmax.f32 %v855_v24, 0.0  ;;  %v7793_v31 = vadd.f32 %v856_v2, %v7501_v16  ;;  %v996_v27 = vpop.permute.xlu1 %995  ;;  %1109 = vrot.lane.b32.xlu0 %v921_v53, %s7106_s2  ;;  %v919_v2 = vmax.f32 %v7803_v59, 0.0 }
 0x1ec   :  { %v1119_v19 = vsel %vm1117_vm8, %v994_v43, %v996_v27  ;;  %v858_v21 = vpop.f32.mrf.mxu0  ;;  %v6433_v27 = vld [vmem:[%s9013_s3 + $0x50] ss:$8 sps:$4 sm:$0xff]   ;;  %v849_v43 = vadd.f32 %v848_v41, %v7504_v17 }
 0x1ed   :  { %v923_v24 = vmax.f32 %v7793_v31, 0.0  ;;  %v1183_v39 = vmax.f32 %v863_v28, %v1119_v19  ;;  %v859_v0 = vadd.f32 %v858_v21, %v7504_v17  ;;  %1111 = vrot.lane.b32.xlu1 %v922_v30, %s7106_s2  ;;  %v998_v4 = vpop.permute.xlu0 %997  ;;  %2315 = vmatpush1.bf16.msra.mxu1 %v6433_v27  ;;  %v6434_v28 = vld [vmem:[%s9013_s3 + $0x44] ss:$8 sps:$4 sm:$0xff]   ;;  %v6437_v30 = vld [vmem:[%s9013_s3 + $0x40] ss:$8 sps:$4 sm:$0xff]  }
 0x1ee   :  { %2316 = vmatprep.subr.bf16.mxu1 %v6434_v28  ;;  %v920_v19 = vmax.f32 %v849_v43, 0.0  ;;  %v1327_v43 = vadd.s32 8, %v7489_v12  ;;  %v6444_v28 = vld [vmem:[%s9013_s3 + $0x14] ss:$8 sps:$4 sm:$0xff]  }
 0x1ef   :  { %1215 = vst.msk [vmem:[#allocation3 + $0x8] sm:$0xff] %vm628_vm6, %v1183_v39  ;;  %v924_v16 = vmax.f32 %v859_v0, 0.0  ;;  %v1000_v22 = vpop.permute.xlu1 %999  ;;  %1113 = vrot.lane.b32.xlu0 %v923_v24, %s7106_s2  ;;  %v6440_v0 = vld [vmem:[%s9013_s3 + $0x30] ss:$8 sps:$4 sm:$0xff]  }
 0x1f0   :  { %v1120_v25 = vsel %vm1117_vm8, %v998_v4, %v1000_v22 }
 0x1f1   :  { %v1184_v17 = vmax.f32 %v865_v34, %v1120_v25  ;;  %1115 = vrot.lane.b32.xlu1 %v924_v16, %s7106_s2  ;;  %v1002_v41 = vpop.permute.xlu0 %1001  ;;  %2317 = vmatpush1.bf16.msra.mxu1 %v6437_v30  ;;  %v6438_v34 = vld [vmem:[%s9013_s3 + $0x34] ss:$8 sps:$4 sm:$0xff]  }
 0x1f2   :  { %2318 = vmatprep.subr.bf16.mxu1 %v6438_v34 }
 0x1f3   :  { %1216 = vst.msk [vmem:[#allocation3 + $0x10] sm:$0xff] %vm628_vm6, %v1184_v17  ;;  %v1004_v21 = vpop.permute.xlu1 %1003  ;;  %1105 = vrot.lane.b32.xlu0 %v919_v2, %s7106_s2 }
 0x1f4   :  { %v1121_v32 = vsel %vm1117_vm8, %v1002_v41, %v1004_v21 }
 0x1f5   :  { %v1185_v3 = vmax.f32 %v867_v40, %v1121_v32  ;;  %1107 = vrot.lane.b32.xlu1 %v920_v19, %s7106_s2  ;;  %v1006_v39 = vpop.permute.xlu0 %1005  ;;  %2319 = vmatpush1.bf16.msra.mxu1 %v6440_v0  ;;  %v6443_v40 = vld [vmem:[%s9013_s3 + $0x20] ss:$8 sps:$4 sm:$0xff]   ;;  %v1353_v19 = vand.u32 15, %v1327_v43  ;;  %v6446_v32 = vld [vmem:[%s9013_s3 + $0x10] ss:$8 sps:$4 sm:$0xff]  }
 0x1f6   :  { %v1246_v4 = vld [vmem:[#allocation3] ss:$2 sm:$0xff]  ;;  %v1278_v27 = vld [vmem:[#allocation3 + $0x1] ss:$2 sm:$0xff]  ;;  %2320 = vmatprep.subr.bf16.mxu1 %v6441_v38 }
 0x1f7   :  { %v1309_v16 = vmax.f32 %v1246_v4, %v1278_v27  ;;  %1217 = vst.msk [vmem:[#allocation3 + $0x18] sm:$0xff] %vm628_vm6, %v1185_v3  ;;  %v1008_v22 = vpop.permute.xlu1 %1007  ;;  %vm1535_vm9 = vcmp.lt.s32.totalorder %v1353_v19, 14  ;;  %v6449_v43 = vld [vmem:[%s9013_s3] ss:$8 sps:$4 sm:$0xff]  }
 0x1f8   :  { %v1122_v25 = vsel %vm1117_vm8, %v1006_v39, %v1008_v22 }
 0x1f9   :  { %v6312_v17 = vpack.c.bf16 %v1309_v16, %v1309_v16  ;;  %v1186_v41 = vmax.f32 %v869_v46, %v1122_v25  ;;  %v1010_v30 = vpop.permute.xlu0 %1009  ;;  %2321 = vmatpush1.bf16.msra.mxu1 %v6443_v40 }
 0x1fa   :  { %2322 = vmatprep.subr.bf16.mxu1 %v6444_v28  ;;  %v6451_v28 = vld [vmem:[%s9013_s3 + $0xf4] ss:$8 sps:$4 sm:$0x3f]  }
 0x1fb   :  { %1218 = vst.msk [vmem:[#allocation3 + $0x20] sm:$0xff] %vm628_vm6, %v1186_v41  ;;  %v1012_v21 = vpop.permute.xlu1 %1011  ;;  %v6453_v41 = vld [vmem:[%s9013_s3 + $0xf0] ss:$8 sps:$4 sm:$0x3f]  }
 0x1fc   :  { %1665 = vst.msk [vmem:[#allocation4 + $0x4] sm:$0xf] %vm1598_vm7, %v6312_v17  ;;  %v1123_v34 = vsel %vm1117_vm8, %v1010_v30, %v1012_v21  ;;  %v1329_v17 = vadd.s32 24, %v7489_v12 }
 0x1fd   :  { %v1187_v46 = vmax.f32 %v871_v52, %v1123_v34  ;;  %v1014_v3 = vpop.permute.xlu0 %1013  ;;  %2323 = vmatpush1.bf16.msra.mxu1 %v6446_v32  ;;  %v2305_v34 = vsel %vm2303_vm10, %v6453_v41, 0 }
 0x1fe   :  { %v1248_v39 = vld [vmem:[#allocation3 + $0x10] ss:$2 sm:$0xff]  ;;  %v1280_v0 = vld [vmem:[#allocation3 + $0x11] ss:$2 sm:$0xff]  ;;  %2324 = vmatprep.subr.bf16.mxu1 %v6447_v44 }
 0x1ff   :  { %v1310_v4 = vmax.f32 %v1248_v39, %v1280_v0  ;;  %1219 = vst.msk [vmem:[#allocation3 + $0x28] sm:$0xff] %vm628_vm6, %v1187_v46  ;;  %v1016_v27 = vpop.permute.xlu1 %1015  ;;  %v1367_v46 = vand.u32 15, %v1329_v17  ;;  %v6457_v0 = vld [vmem:[%s9013_s3 + $0xe0] ss:$8 sps:$4 sm:$0xff]  }
 0x200   :  { %v1124_v16 = vsel %vm1117_vm8, %v1014_v3, %v1016_v27 }
 0x201   :  { %v1583_v22 = vsel %vm1535_vm9, %v1310_v4, 0.0  ;;  %v1188_v50 = vmax.f32 %v873_v58, %v1124_v16  ;;  %v1018_v52 = vpop.permute.xlu0 %1017  ;;  %2325 = vmatpush1.bf16.msra.mxu1 %v6449_v43  ;;  %vm7911_vm11 = vcmp.lt.s32.totalorder %v1367_v46, 14 }
 0x202   :  { %v6313_v38 = vpack.c.bf16 %v1583_v22, %v1583_v22  ;;  %5876 = vmatprep.subr.msk.bf16.mxu1 %vm2303_vm10, %v6451_v28 }
 0x203   :  { %1220 = vst.msk [vmem:[#allocation3 + $0x30] sm:$0xff] %vm628_vm6, %v1188_v50  ;;  %v1020_v40 = vpop.permute.xlu1 %1019  ;;  %v7899_v27 = vld [vmem:[#allocation4 + $0x4] sm:$0xf] }
 0x204   :  { %1666 = vst.msk [vmem:[#allocation4 + $0x8] sm:$0xf] %vm1598_vm7, %v6313_v38  ;;  %v1125_v25 = vsel %vm1117_vm8, %v1018_v52, %v1020_v40  ;;  %v6460_v38 = vld [vmem:[%s9013_s3 + $0xd0] ss:$8 sps:$4 sm:$0xff]  }
 0x205   :  { %v1189_v56 = vmax.f32 %v875_v1, %v1125_v25  ;;  %v1022_v58 = vpop.permute.xlu0 %1021  ;;  %2327 = vmatpush2.bf16.msra.mxu1 %v2305_v34 }
 0x206   :  { %v1250_v30 = vld [vmem:[#allocation3 + $0x20] ss:$2 sm:$0xff]  ;;  %v1282_v19 = vld [vmem:[#allocation3 + $0x21] ss:$2 sm:$0xff]  ;;  %2328 = vmatprep.subr.bf16.mxu1 %v6455_v62 }
 0x207   :  { %v1311_v21 = vmax.f32 %v1250_v30, %v1282_v19  ;;  %1221 = vst.msk [vmem:[#allocation3 + $0x38] sm:$0xff] %vm628_vm6, %v1189_v56  ;;  %v1024_v32 = vpop.permute.xlu1 %1023  ;;  %v6463_v19 = vld [vmem:[%s9013_s3 + $0xc0] ss:$8 sps:$4 sm:$0xff]  }
 0x208   :  { %v1126_v44 = vsel %vm1117_vm8, %v1022_v58, %v1024_v32 }
 0x209   :  { %v6314_v1 = vpack.c.bf16 %v1311_v21, %v1311_v21  ;;  %v1190_v3 = vmax.f32 %v877_v7, %v1126_v44  ;;  %v1026_v39 = vpop.permute.xlu0 %1025  ;;  %2329 = vmatpush2.bf16.msra.mxu1 %v6457_v0  ;;  %v6458_v7 = vld [vmem:[%s9013_s3 + $0xd4] ss:$8 sps:$4 sm:$0xff]   ;;  %v1331_v0 = vadd.s32 40, %v7489_v12 }
 0x20a   :  { %2330 = vmatprep.subr.bf16.mxu1 %v6458_v7  ;;  %v6464_v44 = vld [vmem:[%s9013_s3 + $0xb4] ss:$8 sps:$4 sm:$0xff]  }
 0x20b   :  { %1667 = vst.msk [vmem:[#allocation4 + $0xc] sm:$0xf] %vm1598_vm7, %v6314_v1  ;;  %v1028_v4 = vpop.permute.xlu1 %1027  ;;  %v7901_v43 = vld [vmem:[#allocation4 + $0x8] sm:$0xf] }
 0x20c   :  { %1222 = vst.msk [vmem:[#allocation3 + $0x40] sm:$0xff] %vm628_vm6, %v1190_v3  ;;  %v1127_v16 = vsel %vm1117_vm8, %v1026_v39, %v1028_v4  ;;  %v7906_v5 = vcombine.low %v7899_v27, %v7901_v43 }
 0x20d   :  { %v1191_v50 = vmax.f32 %v879_v14, %v1127_v16  ;;  %v1030_v52 = vpop.permute.xlu0 %1029  ;;  %2331 = vmatpush2.bf16.msra.mxu1 %v6460_v38 }
 0x20e   :  { %v1252_v40 = vld [vmem:[#allocation3 + $0x30] ss:$2 sm:$0xff]  ;;  %v1284_v25 = vld [vmem:[#allocation3 + $0x31] ss:$2 sm:$0xff]  ;;  %v1752_v28 = vshrl.u32 %v7906_v5, 16  ;;  %v1755_v17 = vshll.u32 %v7906_v5, 16  ;;  %2332 = vmatprep.subr.bf16.mxu1 %v6461_v10 }
 0x20f   :  { %v1312_v56 = vmax.f32 %v1252_v40, %v1284_v25  ;;  %1223 = vst.msk [vmem:[#allocation3 + $0x48] sm:$0xff] %vm628_vm6, %v1191_v50  ;;  %v1032_v58 = vpop.permute.xlu1 %1031  ;;  %v1844_v50 = vrot.slane %v7906_v5, 5  ;;  %v1381_v25 = vand.u32 15, %v1331_v0 }
 0x210   :  { %v1128_v14 = vsel %vm1117_vm8, %v1030_v52, %v1032_v58  ;;  %v1754_v41 = vrot.slane %v1752_v28, 4  ;;  %v1757_v30 = vrot.slane %v1755_v17, 5 }
 0x211   :  { %v1585_v21 = vsel %vm7911_vm11, %v1312_v56, 0.0  ;;  %v1192_v32 = vmax.f32 %v881_v26, %v1128_v14  ;;  %v1034_v34 = vpop.permute.xlu0 %1033  ;;  %2333 = vmatpush2.bf16.msra.mxu1 %v6463_v19  ;;  %v6466_v26 = vld [vmem:[%s9013_s3 + $0xb0] ss:$8 sps:$4 sm:$0xff]   ;;  %v6469_v56 = vld [vmem:[%s9013_s3 + $0xa0] ss:$8 sps:$4 sm:$0xff]   ;;  %vm7980_vm12 = vcmp.lt.s32.totalorder %v1381_v25, 14 }
 0x212   :  { %v6315_v62 = vpack.c.bf16 %v1585_v21, %v1585_v21  ;;  %v7937_v1 = vor.u32 %v1757_v30, %v1754_v41  ;;  %v7939_v46 = vld [vmem:[#allocation4 + $0xc] sm:$0xf]  ;;  %2334 = vmatprep.subr.bf16.mxu1 %v6464_v44 }
 0x213   :  { %1224 = vst.msk [vmem:[#allocation3 + $0x50] sm:$0xff] %vm628_vm6, %v1192_v32  ;;  %v1036_v3 = vpop.permute.xlu1 %1035  ;;  %v5827_v39 = vcombine.low %v7901_v43, %v7939_v46  ;;  %v6472_v21 = vld [vmem:[%s9013_s3 + $0x90] ss:$8 sps:$4 sm:$0xff]  }
 0x214   :  { %1668 = vst.msk [vmem:[#allocation4 + $0x10] sm:$0xf] %vm1598_vm7, %v6315_v62  ;;  %v1129_v23 = vsel %vm1117_vm8, %v1034_v34, %v1036_v3  ;;  %1822 = vrot.lane.b32.xlu0 %v7937_v1, %s7107_s25 }
 0x215   :  { %v1193_v4 = vmax.f32 %v883_v36, %v1129_v23  ;;  %v1038_v16 = vpop.permute.xlu0 %1037  ;;  %2335 = vmatpush2.bf16.msra.mxu1 %v6466_v26 }
 0x216   :  { %v1254_v7 = vld [vmem:[#allocation3 + $0x40] ss:$2 sm:$0xff]  ;;  %v1286_v22 = vld [vmem:[#allocation3 + $0x41] ss:$2 sm:$0xff]  ;;  %2336 = vmatprep.subr.bf16.mxu1 %v6467_v33 }
 0x217   :  { %v1313_v52 = vmax.f32 %v1254_v7, %v1286_v22  ;;  %1225 = vst.msk [vmem:[#allocation3 + $0x58] sm:$0xff] %vm628_vm6, %v1193_v4  ;;  %v1040_v38 = vpop.permute.xlu1 %1039  ;;  %v6475_v4 = vld [vmem:[%s9013_s3 + $0x80] ss:$8 sps:$4 sm:$0xff]  }
 0x218   :  { %v1130_v40 = vsel %vm1117_vm8, %v1038_v16, %v1040_v38  ;;  %1861 = vrot.lane.b32.xlu0 %v1844_v50, %s7108_s0 }
 0x219   :  { %v6316_v36 = vpack.c.bf16 %v1313_v52, %v1313_v52  ;;  %v1194_v28 = vmax.f32 %v885_v45, %v1130_v40  ;;  %v1042_v17 = vpop.permute.xlu0 %1041  ;;  %2337 = vmatpush2.bf16.msra.mxu1 %v6469_v56 }
 0x21a   :  { %2338 = vmatprep.subr.bf16.mxu1 %v6470_v42 }
 0x21b   :  { %1669 = vst.msk [vmem:[#allocation4 + $0x14] sm:$0xf] %vm1598_vm7, %v6316_v36  ;;  %v1044_v58 = vpop.permute.xlu1 %1043  ;;  %v7970_v10 = vld [vmem:[#allocation4 + $0x10] sm:$0xf] }
 0x21c   :  { %1226 = vst.msk [vmem:[#allocation3 + $0x60] sm:$0xff] %vm628_vm6, %v1194_v28  ;;  %v1131_v14 = vsel %vm1117_vm8, %v1042_v17, %v1044_v58  ;;  %v7975_v41 = vcombine.low %v7939_v46, %v7970_v10  ;;  %v1333_v28 = vadd.s32 56, %v7489_v12  ;;  %v9042_v17 = vmax.f32 %v7642_v6, 0.0 }
 0x21d   :  { %v1195_v30 = vmax.f32 %v887_v54, %v1131_v14  ;;  %v1046_v19 = vpop.permute.xlu0 %1045  ;;  %2339 = vmatpush2.bf16.msra.mxu1 %v6472_v21  ;;  %v9043_v6 = vmax.f32 %v7651_v20, 0.0  ;;  %v9044_v20 = vmax.f32 %v7660_v35, 0.0 }
 0x21e   :  { %v1256_v32 = vld [vmem:[#allocation3 + $0x50] ss:$2 sm:$0xff]  ;;  %v1288_v34 = vld [vmem:[#allocation3 + $0x51] ss:$2 sm:$0xff]  ;;  %v1760_v44 = vshrl.u32 %v7975_v41, 16  ;;  %v1763_v62 = vshll.u32 %v7975_v41, 16  ;;  %2340 = vmatprep.subr.bf16.mxu1 %v6473_v51 }
 0x21f   :  { %v1314_v3 = vmax.f32 %v1256_v32, %v1288_v34  ;;  %1227 = vst.msk [vmem:[#allocation3 + $0x68] sm:$0xff] %vm628_vm6, %v1195_v30  ;;  %v1048_v23 = vpop.permute.xlu1 %1047  ;;  %v1395_v21 = vand.u32 15, %v1333_v28 }
 0x220   :  { %v1132_v54 = vsel %vm1117_vm8, %v1046_v19, %v1048_v23  ;;  %v1762_v26 = vrot.slane %v1760_v44, 4  ;;  %v1765_v0 = vrot.slane %v1763_v62, 5 }
 0x221   :  { %v1587_v16 = vsel %vm7980_vm12, %v1314_v3, 0.0  ;;  %v1196_v7 = vmax.f32 %v889_v63, %v1132_v54  ;;  %v1050_v22 = vpop.permute.xlu0 %1049  ;;  %v1845_v63 = vrot.slane %v7975_v41, 5  ;;  %2341 = vmatpush2.bf16.msra.mxu1 %v6475_v4  ;;  %vm1541_vm15 = vcmp.lt.s32.totalorder %v1395_v21, 14 }
 0x222   :  { %v6317_v52 = vpack.c.bf16 %v1587_v16, %v1587_v16  ;;  %v8003_v38 = vor.u32 %v1765_v0, %v1762_v26  ;;  %v8005_v40 = vld [vmem:[#allocation4 + $0x14] sm:$0xf] }
 0x223   :  { %1228 = vst.msk [vmem:[#allocation3 + $0x70] sm:$0xff] %vm628_vm6, %v1196_v7  ;;  %v1052_v33 = vpop.permute.xlu1 %1051  ;;  %v5828_v36 = vcombine.low %v7970_v10, %v8005_v40  ;;  %v1846_v41 = vsel %vm1843_vm14, %v1844_v50, %v1845_v63 }
 0x224   :  { %1670 = vst.msk [vmem:[#allocation4 + $0x18] sm:$0xf] %vm1598_vm7, %v6317_v52  ;;  %v1133_v25 = vsel %vm1117_vm8, %v1050_v22, %v1052_v33  ;;  %v1767_v60 = vsel %vm1750_vm13, %v7937_v1, %v8003_v38 }
 0x225   :  { %v1197_v56 = vmax.f32 %v9042_v17, %v1133_v25  ;;  %1824 = vrot.lane.b32.xlu1 %v1767_v60, %s7107_s25  ;;  %v1054_v58 = vpop.permute.xlu0 %1053  ;;  %v9045_v25 = vmax.f32 %v7669_v48, 0.0  ;;  %v1335_v48 = vadd.s32 72, %v7489_v12 }
 0x226   :  { %v1258_v14 = vld [vmem:[#allocation3 + $0x60] ss:$2 sm:$0xff]  ;;  %v1290_v42 = vld [vmem:[#allocation3 + $0x61] ss:$2 sm:$0xff] }
 0x227   :  { %v1315_v45 = vmax.f32 %v1258_v14, %v1290_v42  ;;  %1229 = vst.msk [vmem:[#allocation3 + $0x78] sm:$0xff] %vm628_vm6, %v1197_v56  ;;  %v1056_v30 = vpop.permute.xlu1 %1055 }
 0x228   :  { %v1134_v1 = vsel %vm1117_vm8, %v1054_v58, %v1056_v30  ;;  %v9046_v30 = vmax.f32 %v7678_v61, 0.0 }
 0x229   :  { %v6318_v19 = vpack.c.bf16 %v1315_v45, %v1315_v45  ;;  %v1198_v32 = vmax.f32 %v9043_v6, %v1134_v1  ;;  %1863 = vrot.lane.b32.xlu1 %v1846_v41, %s7108_s0  ;;  %v1058_v34 = vpop.permute.xlu0 %1057 }
 0x22b   :  { %1671 = vst.msk [vmem:[#allocation4 + $0x1c] sm:$0xf] %vm1598_vm7, %v6318_v19  ;;  %v1060_v44 = vpop.permute.xlu1 %1059  ;;  %v8030_v62 = vld [vmem:[#allocation4 + $0x18] sm:$0xf] }
 0x22c   :  { %1230 = vst.msk [vmem:[#allocation3 + $0x80] sm:$0xff] %vm628_vm6, %v1198_v32  ;;  %v1135_v3 = vsel %vm1117_vm8, %v1058_v34, %v1060_v44  ;;  %v8035_v5 = vcombine.low %v8005_v40, %v8030_v62 }
 0x22d   :  { %v1199_v50 = vmax.f32 %v9044_v20, %v1135_v3  ;;  %v1062_v23 = vpop.permute.xlu0 %1061  ;;  %v9047_v20 = vmax.f32 %v7687_v11, 0.0 }
 0x22e   :  { %v1260_v51 = vld [vmem:[#allocation3 + $0x70] ss:$2 sm:$0xff]  ;;  %v1292_v54 = vld [vmem:[#allocation3 + $0x71] ss:$2 sm:$0xff]  ;;  %v1847_v26 = vrot.slane %v8035_v5, 5  ;;  %v1769_v0 = vshrl.u32 %v8035_v5, 16 }
 0x22f   :  { %v1316_v4 = vmax.f32 %v1260_v51, %v1292_v54  ;;  %1231 = vst.msk [vmem:[#allocation3 + $0x88] sm:$0xff] %vm628_vm6, %v1199_v50  ;;  %v1064_v16 = vpop.permute.xlu1 %1063  ;;  %v1772_v7 = vshll.u32 %v8035_v5, 16  ;;  %v1409_v5 = vand.u32 15, %v1335_v48 }
 0x230   :  { %v1136_v22 = vsel %vm1117_vm8, %v1062_v23, %v1064_v16  ;;  %v1848_v52 = vsel %vm1843_vm14, %v1845_v63, %v1847_v26  ;;  %v1771_v33 = vrot.slane %v1769_v0, 4  ;;  %v9048_v0 = vmax.f32 %v7696_v37, 0.0 }
 0x231   :  { %v1589_v35 = vsel %vm1541_vm15, %v1316_v4, 0.0  ;;  %v1200_v60 = vmax.f32 %v9045_v25, %v1136_v22  ;;  %1865 = vrot.lane.b32.xlu1 %v1848_v52, %s7108_s0  ;;  %v1066_v28 = vpop.permute.xlu0 %1065  ;;  %v1774_v17 = vrot.slane %v1772_v7, 5  ;;  %vm1543_vm0 = vcmp.lt.s32.totalorder %v1409_v5, 14 }
 0x232   :  { %v6319_v56 = vpack.c.bf16 %v1589_v35, %v1589_v35  ;;  %v8048_v58 = vld [vmem:[#allocation4 + $0x1c] sm:$0xf] }
 0x233   :  { %1232 = vst.msk [vmem:[#allocation3 + $0x90] sm:$0xff] %vm628_vm6, %v1200_v60  ;;  %v1068_v14 = vpop.permute.xlu1 %1067  ;;  %v1775_v42 = vor.u32 %v1774_v17, %v1771_v33  ;;  %v5829_v45 = vcombine.low %v8030_v62, %v8048_v58 }
 0x234   :  { %1672 = vst.msk [vmem:[#allocation4 + $0x20] sm:$0xf] %vm1598_vm7, %v6319_v56  ;;  %v1137_v63 = vsel %vm1117_vm8, %v1066_v28, %v1068_v14  ;;  %v9049_v56 = vmax.f32 %v7705_v57, 0.0  ;;  %v1337_v57 = vadd.s32 88, %v7489_v12 }
 0x235   :  { %v1201_v1 = vmax.f32 %v9046_v30, %v1137_v63  ;;  %v1776_v41 = vsel %vm1750_vm13, %v8003_v38, %v1775_v42  ;;  %v1070_v19 = vpop.permute.xlu0 %1069 }
 0x236   :  { %v1262_v21 = vld [vmem:[#allocation3 + $0x80] ss:$2 sm:$0xff]  ;;  %v1294_v6 = vld [vmem:[#allocation3 + $0x81] ss:$2 sm:$0xff]  ;;  %1826 = vrot.lane.b32.xlu0 %v1776_v41, %s7107_s25 }
 0x237   :  { %v1317_v32 = vmax.f32 %v1262_v21, %v1294_v6  ;;  %1233 = vst.msk [vmem:[#allocation3 + $0x98] sm:$0xff] %vm628_vm6, %v1201_v1  ;;  %v1072_v34 = vpop.permute.xlu1 %1071  ;;  %v9050_v6 = vmax.f32 %v7714_v18, 0.0 }
 0x238   :  { %v1138_v44 = vsel %vm1117_vm8, %v1070_v19, %v1072_v34 }
 0x239   :  { %v6320_v3 = vpack.c.bf16 %v1317_v32, %v1317_v32  ;;  %v1202_v61 = vmax.f32 %v9047_v20, %v1138_v44  ;;  %v1074_v50 = vpop.permute.xlu0 %1073 }
 0x23b   :  { %1673 = vst.msk [vmem:[#allocation4 + $0x24] sm:$0xf] %vm1598_vm7, %v6320_v3  ;;  %v1076_v38 = vpop.permute.xlu1 %1075  ;;  %v8067_v23 = vld [vmem:[#allocation4 + $0x20] sm:$0xf] }
 0x23c   :  { %1234 = vst.msk [vmem:[#allocation3 + $0xa0] sm:$0xff] %vm628_vm6, %v1202_v61  ;;  %v1139_v51 = vsel %vm1117_vm8, %v1074_v50, %v1076_v38  ;;  %v8072_v54 = vcombine.low %v8048_v58, %v8067_v23 }
 0x23d   :  { %v1203_v4 = vmax.f32 %v9048_v0, %v1139_v51  ;;  %v1078_v11 = vpop.permute.xlu0 %1077  ;;  %v1423_v51 = vand.u32 15, %v1337_v57 }
 0x23e   :  { %v1264_v16 = vld [vmem:[#allocation3 + $0x90] ss:$2 sm:$0xff]  ;;  %v1296_v7 = vld [vmem:[#allocation3 + $0x91] ss:$2 sm:$0xff]  ;;  %v1849_v22 = vrot.slane %v8072_v54, 5  ;;  %v1778_v52 = vshrl.u32 %v8072_v54, 16 }
 0x23f   :  { %v1318_v33 = vmax.f32 %v1264_v16, %v1296_v7  ;;  %1235 = vst.msk [vmem:[#allocation3 + $0xa8] sm:$0xff] %vm628_vm6, %v1203_v4  ;;  %v1080_v35 = vpop.permute.xlu1 %1079  ;;  %v1781_v25 = vshll.u32 %v8072_v54, 16  ;;  %v9051_v54 = vmax.f32 %v7723_v49, 0.0  ;;  %vm1545_vm1 = vcmp.lt.s32.totalorder %v1423_v51, 14 }
 0x240   :  { %v1140_v60 = vsel %vm1117_vm8, %v1078_v11, %v1080_v35  ;;  %v1850_v28 = vsel %vm1843_vm14, %v1847_v26, %v1849_v22  ;;  %v1780_v17 = vrot.slane %v1778_v52, 4  ;;  %v9052_v7 = vmax.f32 %v7732_v9, 0.0 }
 0x241   :  { %v1591_v37 = vsel %vm1543_vm0, %v1318_v33, 0.0  ;;  %v1204_v14 = vmax.f32 %v9049_v56, %v1140_v60  ;;  %1867 = vrot.lane.b32.xlu1 %v1850_v28, %s7108_s0  ;;  %v1082_v63 = vpop.permute.xlu0 %1081  ;;  %v1783_v48 = vrot.slane %v1781_v25, 5 }
 0x242   :  { %v6321_v30 = vpack.c.bf16 %v1591_v37, %v1591_v37  ;;  %v8085_v1 = vld [vmem:[#allocation4 + $0x24] sm:$0xf] }
 0x243   :  { %1236 = vst.msk [vmem:[#allocation3 + $0xb0] sm:$0xff] %vm628_vm6, %v1204_v14  ;;  %v1084_v41 = vpop.permute.xlu1 %1083  ;;  %v1784_v19 = vor.u32 %v1783_v48, %v1780_v17  ;;  %v5830_v21 = vcombine.low %v8067_v23, %v8085_v1 }
 0x244   :  { %1674 = vst.msk [vmem:[#allocation4 + $0x28] sm:$0xf] %vm1598_vm7, %v6321_v30  ;;  %v1141_v26 = vsel %vm1117_vm8, %v1082_v63, %v1084_v41  ;;  %v9053_v30 = vmax.f32 %v7741_v47, 0.0  ;;  %v1339_v47 = vadd.s32 104, %v7489_v12 }
 0x245   :  { %v1205_v32 = vmax.f32 %v9050_v6, %v1141_v26  ;;  %v1785_v34 = vsel %vm1750_vm13, %v1775_v42, %v1784_v19  ;;  %v1086_v44 = vpop.permute.xlu0 %1085 }
 0x246   :  { %v1266_v3 = vld [vmem:[#allocation3 + $0xa0] ss:$2 sm:$0xff]  ;;  %v1298_v5 = vld [vmem:[#allocation3 + $0xa1] ss:$2 sm:$0xff]  ;;  %1828 = vrot.lane.b32.xlu0 %v1785_v34, %s7107_s25 }
 0x247   :  { %v1319_v20 = vmax.f32 %v1266_v3, %v1298_v5  ;;  %1237 = vst.msk [vmem:[#allocation3 + $0xb8] sm:$0xff] %vm628_vm6, %v1205_v32  ;;  %v1088_v61 = vpop.permute.xlu1 %1087  ;;  %v9054_v3 = vmax.f32 %v7750_v29, 0.0 }
 0x248   :  { %v1142_v50 = vsel %vm1117_vm8, %v1086_v44, %v1088_v61 }
 0x249   :  { %v6322_v38 = vpack.c.bf16 %v1319_v20, %v1319_v20  ;;  %v1206_v0 = vmax.f32 %v9051_v54, %v1142_v50  ;;  %v1090_v18 = vpop.permute.xlu0 %1089 }
 0x24b   :  { %1675 = vst.msk [vmem:[#allocation4 + $0x2c] sm:$0xf] %vm1598_vm7, %v6322_v38  ;;  %v1092_v42 = vpop.permute.xlu1 %1091  ;;  %v8103_v4 = vld [vmem:[#allocation4 + $0x28] sm:$0xf] }
 0x24c   :  { %1238 = vst.msk [vmem:[#allocation3 + $0xc0] sm:$0xff] %vm628_vm6, %v1206_v0  ;;  %v1143_v11 = vsel %vm1117_vm8, %v1090_v18, %v1092_v42  ;;  %v5839_v16 = vcombine.low %v8085_v1, %v8103_v4  ;;  %v1437_v42 = vand.u32 15, %v1339_v47 }
 0x24d   :  { %v1207_v52 = vmax.f32 %v9052_v7, %v1143_v11  ;;  %v1094_v33 = vpop.permute.xlu0 %1093  ;;  %v9055_v11 = vmax.f32 %v7759_v55, 0.0 }
 0x24e   :  { %v1268_v49 = vld [vmem:[#allocation3 + $0xb0] ss:$2 sm:$0xff]  ;;  %v1300_v35 = vld [vmem:[#allocation3 + $0xb1] ss:$2 sm:$0xff]  ;;  %v1851_v25 = vrot.slane %v5839_v16, 5  ;;  %v1787_v60 = vshrl.u32 %v5839_v16, 16 }
 0x24f   :  { %v1320_v28 = vmax.f32 %v1268_v49, %v1300_v35  ;;  %1239 = vst.msk [vmem:[#allocation3 + $0xc8] sm:$0xff] %vm628_vm6, %v1207_v52  ;;  %v1096_v17 = vpop.permute.xlu1 %1095  ;;  %v1790_v37 = vshll.u32 %v5839_v16, 16  ;;  %vm1547_vm2 = vcmp.lt.s32.totalorder %v1437_v42, 14 }
 0x250   :  { %v1144_v56 = vsel %vm1117_vm8, %v1094_v33, %v1096_v17  ;;  %v1852_v14 = vsel %vm1843_vm14, %v1849_v22, %v1851_v25  ;;  %v1789_v63 = vrot.slane %v1787_v60, 4 }
 0x251   :  { %v1593_v48 = vsel %vm1545_vm1, %v1320_v28, 0.0  ;;  %v1208_v9 = vmax.f32 %v9053_v30, %v1144_v56  ;;  %1869 = vrot.lane.b32.xlu1 %v1852_v14, %s7108_s0  ;;  %v1098_v41 = vpop.permute.xlu0 %1097  ;;  %v1792_v26 = vrot.slane %v1790_v37, 5 }
 0x252   :  { %v6323_v57 = vpack.c.bf16 %v1593_v48, %v1593_v48  ;;  %v8116_v6 = vld [vmem:[#allocation4 + $0x2c] sm:$0xf] }
 0x253   :  { %1240 = vst.msk [vmem:[#allocation3 + $0xd0] sm:$0xff] %vm628_vm6, %v1208_v9  ;;  %v1100_v32 = vpop.permute.xlu1 %1099  ;;  %v1793_v34 = vor.u32 %v1792_v26, %v1789_v63  ;;  %v5831_v44 = vcombine.low %v8103_v4, %v8116_v6 }
 0x254   :  { %1676 = vst.msk [vmem:[#allocation4 + $0x30] sm:$0xf] %vm1598_vm7, %v6323_v57  ;;  %v1145_v22 = vsel %vm1117_vm8, %v1098_v41, %v1100_v32 }
 0x255   :  { %v1209_v5 = vmax.f32 %v9054_v3, %v1145_v22  ;;  %v1794_v20 = vsel %vm1750_vm13, %v1784_v19, %v1793_v34  ;;  %v1102_v51 = vpop.permute.xlu0 %1101 }
 0x256   :  { %v1270_v61 = vld [vmem:[#allocation3 + $0xc0] ss:$2 sm:$0xff]  ;;  %v1302_v50 = vld [vmem:[#allocation3 + $0xc1] ss:$2 sm:$0xff]  ;;  %1830 = vrot.lane.b32.xlu0 %v1794_v20, %s7107_s25 }
 0x257   :  { %v1321_v38 = vmax.f32 %v1270_v61, %v1302_v50  ;;  %1241 = vst.msk [vmem:[#allocation3 + $0xd8] sm:$0xff] %vm628_vm6, %v1209_v5  ;;  %v1104_v54 = vpop.permute.xlu1 %1103 }
 0x258   :  { %v1146_v0 = vsel %vm1117_vm8, %v1102_v51, %v1104_v54 }
 0x259   :  { %v6324_v18 = vpack.c.bf16 %v1321_v38, %v1321_v38  ;;  %v1210_v16 = vmax.f32 %v9055_v11, %v1146_v0 }
 0x25b   :  { %1677 = vst.msk [vmem:[#allocation4 + $0x34] sm:$0xf] %vm1598_vm7, %v6324_v18  ;;  %v8134_v29 = vld [vmem:[#allocation4 + $0x30] sm:$0xf] }
 0x25c   :  { %1242 = vst.msk [vmem:[#allocation3 + $0xe0] sm:$0xff] %vm628_vm6, %v1210_v16  ;;  %v5840_v19 = vcombine.low %v8116_v6, %v8134_v29 }
 0x25d   :  { %v1110_v7 = vpop.permute.xlu0 %1109 }
 0x25e   :  { %v1272_v52 = vld [vmem:[#allocation3 + $0xd0] ss:$2 sm:$0xff]  ;;  %v1304_v33 = vld [vmem:[#allocation3 + $0xd1] ss:$2 sm:$0xff]  ;;  %v1853_v49 = vrot.slane %v5840_v19, 5  ;;  %v1796_v35 = vshrl.u32 %v5840_v19, 16 }
 0x25f   :  { %v1322_v60 = vmax.f32 %v1272_v52, %v1304_v33  ;;  %v1112_v28 = vpop.permute.xlu1 %1111  ;;  %v1799_v17 = vshll.u32 %v5840_v19, 16 }
 0x260   :  { %v1148_v55 = vsel %vm1117_vm8, %v1110_v7, %v1112_v28  ;;  %v1854_v37 = vsel %vm1843_vm14, %v1851_v25, %v1853_v49  ;;  %v1798_v56 = vrot.slane %v1796_v35, 4 }
 0x261   :  { %v1595_v14 = vsel %vm1547_vm2, %v1322_v60, 0.0  ;;  %v1212_v63 = vmax.f32 %v921_v53, %v1148_v55  ;;  %1871 = vrot.lane.b32.xlu1 %v1854_v37, %s7108_s0  ;;  %v1114_v48 = vpop.permute.xlu0 %1113  ;;  %v1801_v30 = vrot.slane %v1799_v17, 5  ;;  %v1341_v53 = vadd.s32 120, %v7489_v12  ;;  %v6454_v17 = vld [vmem:[#allocation4 + $0x44] ss:$0 sps:$4 sm:$0x11]  }
 0x262   :  { %v6325_v9 = vpack.c.bf16 %v1595_v14, %v1595_v14  ;;  %v8143_v41 = vld [vmem:[#allocation4 + $0x34] sm:$0xf] }
 0x263   :  { %1244 = vst.msk [vmem:[#allocation3 + $0xf0] sm:$0xff] %vm628_vm6, %v1212_v63  ;;  %v1116_v26 = vpop.permute.xlu1 %1115  ;;  %v1802_v57 = vor.u32 %v1801_v30, %v1798_v56  ;;  %v5832_v32 = vcombine.low %v8134_v29, %v8143_v41  ;;  %v1451_v20 = vand.u32 15, %v1341_v53  ;;  %v1681_v53 = vld [vmem:[#allocation4] sm:$0x8] }
 0x264   :  { %1678 = vst.msk [vmem:[#allocation4 + $0x38] sm:$0xf] %vm1598_vm7, %v6325_v9  ;;  %v1149_v25 = vsel %vm1117_vm8, %v1114_v48, %v1116_v26  ;;  %v1859_v48 = vrot.slane %v6454_v17, 5 }
 0x265   :  { %v1213_v8 = vmax.f32 %v923_v24, %v1149_v25  ;;  %v1803_v22 = vsel %vm1750_vm13, %v1793_v34, %v1802_v57  ;;  %v1106_v47 = vpop.permute.xlu0 %1105  ;;  %vm1549_vm3 = vcmp.lt.s32.totalorder %v1451_v20, 14 }
 0x266   :  { %1832 = vrot.lane.b32.xlu0 %v1803_v22, %s7107_s25  ;;  %v5826_v22 = vcombine.low %v1681_v53, %v7899_v27 }
 0x267   :  { %1245 = vst.msk [vmem:[#allocation3 + $0xf8] sm:$0xff] %vm628_vm6, %v1213_v8  ;;  %v1108_v3 = vpop.permute.xlu1 %1107 }
 0x268   :  { %v1147_v5 = vsel %vm1117_vm8, %v1106_v47, %v1108_v3  ;;  %vm2600_vm8 = vcmask 916480  }
 0x269   :  { %v1211_v61 = vmax.f32 %v919_v2, %v1147_v5  ;;  %vm8491_vm9 = vmpackc.low %vm2600_vm8, %vm2600_vm8 }
 0x26b   :  { %1243 = vst.msk [vmem:[#allocation3 + $0xe8] sm:$0xff] %vm628_vm6, %v1211_v61  ;;  %v8160_v50 = vld [vmem:[#allocation4 + $0x38] sm:$0xf] }
 0x26c   :  { %v5841_v31 = vcombine.low %v8143_v41, %v8160_v50 }
 0x26e   :  { %v1276_v24 = vld [vmem:[#allocation3 + $0xf0] ss:$2 sm:$0xff]  ;;  %v1308_v34 = vld [vmem:[#allocation3 + $0xf1] ss:$2 sm:$0xff]  ;;  %v1855_v38 = vrot.slane %v5841_v31, 5  ;;  %v1805_v51 = vshrl.u32 %v5841_v31, 16 }
 0x26f   :  { %v1324_v54 = vmax.f32 %v1276_v24, %v1308_v34  ;;  %v1808_v0 = vshll.u32 %v5841_v31, 16 }
 0x270   :  { %v1856_v18 = vsel %vm1843_vm14, %v1853_v49, %v1855_v38  ;;  %v1807_v42 = vrot.slane %v1805_v51, 4 }
 0x271   :  { %v1597_v11 = vsel %vm1549_vm3, %v1324_v54, 0.0  ;;  %1873 = vrot.lane.b32.xlu1 %v1856_v18, %s7108_s0  ;;  %v1810_v59 = vrot.slane %v1808_v0, 5 }
 0x272   :  { %v6327_v2 = vpack.c.bf16 %v1597_v11, %v1597_v11  ;;  %v1274_v16 = vld [vmem:[#allocation3 + $0xe0] ss:$2 sm:$0xff]  ;;  %v1306_v19 = vld [vmem:[#allocation3 + $0xe1] ss:$2 sm:$0xff] }
 0x273   :  { %v1323_v7 = vmax.f32 %v1274_v16, %v1306_v19  ;;  %v1811_v52 = vor.u32 %v1810_v59, %v1807_v42 }
 0x274   :  { %1680 = vst.msk [vmem:[#allocation4 + $0x40] sm:$0xf] %vm1598_vm7, %v6327_v2 }
 0x275   :  { %v6326_v33 = vpack.c.bf16 %v1323_v7, %v1323_v7  ;;  %v1812_v35 = vsel %vm1750_vm13, %v1802_v57, %v1811_v52 }
 0x276   :  { %1834 = vrot.lane.b32.xlu0 %v1812_v35, %s7107_s25 }
 0x277   :  { %1679 = vst.msk [vmem:[#allocation4 + $0x3c] sm:$0xf] %vm1598_vm7, %v6326_v33  ;;  %vm2278_vm7 = vcmask 1014784  }
 0x27b   :  { %v8172_v60 = vld [vmem:[#allocation4 + $0x40] sm:$0xf] }
 0x27e   :  { %v8170_v49 = vld [vmem:[#allocation4 + $0x3c] sm:$0xf] }
 0x27f   :  { %v5842_v28 = vcombine.low %v8170_v49, %v8172_v60  ;;  %v5833_v55 = vcombine.low %v8160_v50, %v8170_v49 }
 0x281   :  { %v1857_v37 = vrot.slane %v5842_v28, 5  ;;  %v1814_v56 = vshrl.u32 %v5842_v28, 16  ;;  %v1817_v14 = vshll.u32 %v5842_v28, 16 }
 0x283   :  { %v1858_v63 = vsel %vm1843_vm14, %v1855_v38, %v1857_v37  ;;  %v1816_v30 = vrot.slane %v1814_v56, 4  ;;  %v1819_v9 = vrot.slane %v1817_v14, 5  ;;  %v1860_v57 = vsel %vm1843_vm14, %v1857_v37, %v1859_v48 }
 0x284   :  { %1875 = vrot.lane.b32.xlu1 %v1858_v63, %s7108_s0 }
 0x285   :  { %v1820_v26 = vor.u32 %v1819_v9, %v1816_v30 }
 0x286   :  { %v1823_v8 = vpop.permute.xlu0 %1822 }
 0x287   :  { %v1821_v25 = vsel %vm1750_vm13, %v1811_v52, %v1820_v26  ;;  %v1881_v47 = vsel %vm628_vm6, %v5826_v22, %v1823_v8 }
 0x288   :  { %1877 = vrot.lane.b32.xlu1 %v1860_v57, %s7108_s0  ;;  %1836 = vrot.lane.b32.xlu0 %v1821_v25, %s7107_s25  ;;  %v1970_v5 = vshrl.u32 %v1881_v47, 16  ;;  %v1973_v20 = vshll.u32 %v1881_v47, 16 }
 0x28a   :  { %v1862_v3 = vpop.permute.xlu0 %1861  ;;  %v1972_v24 = vrot.slane %v1970_v5, 3  ;;  %v1975_v34 = vrot.slane %v1973_v20, 4 }
 0x28b   :  { %v1908_v61 = vsel %vm1906_vm4, %v1823_v8, %v1862_v3 }
 0x28c   :  { %1838 = vrot.lane.b32.xlu0 %v1820_v26, %s7107_s25  ;;  %v1985_v38 = vshrl.u32 %v1908_v61, 16  ;;  %v1988_v54 = vshll.u32 %v1908_v61, 16  ;;  %v1976_v59 = vor.u32 %v1975_v34, %v1972_v24 }
 0x28e   :  { %v1987_v2 = vrot.slane %v1985_v38, 3  ;;  %v1990_v19 = vrot.slane %v1988_v54, 4 }
 0x290   :  { %v1991_v46 = vor.u32 %v1990_v19, %v1987_v2 }
 0x297   :  { %v1825_v31 = vpop.permute.xlu1 %1824 }
 0x298   :  { %v1884_v51 = vsel %vm628_vm6, %v5827_v39, %v1825_v31 }
 0x299   :  { %v1977_v0 = vshrl.u32 %v1884_v51, 16  ;;  %v1980_v27 = vshll.u32 %v1884_v51, 16 }
 0x29b   :  { %v1979_v18 = vrot.slane %v1977_v0, 3  ;;  %v1982_v42 = vrot.slane %v1980_v27, 4  ;;  %v1864_v11 = vpop.permute.xlu1 %1863 }
 0x29c   :  { %v1910_v16 = vsel %vm1906_vm4, %v1825_v31, %v1864_v11 }
 0x29d   :  { %v1983_v7 = vor.u32 %v1982_v42, %v1979_v18  ;;  %v1992_v52 = vshrl.u32 %v1910_v16, 16  ;;  %v1995_v33 = vshll.u32 %v1910_v16, 16 }
 0x29f   :  { %v1994_v35 = vrot.slane %v1992_v52, 3  ;;  %v1997_v28 = vrot.slane %v1995_v33, 4  ;;  %v1984_v43 = vsel %vm1969_vm5, %v1976_v59, %v1983_v7 }
 0x2a1   :  { %v1998_v39 = vor.u32 %v1997_v28, %v1994_v35 }
 0x2a3   :  { %v1999_v17 = vsel %vm1969_vm5, %v1991_v46, %v1998_v39  ;;  %v1866_v37 = vpop.permute.xlu1 %1865 }
 0x2a4   :  { %5877 = vmatprep.mubr.msk.bf16.mxu1 %vm2278_vm7, %v1999_v17 }
 0x2a5   :  { %2343 = vmatmul.mubr.bf16.vlgmr.msra.gmra.mxu1 %v1984_v43 }
 0x2a8   :  { %v1827_v56 = vpop.permute.xlu0 %1826 }
 0x2a9   :  { %v1887_v14 = vsel %vm628_vm6, %v5828_v36, %v1827_v56  ;;  %v1912_v63 = vsel %vm1906_vm4, %v1827_v56, %v1866_v37 }
 0x2aa   :  { %v2000_v48 = vshrl.u32 %v1887_v14, 16  ;;  %v2003_v30 = vshll.u32 %v1887_v14, 16  ;;  %v2008_v9 = vshrl.u32 %v1912_v63, 16  ;;  %v2011_v26 = vshll.u32 %v1912_v63, 16 }
 0x2ac   :  { %v2002_v57 = vrot.slane %v2000_v48, 3  ;;  %v2005_v25 = vrot.slane %v2003_v30, 4  ;;  %v2010_v53 = vrot.slane %v2008_v9, 3  ;;  %v2013_v8 = vrot.slane %v2011_v26, 4 }
 0x2ae   :  { %v2006_v22 = vor.u32 %v2005_v25, %v2002_v57  ;;  %v2014_v47 = vor.u32 %v2013_v8, %v2010_v53 }
 0x2b0   :  { %v2015_v3 = vsel %vm1969_vm5, %v1998_v39, %v2014_v47  ;;  %v2007_v5 = vsel %vm1969_vm5, %v1983_v7, %v2006_v22 }
 0x2b1   :  { %5878 = vmatprep.mubr.msk.bf16.mxu1 %vm2278_vm7, %v2015_v3 }
 0x2b2   :  { %2353 = vmatmul.mubr.bf16.gmra.mxu1 %v2007_v5 }
 0x2b3   :  { %v1868_v10 = vpop.permute.xlu1 %1867 }
 0x2b8   :  { %v1829_v40 = vpop.permute.xlu0 %1828 }
 0x2b9   :  { %v1890_v36 = vsel %vm628_vm6, %v5829_v45, %v1829_v40  ;;  %v1914_v20 = vsel %vm1906_vm4, %v1829_v40, %v1868_v10 }
 0x2ba   :  { %v2016_v61 = vshrl.u32 %v1890_v36, 16  ;;  %v2019_v31 = vshll.u32 %v1890_v36, 16  ;;  %v2024_v24 = vshrl.u32 %v1914_v20, 16  ;;  %v2027_v34 = vshll.u32 %v1914_v20, 16 }
 0x2bc   :  { %v2018_v38 = vrot.slane %v2016_v61, 3  ;;  %v2021_v51 = vrot.slane %v2019_v31, 4  ;;  %v2026_v54 = vrot.slane %v2024_v24, 3  ;;  %v2029_v0 = vrot.slane %v2027_v34, 4 }
 0x2be   :  { %v2022_v27 = vor.u32 %v2021_v51, %v2018_v38  ;;  %v2030_v18 = vor.u32 %v2029_v0, %v2026_v54 }
 0x2c0   :  { %v2031_v42 = vsel %vm1969_vm5, %v2014_v47, %v2030_v18  ;;  %v2023_v11 = vsel %vm1969_vm5, %v2006_v22, %v2022_v27 }
 0x2c1   :  { %5879 = vmatprep.mubr.msk.bf16.mxu1 %vm2278_vm7, %v2031_v42 }
 0x2c2   :  { %2363 = vmatmul.mubr.bf16.gmra.mxu1 %v2023_v11  ;;  %v5834_v11 = vcombine.low %v8172_v60, %v8172_v60 }
 0x2c3   :  { %v1870_v62 = vpop.permute.xlu1 %1869 }
 0x2c8   :  { %v1831_v58 = vpop.permute.xlu0 %1830 }
 0x2c9   :  { %v1893_v45 = vsel %vm628_vm6, %v5830_v21, %v1831_v58  ;;  %v1916_v59 = vsel %vm1906_vm4, %v1831_v58, %v1870_v62 }
 0x2ca   :  { %v2032_v2 = vshrl.u32 %v1893_v45, 16  ;;  %v2035_v16 = vshll.u32 %v1893_v45, 16  ;;  %v2040_v19 = vshrl.u32 %v1916_v59, 16  ;;  %v2043_v7 = vshll.u32 %v1916_v59, 16 }
 0x2cc   :  { %v2034_v52 = vrot.slane %v2032_v2, 3  ;;  %v2037_v33 = vrot.slane %v2035_v16, 4  ;;  %v2042_v35 = vrot.slane %v2040_v19, 3  ;;  %v2045_v28 = vrot.slane %v2043_v7, 4 }
 0x2ce   :  { %v2038_v43 = vor.u32 %v2037_v33, %v2034_v52  ;;  %v2046_v46 = vor.u32 %v2045_v28, %v2042_v35 }
 0x2d0   :  { %v2047_v39 = vsel %vm1969_vm5, %v2030_v18, %v2046_v46  ;;  %v2039_v17 = vsel %vm1969_vm5, %v2022_v27, %v2038_v43 }
 0x2d1   :  { %5880 = vmatprep.mubr.msk.bf16.mxu1 %vm2278_vm7, %v2047_v39 }
 0x2d2   :  { %2373 = vmatmul.mubr.bf16.gmra.mxu1 %v2039_v17 }
 0x2d3   :  { %v1872_v23 = vpop.permute.xlu1 %1871 }
 0x2d8   :  { %v1833_v1 = vpop.permute.xlu0 %1832 }
 0x2d9   :  { %v1896_v21 = vsel %vm628_vm6, %v5831_v44, %v1833_v1  ;;  %v1918_v37 = vsel %vm1906_vm4, %v1833_v1, %v1872_v23 }
 0x2da   :  { %v2048_v56 = vshrl.u32 %v1896_v21, 16  ;;  %v2051_v14 = vshll.u32 %v1896_v21, 16  ;;  %v2056_v63 = vshrl.u32 %v1918_v37, 16  ;;  %v2059_v48 = vshll.u32 %v1918_v37, 16 }
 0x2dc   :  { %v2050_v30 = vrot.slane %v2048_v56, 3  ;;  %v2053_v9 = vrot.slane %v2051_v14, 4  ;;  %v2058_v26 = vrot.slane %v2056_v63, 3  ;;  %v2061_v57 = vrot.slane %v2059_v48, 4  ;;  %v6478_v56 = vld [vmem:[#allocation6 + $0x2e0] ss:$16 sps:$4 sm:$0xff]  }
 0x2dd   :  { %v6480_v14 = vld [vmem:[#allocation6 + $0x2e4] ss:$16 sps:$4 sm:$0xff]  }
 0x2de   :  { %v2054_v25 = vor.u32 %v2053_v9, %v2050_v30  ;;  %v2062_v53 = vor.u32 %v2061_v57, %v2058_v26  ;;  %4156 = vmatprep.subr.bf16.mxu0 %v6480_v14  ;;  %v1957_v63 = vld [vmem:[%s9014_s4] sm:$0x3]  ;;  %v6481_v30 = vld [vmem:[#allocation6 + $0x2c0] ss:$16 sps:$4 sm:$0xff]  }
 0x2df   :  { %4157 = vmatpush1.bf16.msra.mxu0 %v6478_v56  ;;  %v8255_v48 = vrot.slane %v1957_v63, %v7492_v13  ;;  %v6483_v9 = vld [vmem:[#allocation6 + $0x2c4] ss:$16 sps:$4 sm:$0xff]   ;;  %v8258_v26 = vrot.slane %v1957_v63, %v7498_v15  ;;  %v6517_v14 = vld [vmem:[#allocation6 + $0x80] ss:$16 sps:$4 sm:$0xff]  }
 0x2e0   :  { %v2063_v8 = vsel %vm1969_vm5, %v2046_v46, %v2062_v53  ;;  %v2055_v22 = vsel %vm1969_vm5, %v2038_v43, %v2054_v25  ;;  %4158 = vmatprep.subr.bf16.mxu0 %v6483_v9  ;;  %v6519_v56 = vld [vmem:[#allocation6 + $0x84] ss:$16 sps:$4 sm:$0xff]  }
 0x2e1   :  { %5881 = vmatprep.mubr.msk.bf16.mxu1 %vm2278_vm7, %v2063_v8  ;;  %v6525_v63 = vld [vmem:[#allocation6 + $0x3a4] ss:$16 sps:$4 sm:$0xff]  }
 0x2e2   :  { %2383 = vmatmul.mubr.bf16.gmra.mxu1 %v2055_v22  ;;  %v6522_v9 = vld [vmem:[#allocation6 + $0x64] ss:$16 sps:$4 sm:$0xff]  }
 0x2e3   :  { %v1874_v4 = vpop.permute.xlu1 %1873  ;;  %4159 = vmatpush1.bf16.msra.mxu0 %v6481_v30 }
 0x2e8   :  { %v1835_v6 = vpop.permute.xlu0 %1834 }
 0x2e9   :  { %v1899_v44 = vsel %vm628_vm6, %v5832_v32, %v1835_v6  ;;  %v1920_v47 = vsel %vm1906_vm4, %v1835_v6, %v1874_v4 }
 0x2ea   :  { %v2064_v3 = vshrl.u32 %v1899_v44, 16  ;;  %v2067_v5 = vshll.u32 %v1899_v44, 16  ;;  %v2072_v10 = vshrl.u32 %v1920_v47, 16  ;;  %v2075_v40 = vshll.u32 %v1920_v47, 16 }
 0x2ec   :  { %v2066_v36 = vrot.slane %v2064_v3, 3  ;;  %v2069_v20 = vrot.slane %v2067_v5, 4  ;;  %v2074_v61 = vrot.slane %v2072_v10, 3  ;;  %v2077_v31 = vrot.slane %v2075_v40, 4  ;;  %v6487_v3 = vld [vmem:[#allocation6 + $0x280] ss:$16 sps:$4 sm:$0xff]  }
 0x2ed   :  { %v6489_v5 = vld [vmem:[#allocation6 + $0x284] ss:$16 sps:$4 sm:$0xff]  }
 0x2ee   :  { %v2070_v24 = vor.u32 %v2069_v20, %v2066_v36  ;;  %v2078_v34 = vor.u32 %v2077_v31, %v2074_v61  ;;  %v6490_v20 = vld [vmem:[#allocation6 + $0x260] ss:$16 sps:$4 sm:$0xff]   ;;  %v6492_v61 = vld [vmem:[#allocation6 + $0x264] ss:$16 sps:$4 sm:$0xff]  }
 0x2f0   :  { %v2079_v38 = vsel %vm1969_vm5, %v2062_v53, %v2078_v34  ;;  %v2071_v51 = vsel %vm1969_vm5, %v2054_v25, %v2070_v24  ;;  %v6484_v25 = vld [vmem:[#allocation6 + $0x2a0] ss:$16 sps:$4 sm:$0xff]   ;;  %v6486_v53 = vld [vmem:[#allocation6 + $0x2a4] ss:$16 sps:$4 sm:$0xff]  }
 0x2f1   :  { %5882 = vmatprep.mubr.msk.bf16.mxu1 %vm2278_vm7, %v2079_v38  ;;  %4160 = vmatprep.subr.bf16.mxu0 %v6486_v53 }
 0x2f2   :  { %2393 = vmatmul.mubr.bf16.gmra.mxu1 %v2071_v51  ;;  %4161 = vmatpush1.bf16.msra.mxu0 %v6484_v25 }
 0x2f3   :  { %4162 = vmatprep.subr.bf16.mxu0 %v6489_v5  ;;  %v6528_v5 = vld [vmem:[#allocation6 + $0x44] ss:$16 sps:$4 sm:$0xff]  }
 0x2f6   :  { %v1876_v29 = vpop.permute.xlu1 %1875  ;;  %4163 = vmatpush1.bf16.msra.mxu0 %v6487_v3 }
 0x2f7   :  { %4164 = vmatprep.subr.bf16.mxu0 %v6492_v61  ;;  %v6531_v61 = vld [vmem:[#allocation6 + $0x24] ss:$16 sps:$4 sm:$0xff]  }
 0x2fa   :  { %v1837_v41 = vpop.permute.xlu0 %1836  ;;  %v1878_v62 = vpop.permute.xlu1 %1877  ;;  %4165 = vmatpush1.bf16.msra.mxu0 %v6490_v20 }
 0x2fb   :  { %v1902_v32 = vsel %vm628_vm6, %v5833_v55, %v1837_v41  ;;  %v1922_v54 = vsel %vm1906_vm4, %v1837_v41, %v1876_v29  ;;  %v6493_v29 = vld [vmem:[#allocation6 + $0x240] ss:$16 sps:$4 sm:$0xff]   ;;  %v6495_v41 = vld [vmem:[#allocation6 + $0x244] ss:$16 sps:$4 sm:$0xff]  }
 0x2fc   :  { %v2080_v0 = vshrl.u32 %v1902_v32, 16  ;;  %v2083_v27 = vshll.u32 %v1902_v32, 16  ;;  %v2088_v18 = vshrl.u32 %v1922_v54, 16  ;;  %v2091_v42 = vshll.u32 %v1922_v54, 16  ;;  %v6498_v54 = vld [vmem:[#allocation6 + $0x224] ss:$16 sps:$4 sm:$0xff]   ;;  %4166 = vmatprep.subr.bf16.mxu0 %v6495_v41 }
 0x2fd   :  { %v6537_v41 = vld [vmem:[#allocation6 + $0x4] ss:$16 sps:$4 sm:$0xff]  }
 0x2fe   :  { %v2082_v58 = vrot.slane %v2080_v0, 3  ;;  %v2085_v45 = vrot.slane %v2083_v27, 4  ;;  %v2090_v59 = vrot.slane %v2088_v18, 3  ;;  %v2093_v2 = vrot.slane %v2091_v42, 4  ;;  %v1839_v16 = vpop.permute.xlu0 %1838  ;;  %4167 = vmatpush1.bf16.msra.mxu0 %v6493_v29  ;;  %v6496_v27 = vld [vmem:[#allocation6 + $0x220] ss:$16 sps:$4 sm:$0xff]  }
 0x2ff   :  { %v1905_v19 = vsel %vm628_vm6, %v5834_v11, %v1839_v16  ;;  %v1924_v50 = vsel %vm1906_vm4, %v1839_v16, %v1878_v62  ;;  %4168 = vmatprep.subr.bf16.mxu0 %v6498_v54  ;;  %v6502_v16 = vld [vmem:[#allocation6 + $0xe0] ss:$16 sps:$4 sm:$0xff]   ;;  %vm2551_vm6 = vcmask 130048  }
 0x300   :  { %v2086_v49 = vor.u32 %v2085_v45, %v2082_v58  ;;  %v2094_v55 = vor.u32 %v2093_v2, %v2090_v59  ;;  %v2096_v7 = vshrl.u32 %v1905_v19, 16  ;;  %v2099_v52 = vshll.u32 %v1905_v19, 16  ;;  %v6499_v59 = vld [vmem:[#allocation6 + $0x200] ss:$16 sps:$4 sm:$0xff]   ;;  %v6501_v2 = vld [vmem:[#allocation6 + $0x204] ss:$16 sps:$4 sm:$0xff]  }
 0x301   :  { %v2104_v33 = vshrl.u32 %v1924_v50, 16  ;;  %v2107_v35 = vshll.u32 %v1924_v50, 16  ;;  %v6504_v50 = vld [vmem:[#allocation6 + $0xe4] ss:$16 sps:$4 sm:$0xff]   ;;  %v6535_v54 = vld [vmem:[#allocation6] ss:$16 sps:$4 sm:$0xff]  }
 0x302   :  { %v2098_v28 = vrot.slane %v2096_v7, 3  ;;  %v2101_v43 = vrot.slane %v2099_v52, 4  ;;  %v2095_v60 = vsel %vm1969_vm5, %v2078_v34, %v2094_v55  ;;  %v2087_v46 = vsel %vm1969_vm5, %v2070_v24, %v2086_v49  ;;  %4169 = vmatpush1.bf16.msra.mxu0 %v6496_v27  ;;  %4115 = vmatprep.subr.bf16.mxu1 %v6504_v50  ;;  %v6505_v7 = vld [vmem:[#allocation6 + $0x3e0] ss:$16 sps:$4 sm:$0xff]  }
 0x303   :  { %v2106_v39 = vrot.slane %v2104_v33, 3  ;;  %v2109_v17 = vrot.slane %v2107_v35, 4  ;;  %5883 = vmatprep.mubr.msk.bf16.mxu1 %vm2278_vm7, %v2095_v60  ;;  %4170 = vmatprep.subr.bf16.mxu0 %v6501_v2  ;;  %v6510_v60 = vld [vmem:[#allocation6 + $0xc4] ss:$16 sps:$4 sm:$0xff]   ;;  %v6538_v50 = vld [vmem:[#allocation6 + $0x1e0] ss:$16 sps:$4 sm:$0xff]  }
 0x304   :  { %v2102_v23 = vor.u32 %v2101_v43, %v2098_v28  ;;  %2403 = vmatmul.mubr.bf16.gmra.mxu1 %v2087_v46  ;;  %v6508_v46 = vld [vmem:[#allocation6 + $0xc0] ss:$16 sps:$4 sm:$0xff]  }
 0x305   :  { %v2110_v1 = vor.u32 %v2109_v17, %v2106_v39  ;;  %4116 = vmatpush1.bf16.msra.mxu1 %v6502_v16  ;;  %v6513_v17 = vld [vmem:[#allocation6 + $0xa4] ss:$16 sps:$4 sm:$0xff]  }
 0x306   :  { %v2103_v21 = vsel %vm1969_vm5, %v2086_v49, %v2102_v23  ;;  %v6507_v49 = vld [vmem:[#allocation6 + $0x3e4] ss:$16 sps:$4 sm:$0xff]   ;;  %4171 = vmatpush1.bf16.msra.mxu0 %v6499_v59  ;;  %4117 = vmatprep.subr.bf16.mxu1 %v6510_v60  ;;  %v6511_v23 = vld [vmem:[#allocation6 + $0xa0] ss:$16 sps:$4 sm:$0xff]  }
 0x307   :  { %v2111_v37 = vsel %vm1969_vm5, %v2094_v55, %v2110_v1  ;;  %4172 = vmatprep.subr.bf16.mxu0 %v6507_v49  ;;  %v6514_v1 = vld [vmem:[#allocation6 + $0x3c0] ss:$16 sps:$4 sm:$0xff]   ;;  %v6546_v49 = vld [vmem:[#allocation6 + $0x1c4] ss:$16 sps:$4 sm:$0xff]  }
 0x308   :  { %5884 = vmatprep.mubr.msk.bf16.mxu1 %vm2278_vm7, %v2111_v37  ;;  %v6550_v60 = vld [vmem:[#allocation6 + $0x340] ss:$16 sps:$4 sm:$0xff]  }
 0x309   :  { %4118 = vmatpush1.bf16.msra.mxu1 %v6508_v46  ;;  %v6552_v46 = vld [vmem:[#allocation6 + $0x344] ss:$16 sps:$4 sm:$0xff]  }
 0x30a   :  { %4173 = vmatpush2.bf16.msra.mxu0 %v6505_v7  ;;  %4119 = vmatprep.subr.bf16.mxu1 %v6513_v17  ;;  %v6544_v7 = vld [vmem:[#allocation6 + $0x1c0] ss:$16 sps:$4 sm:$0xff]  }
 0x30b   :  { %v6553_v17 = vld [vmem:[#allocation6 + $0x180] ss:$16 sps:$4 sm:$0xff]  }
 0x30c   :  { %2413 = vmatmul.mubr.bf16.gmra.mxu1 %v2103_v21  ;;  %v6516_v21 = vld [vmem:[#allocation6 + $0x3c4] ss:$16 sps:$4 sm:$0xff]  }
 0x30d   :  { %4174 = vmatprep.subr.bf16.mxu0 %v6516_v21  ;;  %4120 = vmatpush1.bf16.msra.mxu1 %v6511_v23 }
 0x30e   :  { %4175 = vmatpush2.bf16.msra.mxu0 %v6514_v1  ;;  %4121 = vmatprep.subr.bf16.mxu1 %v6519_v56  ;;  %v6555_v1 = vld [vmem:[#allocation6 + $0x184] ss:$16 sps:$4 sm:$0xff]  }
 0x30f   :  { %4176 = vmatprep.subr.bf16.mxu0 %v6525_v63  ;;  %v6558_v63 = vld [vmem:[#allocation6 + $0x164] ss:$16 sps:$4 sm:$0xff]  }
 0x311   :  { %4122 = vmatpush1.bf16.msra.mxu1 %v6517_v14 }
 0x312   :  { %4123 = vmatprep.subr.bf16.mxu1 %v6522_v9 }
 0x365   :  { %v2344_v57 = vpop.f32.mrf.mxu1 }
 0x366   :  { %v8261_v8 = vadd.f32 %v2344_v57, %v8255_v48  ;;  %v6523_v57 = vld [vmem:[#allocation6 + $0x3a0] ss:$16 sps:$4 sm:$0xff]  }
 0x367   :  { %v2346_v22 = vpop.f32.mrf.mxu1  ;;  %4177 = vmatpush2.bf16.msra.mxu0 %v6523_v57  ;;  %v6556_v57 = vld [vmem:[#allocation6 + $0x160] ss:$16 sps:$4 sm:$0xff]  }
 0x368   :  { %v2423_v4 = vmax.f32 %v8261_v8, 0.0  ;;  %v2347_v6 = vadd.f32 %v2346_v22, %v8258_v26 }
 0x369   :  { %v8268_v47 = vpop.f32.mrf.mxu1 }
 0x36a   :  { %v2424_v44 = vmax.f32 %v2347_v6, 0.0  ;;  %2487 = vrot.lane.b32.xlu0 %v2423_v4, %s7099_s21 }
 0x36b   :  { %v8271_v10 = vpop.f32.mrf.mxu1 }
 0x36c   :  { %2489 = vrot.lane.b32.xlu1 %v2424_v44, %s7099_s21  ;;  %v6520_v44 = vld [vmem:[#allocation6 + $0x60] ss:$16 sps:$4 sm:$0xff]  }
 0x36d   :  { %4124 = vmatpush1.bf16.msra.mxu1 %v6520_v44  ;;  %v6559_v44 = vld [vmem:[#allocation6 + $0x320] ss:$16 sps:$4 sm:$0xff]  }
 0x36e   :  { %4125 = vmatprep.subr.bf16.mxu1 %v6528_v5 }
 0x372   :  { %v2354_v40 = vpop.f32.mrf.mxu1 }
 0x373   :  { %v8274_v36 = vadd.f32 %v2354_v40, %v8255_v48  ;;  %v6526_v40 = vld [vmem:[#allocation6 + $0x40] ss:$16 sps:$4 sm:$0xff]  }
 0x374   :  { %v2356_v31 = vpop.f32.mrf.mxu1  ;;  %4126 = vmatpush1.bf16.msra.mxu1 %v6526_v40  ;;  %v6564_v40 = vld [vmem:[#allocation6 + $0x144] ss:$16 sps:$4 sm:$0xff]  }
 0x375   :  { %v2427_v24 = vmax.f32 %v8274_v36, 0.0  ;;  %v2357_v34 = vadd.f32 %v2356_v31, %v8258_v26  ;;  %v6529_v31 = vld [vmem:[#allocation6 + $0x20] ss:$16 sps:$4 sm:$0xff]   ;;  %4127 = vmatprep.subr.bf16.mxu1 %v6531_v61 }
 0x376   :  { %v8282_v51 = vpop.f32.mrf.mxu1  ;;  %v6562_v61 = vld [vmem:[#allocation6 + $0x140] ss:$16 sps:$4 sm:$0xff]  }
 0x377   :  { %v2428_v38 = vmax.f32 %v2357_v34, 0.0  ;;  %2495 = vrot.lane.b32.xlu0 %v2427_v24, %s7099_s21  ;;  %v6532_v34 = vld [vmem:[#allocation6 + $0x380] ss:$16 sps:$4 sm:$0xff]  }
 0x378   :  { %v8284_v32 = vpop.f32.mrf.mxu1  ;;  %4128 = vmatpush1.bf16.msra.mxu1 %v6529_v31 }
 0x379   :  { %2497 = vrot.lane.b32.xlu1 %v2428_v38, %s7099_s21  ;;  %v6534_v38 = vld [vmem:[#allocation6 + $0x384] ss:$16 sps:$4 sm:$0xff]   ;;  %4129 = vmatprep.subr.bf16.mxu1 %v6537_v41 }
 0x37a   :  { %4178 = vmatprep.subr.bf16.mxu0 %v6534_v38  ;;  %v6567_v41 = vld [vmem:[#allocation6 + $0x124] ss:$16 sps:$4 sm:$0xff]  }
 0x37b   :  { %4179 = vmatpush2.bf16.msra.mxu0 %v6532_v34 }
 0x37c   :  { %4130 = vmatpush1.bf16.msra.mxu1 %v6535_v54  ;;  %v8356_v54 = vadd.f32 %v8268_v47, %v8255_v48 }
 0x37e   :  { %v2425_v47 = vmax.f32 %v8356_v54, 0.0 }
 0x382   :  { %v2364_v0 = vpop.f32.mrf.mxu1 }
 0x383   :  { %v8287_v18 = vadd.f32 %v2364_v0, %v8255_v48  ;;  %v6543_v0 = vld [vmem:[#allocation6 + $0x364] ss:$16 sps:$4 sm:$0xff]  }
 0x384   :  { %v2366_v42 = vpop.f32.mrf.mxu1  ;;  %4180 = vmatprep.subr.bf16.mxu0 %v6543_v0 }
 0x385   :  { %v2431_v11 = vmax.f32 %v8287_v18, 0.0  ;;  %v2367_v62 = vadd.f32 %v2366_v42, %v8258_v26  ;;  %v6540_v42 = vld [vmem:[#allocation6 + $0x1e4] ss:$16 sps:$4 sm:$0xff]  }
 0x386   :  { %v8295_v45 = vpop.f32.mrf.mxu1  ;;  %4131 = vmatprep.subr.bf16.mxu1 %v6540_v42  ;;  %v6565_v42 = vld [vmem:[#allocation6 + $0x120] ss:$16 sps:$4 sm:$0xff]  }
 0x387   :  { %v2432_v58 = vmax.f32 %v2367_v62, 0.0  ;;  %2503 = vrot.lane.b32.xlu0 %v2431_v11, %s7099_s21  ;;  %v6541_v62 = vld [vmem:[#allocation6 + $0x360] ss:$16 sps:$4 sm:$0xff]   ;;  %4132 = vmatpush2.bf16.msra.mxu1 %v6538_v50  ;;  %v6570_v50 = vld [vmem:[#allocation6 + $0x304] ss:$16 sps:$4 sm:$0xff]  }
 0x388   :  { %v8297_v19 = vpop.f32.mrf.mxu1  ;;  %4181 = vmatpush2.bf16.msra.mxu0 %v6541_v62  ;;  %4133 = vmatprep.subr.bf16.mxu1 %v6546_v49  ;;  %v2351_v62 = vadd.f32 %v8271_v10, %v8258_v26  ;;  %v6573_v49 = vld [vmem:[#allocation6 + $0x104] ss:$16 sps:$4 sm:$0xff]  }
 0x389   :  { %2505 = vrot.lane.b32.xlu1 %v2432_v58, %s7099_s21  ;;  %4182 = vmatprep.subr.bf16.mxu0 %v6552_v46  ;;  %v6579_v46 = vld [vmem:[#allocation6 + $0x6e4] ss:$16 sps:$4 sm:$0xff]  }
 0x38a   :  { %v2426_v10 = vmax.f32 %v2351_v62, 0.0 }
 0x38b   :  { %4134 = vmatpush2.bf16.msra.mxu1 %v6544_v7  ;;  %v6571_v7 = vld [vmem:[#allocation6 + $0x100] ss:$16 sps:$4 sm:$0xff]  }
 0x38c   :  { %4183 = vmatpush2.bf16.msra.mxu0 %v6550_v60  ;;  %v6576_v60 = vld [vmem:[#allocation6 + $0x4e4] ss:$16 sps:$4 sm:$0xff]  }
 0x392   :  { %v2374_v55 = vpop.f32.mrf.mxu1 }
 0x393   :  { %v8300_v52 = vadd.f32 %v2374_v55, %v8255_v48 }
 0x394   :  { %v2376_v33 = vpop.f32.mrf.mxu1 }
 0x395   :  { %v2435_v35 = vmax.f32 %v8300_v52, 0.0  ;;  %v2377_v28 = vadd.f32 %v2376_v33, %v8258_v26 }
 0x396   :  { %v8308_v39 = vpop.f32.mrf.mxu1 }
 0x397   :  { %v2436_v43 = vmax.f32 %v2377_v28, 0.0  ;;  %2511 = vrot.lane.b32.xlu0 %v2435_v35, %s7099_s21  ;;  %v6549_v28 = vld [vmem:[#allocation6 + $0x1a4] ss:$16 sps:$4 sm:$0xff]  }
 0x398   :  { %v8310_v37 = vpop.f32.mrf.mxu1  ;;  %4135 = vmatprep.subr.bf16.mxu1 %v6549_v28  ;;  %v2361_v28 = vadd.f32 %v8284_v32, %v8258_v26 }
 0x399   :  { %2513 = vrot.lane.b32.xlu1 %v2436_v43, %s7099_s21  ;;  %v6547_v43 = vld [vmem:[#allocation6 + $0x1a0] ss:$16 sps:$4 sm:$0xff]  }
 0x39a   :  { %4136 = vmatpush2.bf16.msra.mxu1 %v6547_v43 }
 0x39b   :  { %4137 = vmatprep.subr.bf16.mxu1 %v6555_v1  ;;  %v2371_v1 = vadd.f32 %v8297_v19, %v8258_v26 }
 0x39e   :  { %4138 = vmatpush2.bf16.msra.mxu1 %v6553_v17  ;;  %v2430_v17 = vmax.f32 %v2361_v28, 0.0 }
 0x39f   :  { %4139 = vmatprep.subr.bf16.mxu1 %v6558_v63 }
 0x3a2   :  { %v2384_v30 = vpop.f32.mrf.mxu1  ;;  %4140 = vmatpush2.bf16.msra.mxu1 %v6556_v57 }
 0x3a3   :  { %v8313_v25 = vadd.f32 %v2384_v30, %v8255_v48  ;;  %4141 = vmatprep.subr.bf16.mxu1 %v6564_v40 }
 0x3a4   :  { %v2386_v53 = vpop.f32.mrf.mxu1 }
 0x3a5   :  { %v2439_v22 = vmax.f32 %v8313_v25, 0.0  ;;  %v2387_v6 = vadd.f32 %v2386_v53, %v8258_v26 }
 0x3a6   :  { %v8321_v20 = vpop.f32.mrf.mxu1  ;;  %4142 = vmatpush2.bf16.msra.mxu1 %v6562_v61 }
 0x3a7   :  { %v2440_v3 = vmax.f32 %v2387_v6, 0.0  ;;  %2519 = vrot.lane.b32.xlu0 %v2439_v22, %s7099_s21  ;;  %4143 = vmatprep.subr.bf16.mxu1 %v6567_v41  ;;  %v8401_v57 = vadd.f32 %v8321_v20, %v8255_v48 }
 0x3a8   :  { %v8323_v29 = vpop.f32.mrf.mxu1 }
 0x3a9   :  { %2521 = vrot.lane.b32.xlu1 %v2440_v3, %s7099_s21  ;;  %v6561_v3 = vld [vmem:[#allocation6 + $0x324] ss:$16 sps:$4 sm:$0xff]   ;;  %v2441_v20 = vmax.f32 %v8401_v57, 0.0 }
 0x3aa   :  { %4184 = vmatprep.subr.bf16.mxu0 %v6561_v3  ;;  %4144 = vmatpush2.bf16.msra.mxu1 %v6565_v42 }
 0x3ab   :  { %4185 = vmatpush2.bf16.msra.mxu0 %v6559_v44  ;;  %4145 = vmatprep.subr.bf16.mxu1 %v6573_v49  ;;  %v2391_v44 = vadd.f32 %v8323_v29, %v8258_v26 }
 0x3ac   :  { %4186 = vmatprep.subr.bf16.mxu0 %v6570_v50 }
 0x3ad   :  { %v2442_v8 = vmax.f32 %v2391_v44, 0.0 }
 0x3ae   :  { %4146 = vmatpush2.bf16.msra.mxu1 %v6571_v7 }
 0x3af   :  { %4197 = vmatprep.subr.bf16.mxu1 %v6576_v60 }
 0x3b2   :  { %v2394_v27 = vpop.f32.mrf.mxu1 }
 0x3b3   :  { %v8326_v58 = vadd.f32 %v2394_v27, %v8255_v48 }
 0x3b4   :  { %v2396_v59 = vpop.f32.mrf.mxu1 }
 0x3b5   :  { %v2443_v2 = vmax.f32 %v8326_v58, 0.0  ;;  %v2397_v16 = vadd.f32 %v2396_v59, %v8258_v26 }
 0x3b6   :  { %v8334_v33 = vpop.f32.mrf.mxu1 }
 0x3b7   :  { %v2444_v55 = vmax.f32 %v2397_v16, 0.0  ;;  %2527 = vrot.lane.b32.xlu0 %v2443_v2, %s7099_s21  ;;  %v6568_v16 = vld [vmem:[#allocation6 + $0x300] ss:$16 sps:$4 sm:$0xff]   ;;  %v8416_v3 = vadd.f32 %v8334_v33, %v8255_v48 }
 0x3b8   :  { %v8336_v23 = vpop.f32.mrf.mxu1  ;;  %4187 = vmatpush2.bf16.msra.mxu0 %v6568_v16 }
 0x3b9   :  { %2529 = vrot.lane.b32.xlu1 %v2444_v55, %s7099_s21  ;;  %v8368_v55 = vadd.f32 %v8282_v51, %v8255_v48  ;;  %v8379_v51 = vadd.f32 %v8295_v45, %v8255_v48  ;;  %4238 = vmatprep.subr.bf16.mxu0 %v6579_v46  ;;  %v8390_v45 = vadd.f32 %v8308_v39, %v8255_v48  ;;  %v2445_v40 = vmax.f32 %v8416_v3, 0.0  ;;  %v6595_v3 = vld [vmem:[#allocation6 + $0x680] ss:$16 sps:$4 sm:$0xff]  }
 0x3bb   :  { %v2429_v43 = vmax.f32 %v8368_v55, 0.0  ;;  %v2433_v32 = vmax.f32 %v8379_v51, 0.0 }
 0x3c4   :  { %v2404_v21 = vpop.f32.mrf.mxu1 }
 0x3c5   :  { %v8339_v56 = vadd.f32 %v2404_v21, %v8255_v48  ;;  %v2434_v21 = vmax.f32 %v2371_v1, 0.0 }
 0x3c6   :  { %v2406_v14 = vpop.f32.mrf.mxu1 }
 0x3c7   :  { %v2447_v30 = vmax.f32 %v8339_v56, 0.0  ;;  %v2407_v9 = vadd.f32 %v2406_v14, %v8258_v26  ;;  %v2381_v14 = vadd.f32 %v8310_v37, %v8258_v26 }
 0x3c8   :  { %v8343_v53 = vpop.f32.mrf.mxu1 }
 0x3c9   :  { %v2448_v6 = vmax.f32 %v2407_v9, 0.0  ;;  %2535 = vrot.lane.b32.xlu0 %v2447_v30, %s7099_s21  ;;  %v2437_v9 = vmax.f32 %v8390_v45, 0.0  ;;  %v8427_v61 = vadd.f32 %v8343_v53, %v8255_v48 }
 0x3ca   :  { %v8348_v5 = vpop.f32.mrf.mxu1 }
 0x3cb   :  { %2537 = vrot.lane.b32.xlu1 %v2448_v6, %s7099_s21  ;;  %v2438_v6 = vmax.f32 %v2381_v14, 0.0 }
 0x3cc   :  { %v2414_v31 = vpop.f32.mrf.mxu1 }
 0x3cd   :  { %v8352_v34 = vadd.f32 %v2414_v31, %v8255_v48  ;;  %v2411_v31 = vadd.f32 %v8348_v5, %v8258_v26 }
 0x3ce   :  { %v2416_v38 = vpop.f32.mrf.mxu1 }
 0x3cf   :  { %v2451_v0 = vmax.f32 %v8352_v34, 0.0  ;;  %v2417_v27 = vadd.f32 %v2416_v38, %v8258_v26  ;;  %v2449_v38 = vmax.f32 %v8427_v61, 0.0  ;;  %v2450_v62 = vmax.f32 %v2411_v31, 0.0  ;;  %v6601_v61 = vld [vmem:[#allocation6 + $0x660] ss:$16 sps:$4 sm:$0xff]  }
 0x3d0   :  { %v2418_v29 = vpop.f32.mrf.mxu1 }
 0x3d1   :  { %v2452_v59 = vmax.f32 %v2417_v27, 0.0  ;;  %2543 = vrot.lane.b32.xlu0 %v2451_v0, %s7099_s21  ;;  %v8437_v41 = vadd.f32 %v2418_v29, %v8255_v48 }
 0x3d3   :  { %2545 = vrot.lane.b32.xlu1 %v2452_v59, %s7099_s21  ;;  %v2453_v16 = vmax.f32 %v8437_v41, 0.0 }
 0x3d5   :  { %2491 = vrot.lane.b32.xlu0 %v2425_v47, %s7099_s21 }
 0x3d7   :  { %2493 = vrot.lane.b32.xlu1 %v2426_v10, %s7099_s21 }
 0x3d9   :  { %2499 = vrot.lane.b32.xlu0 %v2429_v43, %s7099_s21 }
 0x3db   :  { %2501 = vrot.lane.b32.xlu1 %v2430_v17, %s7099_s21 }
 0x3dc   :  { %v2488_v19 = vpop.permute.xlu0 %2487 }
 0x3dd   :  { %2507 = vrot.lane.b32.xlu0 %v2433_v32, %s7099_s21 }
 0x3de   :  { %v2490_v63 = vpop.permute.xlu1 %2489 }
 0x3df   :  { %v2552_v39 = vsel %vm2551_vm6, %v2488_v19, %v2490_v63  ;;  %2509 = vrot.lane.b32.xlu1 %v2434_v21, %s7099_s21 }
 0x3e0   :  { %v2584_v37 = vmax.f32 %v2423_v4, %v2552_v39  ;;  %v2401_v4 = vadd.f32 %v8336_v23, %v8258_v26  ;;  %v2420_v23 = vpop.f32.mrf.mxu1 }
 0x3e1   :  { %2515 = vrot.lane.b32.xlu0 %v2437_v9, %s7099_s21  ;;  %v2421_v59 = vadd.f32 %v2420_v23, %v8258_v26 }
 0x3e2   :  { %2601 = vst.msk [vmem:[#allocation5] sm:$0xff] %vm2600_vm8, %v2584_v37  ;;  %v2446_v33 = vmax.f32 %v2401_v4, 0.0 }
 0x3e3   :  { %2517 = vrot.lane.b32.xlu1 %v2438_v6, %s7099_s21  ;;  %v2454_v48 = vmax.f32 %v2421_v59, 0.0 }
 0x3e5   :  { %2523 = vrot.lane.b32.xlu0 %v2441_v20, %s7099_s21 }
 0x3e7   :  { %2525 = vrot.lane.b32.xlu1 %v2442_v8, %s7099_s21 }
 0x3e9   :  { %2531 = vrot.lane.b32.xlu0 %v2445_v40, %s7099_s21  ;;  %v2496_v27 = vpop.permute.xlu0 %2495 }
 0x3eb   :  { %v2498_v42 = vpop.permute.xlu1 %2497  ;;  %2533 = vrot.lane.b32.xlu1 %v2446_v33, %s7099_s21 }
 0x3ec   :  { %v2554_v53 = vsel %vm2551_vm6, %v2496_v27, %v2498_v42 }
 0x3ed   :  { %v2586_v5 = vmax.f32 %v2427_v24, %v2554_v53  ;;  %2539 = vrot.lane.b32.xlu0 %v2449_v38, %s7099_s21 }
 0x3ef   :  { %2603 = vst.msk [vmem:[#allocation5 + $0x10] sm:$0xff] %vm2600_vm8, %v2586_v5  ;;  %2541 = vrot.lane.b32.xlu1 %v2450_v62, %s7099_s21 }
 0x3f1   :  { %2547 = vrot.lane.b32.xlu0 %v2453_v16, %s7099_s21 }
 0x3f3   :  { %2549 = vrot.lane.b32.xlu1 %v2454_v48, %s7099_s21 }
 0x3f6   :  { %v2642_v33 = vld [vmem:[#allocation5 + $0x3] ss:$16 sm:$0x3]  ;;  %v2668_v31 = vld [vmem:[#allocation5 + $0x6] ss:$16 sm:$0x3] }
 0x3f7   :  { %v2676_v53 = vld [vmem:[#allocation5 + $0x7] ss:$16 sm:$0x3]  ;;  %v2617_v62 = vld [vmem:[#allocation5] ss:$16 sm:$0x3] }
 0x3f8   :  { %v2625_v59 = vld [vmem:[#allocation5 + $0x1] ss:$16 sm:$0x3] }
 0x3f9   :  { %v2504_v26 = vpop.permute.xlu0 %2503 }
 0x3fb   :  { %v2506_v36 = vpop.permute.xlu1 %2505 }
 0x3fc   :  { %v2556_v24 = vsel %vm2551_vm6, %v2504_v26, %v2506_v36  ;;  %v2651_v36 = vld [vmem:[#allocation5 + $0x4] ss:$16 sm:$0x3] }
 0x3fd   :  { %v2588_v50 = vmax.f32 %v2431_v11, %v2556_v24 }
 0x3ff   :  { %2605 = vst.msk [vmem:[#allocation5 + $0x20] sm:$0xff] %vm2600_vm8, %v2588_v50 }
 0x409   :  { %v2512_v49 = vpop.permute.xlu0 %2511 }
 0x40b   :  { %v2514_v7 = vpop.permute.xlu1 %2513 }
 0x40c   :  { %v2558_v10 = vsel %vm2551_vm6, %v2512_v49, %v2514_v7 }
 0x40d   :  { %v2590_v28 = vmax.f32 %v2435_v35, %v2558_v10 }
 0x40f   :  { %2607 = vst.msk [vmem:[#allocation5 + $0x30] sm:$0xff] %vm2600_vm8, %v2590_v28 }
 0x416   :  { %v2643_v6 = vld [vmem:[#allocation5 + $0x3] ss:$16 sm:$0xc]  ;;  %v2669_v44 = vld [vmem:[#allocation5 + $0x6] ss:$16 sm:$0xc] }
 0x417   :  { %v2677_v4 = vld [vmem:[#allocation5 + $0x7] ss:$16 sm:$0xc]  ;;  %v2618_v29 = vld [vmem:[#allocation5] ss:$16 sm:$0xc]  ;;  %v2644_v49 = vor.u32 %v2643_v6, %v2642_v33  ;;  %v2670_v7 = vor.u32 %v2669_v44, %v2668_v31 }
 0x418   :  { %v2626_v23 = vld [vmem:[#allocation5 + $0x1] ss:$16 sm:$0xc]  ;;  %v2652_v27 = vld [vmem:[#allocation5 + $0x4] ss:$16 sm:$0xc] }
 0x419   :  { %v2520_v60 = vpop.permute.xlu0 %2519  ;;  %v2660_v5 = vld [vmem:[#allocation5 + $0x5] ss:$16 sm:$0xc] }
 0x41b   :  { %v2522_v46 = vpop.permute.xlu1 %2521 }
 0x41c   :  { %v2560_v17 = vsel %vm2551_vm6, %v2520_v60, %v2522_v46  ;;  %v2619_v60 = vor.u32 %v2618_v29, %v2617_v62  ;;  %v2627_v46 = vor.u32 %v2626_v23, %v2625_v59 }
 0x41d   :  { %v2592_v1 = vmax.f32 %v2439_v22, %v2560_v17 }
 0x41f   :  { %2609 = vst.msk [vmem:[#allocation5 + $0x40] sm:$0xff] %vm2600_vm8, %v2592_v1 }
 0x429   :  { %v2528_v18 = vpop.permute.xlu0 %2527 }
 0x42b   :  { %v2530_v11 = vpop.permute.xlu1 %2529 }
 0x42c   :  { %v2562_v21 = vsel %vm2551_vm6, %v2528_v18, %v2530_v11 }
 0x42d   :  { %v2594_v14 = vmax.f32 %v2443_v2, %v2562_v21  ;;  %v2635_v2 = vld [vmem:[#allocation5 + $0x2] ss:$16 sm:$0xc] }
 0x42f   :  { %2611 = vst.msk [vmem:[#allocation5 + $0x50] sm:$0xff] %vm2600_vm8, %v2594_v14 }
 0x436   :  { %v2637_v42 = vld [vmem:[#allocation5 + $0x2] ss:$16 sm:$0x30]  ;;  %v2645_v48 = vld [vmem:[#allocation5 + $0x3] ss:$16 sm:$0x30] }
 0x437   :  { %v2671_v26 = vld [vmem:[#allocation5 + $0x6] ss:$16 sm:$0x30]  ;;  %v2679_v10 = vld [vmem:[#allocation5 + $0x7] ss:$16 sm:$0x30]  ;;  %v2646_v14 = vor.u32 %v2645_v48, %v2644_v49 }
 0x438   :  { %v2620_v28 = vld [vmem:[#allocation5] ss:$16 sm:$0x30]  ;;  %v2628_v17 = vld [vmem:[#allocation5 + $0x1] ss:$16 sm:$0x30] }
 0x439   :  { %v2654_v1 = vld [vmem:[#allocation5 + $0x4] ss:$16 sm:$0x30] }
 0x43b   :  { %v2536_v52 = vpop.permute.xlu0 %2535 }
 0x43d   :  { %v2538_v35 = vpop.permute.xlu1 %2537 }
 0x43e   :  { %v2564_v19 = vsel %vm2551_vm6, %v2536_v52, %v2538_v35  ;;  %v2653_v52 = vor.u32 %v2652_v27, %v2651_v36  ;;  %v2659_v35 = vld [vmem:[#allocation5 + $0x5] ss:$16 sm:$0x3] }
 0x43f   :  { %v2596_v63 = vmax.f32 %v2447_v30, %v2564_v19  ;;  %v2634_v30 = vld [vmem:[#allocation5 + $0x2] ss:$16 sm:$0x3]  ;;  %v2662_v19 = vld [vmem:[#allocation5 + $0x5] ss:$16 sm:$0x30] }
 0x440   :  { %v2636_v50 = vor.u32 %v2635_v2, %v2634_v30 }
 0x441   :  { %2613 = vst.msk [vmem:[#allocation5 + $0x60] sm:$0xff] %vm2600_vm8, %v2596_v63 }
 0x442   :  { %v2638_v21 = vor.u32 %v2637_v42, %v2636_v50 }
 0x443   :  { %v2544_v25 = vpop.permute.xlu0 %2543 }
 0x445   :  { %v2546_v22 = vpop.permute.xlu1 %2545 }
 0x446   :  { %v2566_v39 = vsel %vm2551_vm6, %v2544_v25, %v2546_v22  ;;  %v2672_v22 = vor.u32 %v2671_v26, %v2670_v7  ;;  %v6574_v7 = vld [vmem:[#allocation6 + $0x4e0] ss:$16 sps:$4 sm:$0xff]  }
 0x447   :  { %v2598_v37 = vmax.f32 %v2451_v0, %v2566_v39  ;;  %v2492_v58 = vpop.permute.xlu0 %2491 }
 0x449   :  { %2615 = vst.msk [vmem:[#allocation5 + $0x70] sm:$0xff] %vm2600_vm8, %v2598_v37  ;;  %v2494_v8 = vpop.permute.xlu1 %2493  ;;  %v2621_v37 = vor.u32 %v2620_v28, %v2619_v60 }
 0x44a   :  { %v2553_v56 = vsel %vm2551_vm6, %v2492_v58, %v2494_v8  ;;  %v2661_v58 = vor.u32 %v2660_v5, %v2659_v35  ;;  %v6591_v35 = vld [vmem:[#allocation6 + $0x6a4] ss:$16 sps:$4 sm:$0xff]   ;;  %v6825_v5 = vld [vmem:[%s9017_s7 + $0x84] ss:$16 sps:$4 sm:$0xff]  }
 0x44b   :  { %v2585_v34 = vmax.f32 %v2425_v47, %v2553_v56  ;;  %v2500_v0 = vpop.permute.xlu0 %2499  ;;  %v2678_v47 = vor.u32 %v2677_v4, %v2676_v53  ;;  %v2655_v4 = vor.u32 %v2654_v1, %v2653_v52  ;;  %v6585_v1 = vld [vmem:[#allocation6 + $0x6c4] ss:$16 sps:$4 sm:$0xff]  }
 0x44c   :  { %v2663_v23 = vor.u32 %v2662_v19, %v2661_v58  ;;  %v6588_v52 = vld [vmem:[#allocation6 + $0x4a4] ss:$16 sps:$4 sm:$0xff]   ;;  %v9058_v19 = vmov 0  }
 0x44d   :  { %2602 = vst.msk [vmem:[#allocation5 + $0x8] sm:$0xff] %vm2600_vm8, %v2585_v34  ;;  %v2502_v24 = vpop.permute.xlu1 %2501  ;;  %v2680_v39 = vor.u32 %v2679_v10, %v2678_v47  ;;  %v6597_v58 = vld [vmem:[#allocation6 + $0x684] ss:$16 sps:$4 sm:$0xff]  }
 0x44e   :  { %v2555_v54 = vsel %vm2551_vm6, %v2500_v0, %v2502_v24 }
 0x44f   :  { %v2587_v18 = vmax.f32 %v2429_v43, %v2555_v54  ;;  %v2508_v11 = vpop.permute.xlu0 %2507  ;;  %v2629_v43 = vor.u32 %v2628_v17, %v2627_v46  ;;  %v6577_v54 = vld [vmem:[#allocation6 + $0x6e0] ss:$16 sps:$4 sm:$0xff]   ;;  %v6582_v46 = vld [vmem:[#allocation6 + $0x4c4] ss:$16 sps:$4 sm:$0xff]  }
 0x450   :  { %v2639_v63 = vld [vmem:[#allocation5 + $0x2] ss:$16 sm:$0xc0]  ;;  %v2647_v25 = vld [vmem:[#allocation5 + $0x3] ss:$16 sm:$0xc0] }
 0x451   :  { %2604 = vst.msk [vmem:[#allocation5 + $0x18] sm:$0xff] %vm2600_vm8, %v2587_v18  ;;  %v2510_v2 = vpop.permute.xlu1 %2509  ;;  %v2640_v6 = vor.u32 %v2639_v63, %v2638_v21  ;;  %v2648_v44 = vor.u32 %v2647_v25, %v2646_v14  ;;  %v2673_v8 = vld [vmem:[#allocation5 + $0x6] ss:$16 sm:$0xc0]  ;;  %v6580_v18 = vld [vmem:[#allocation6 + $0x4c0] ss:$16 sps:$4 sm:$0xff]  }
 0x452   :  { %v2681_v55 = vld [vmem:[#allocation5 + $0x7] ss:$16 sm:$0xc0]  ;;  %v2557_v29 = vsel %vm2551_vm6, %v2508_v11, %v2510_v2  ;;  %v2674_v56 = vor.u32 %v2673_v8, %v2672_v22  ;;  %v2622_v33 = vld [vmem:[#allocation5] ss:$16 sm:$0xc0] }
 0x453   :  { %v2682_v30 = vor.u32 %v2681_v55, %v2680_v39  ;;  %v2630_v31 = vld [vmem:[#allocation5 + $0x1] ss:$16 sm:$0xc0]  ;;  %v2589_v27 = vmax.f32 %v2433_v32, %v2557_v29  ;;  %v2516_v34 = vpop.permute.xlu0 %2515  ;;  %v2649_v0 = vmax.f32 %v2640_v6, %v2648_v44  ;;  %v2623_v42 = vor.u32 %v2622_v33, %v2621_v37  ;;  %v2656_v62 = vld [vmem:[#allocation5 + $0x4] ss:$16 sm:$0xc0] }
 0x454   :  { %v2631_v53 = vor.u32 %v2630_v31, %v2629_v43  ;;  %v2664_v59 = vld [vmem:[#allocation5 + $0x5] ss:$16 sm:$0xc0]  ;;  %v2657_v26 = vor.u32 %v2656_v62, %v2655_v4  ;;  %v6583_v21 = vld [vmem:[#allocation6 + $0x6c0] ss:$16 sps:$4 sm:$0xff]  }
 0x455   :  { %v2683_v48 = vmax.f32 %v2674_v56, %v2682_v30  ;;  %v2665_v36 = vor.u32 %v2664_v59, %v2663_v23  ;;  %2606 = vst.msk [vmem:[#allocation5 + $0x28] sm:$0xff] %vm2600_vm8, %v2589_v27  ;;  %v2518_v24 = vpop.permute.xlu1 %2517  ;;  %v8496_v51 = vpack.c.bf16 %v2649_v0, %v2649_v0  ;;  %v6586_v22 = vld [vmem:[#allocation6 + $0x4a0] ss:$16 sps:$4 sm:$0xff]   ;;  %v6594_v37 = vld [vmem:[#allocation6 + $0x484] ss:$16 sps:$4 sm:$0xff]  }
 0x456   :  { %v2632_v32 = vmax.f32 %v2623_v42, %v2631_v53  ;;  %v2559_v50 = vsel %vm2551_vm6, %v2516_v34, %v2518_v24  ;;  %v6592_v44 = vld [vmem:[#allocation6 + $0x480] ss:$16 sps:$4 sm:$0xff]   ;;  %v6603_v55 = vld [vmem:[#allocation6 + $0x664] ss:$16 sps:$4 sm:$0xff]  }
 0x457   :  { %v8499_v49 = vpack.c.bf16 %v2683_v48, %v2683_v48  ;;  %v2666_v10 = vmax.f32 %v2657_v26, %v2665_v36  ;;  %v2591_v28 = vmax.f32 %v2437_v9, %v2559_v50  ;;  %6111 = vmatprep.mubr.msk.bf16.mxu1 %vm8491_vm9, %v8496_v51  ;;  %v2524_v47 = vpop.permute.xlu0 %2523  ;;  %v6598_v56 = vld [vmem:[#allocation6 + $0x460] ss:$16 sps:$4 sm:$0xff]   ;;  %v6609_v33 = vld [vmem:[#allocation6 + $0x644] ss:$16 sps:$4 sm:$0xff]  }
 0x458   :  { %v8506_v60 = vpack.c.bf16 %v2632_v32, %v2632_v32  ;;  %v6604_v31 = vld [vmem:[#allocation6 + $0x440] ss:$16 sps:$4 sm:$0xff]   ;;  %v6612_v27 = vld [vmem:[#allocation6 + $0x424] ss:$16 sps:$4 sm:$0xff]  }
 0x459   :  { %6117 = vmatprep.mubr.msk.bf16.mxu0 %vm8491_vm9, %v8499_v49  ;;  %v8511_v17 = vpack.c.bf16 %v2666_v10, %v2666_v10  ;;  %2608 = vst.msk [vmem:[#allocation5 + $0x38] sm:$0xff] %vm2600_vm8, %v2591_v28  ;;  %v2526_v45 = vpop.permute.xlu1 %2525  ;;  %v6607_v23 = vld [vmem:[#allocation6 + $0x640] ss:$16 sps:$4 sm:$0xff]   ;;  %v6615_v34 = vld [vmem:[#allocation6 + $0x624] ss:$16 sps:$4 sm:$0xff]  }
 0x45a   :  { %6114 = vmatmul.mubr.msk.bf16.vlgmr.msra.gmra.mxu1 %vm8491_vm9, %v8506_v60  ;;  %v2561_v9 = vsel %vm2551_vm6, %v2524_v47, %v2526_v45  ;;  %v2702_v0 = vld [vmem:[#allocation5 + $0xa] ss:$16 sm:$0x3]  ;;  %v2710_v53 = vld [vmem:[#allocation5 + $0xb] ss:$16 sm:$0x3] }
 0x45b   :  { %6120 = vmatmul.mubr.msk.bf16.vlgmr.msra.gmra.mxu0 %vm8491_vm9, %v8511_v17  ;;  %4198 = vmatpush1.bf16.msra.mxu1 %v6574_v7  ;;  %v2593_v11 = vmax.f32 %v2441_v20, %v2561_v9  ;;  %v2532_v14 = vpop.permute.xlu0 %2531  ;;  %v6589_v20 = vld [vmem:[#allocation6 + $0x6a0] ss:$16 sps:$4 sm:$0xff]   ;;  %v2719_v41 = vld [vmem:[#allocation5 + $0xc] ss:$16 sm:$0x3] }
 0x45c   :  { %4239 = vmatpush1.bf16.msra.mxu0 %v6577_v54  ;;  %4199 = vmatprep.subr.bf16.mxu1 %v6582_v46  ;;  %v2727_v59 = vld [vmem:[#allocation5 + $0xd] ss:$16 sm:$0x3]  ;;  %v6610_v10 = vld [vmem:[#allocation6 + $0x420] ss:$16 sps:$4 sm:$0xff]  }
 0x45d   :  { %4240 = vmatprep.subr.bf16.mxu0 %v6585_v1  ;;  %4270 = vmatprep.mubr.bf16.mxu0 %v9058_v19  ;;  %2610 = vst.msk [vmem:[#allocation5 + $0x48] sm:$0xff] %vm2600_vm8, %v2593_v11  ;;  %v2534_v63 = vpop.permute.xlu1 %2533  ;;  %v6613_v47 = vld [vmem:[#allocation6 + $0x620] ss:$16 sps:$4 sm:$0xff]   ;;  %v6618_v46 = vld [vmem:[#allocation6 + $0x404] ss:$16 sps:$4 sm:$0xff]  }
 0x45e   :  { %v2563_v25 = vsel %vm2551_vm6, %v2532_v14, %v2534_v63  ;;  %v6621_v1 = vld [vmem:[#allocation6 + $0x604] ss:$16 sps:$4 sm:$0xff]  }
 0x45f   :  { %4200 = vmatpush1.bf16.msra.mxu1 %v6580_v18  ;;  %v2595_v57 = vmax.f32 %v2445_v40, %v2563_v25  ;;  %v2540_v39 = vpop.permute.xlu0 %2539  ;;  %v6600_v40 = vld [vmem:[#allocation6 + $0x464] ss:$16 sps:$4 sm:$0xff]  }
 0x460   :  { %4241 = vmatpush1.bf16.msra.mxu0 %v6583_v21  ;;  %4201 = vmatprep.subr.bf16.mxu1 %v6588_v52  ;;  %v2703_v42 = vld [vmem:[#allocation5 + $0xa] ss:$16 sm:$0xc]  ;;  %v2711_v62 = vld [vmem:[#allocation5 + $0xb] ss:$16 sm:$0xc] }
 0x461   :  { %4242 = vmatprep.subr.bf16.mxu0 %v6591_v35  ;;  %2612 = vst.msk [vmem:[#allocation5 + $0x58] sm:$0xff] %vm2600_vm8, %v2595_v57  ;;  %v2542_v2 = vpop.permute.xlu1 %2541  ;;  %v2728_v48 = vld [vmem:[#allocation5 + $0xd] ss:$16 sm:$0xc]  ;;  %v2704_v24 = vor.u32 %v2703_v42, %v2702_v0  ;;  %v2712_v32 = vor.u32 %v2711_v62, %v2710_v53  ;;  %v6646_v0 = vld [vmem:[#allocation6 + $0x560] ss:$16 sps:$4 sm:$0xff]  }
 0x462   :  { %v2565_v6 = vsel %vm2551_vm6, %v2540_v39, %v2542_v2  ;;  %v2729_v54 = vor.u32 %v2728_v48, %v2727_v59  ;;  %v6619_v39 = vld [vmem:[#allocation6 + $0x600] ss:$16 sps:$4 sm:$0xff]   ;;  %v6649_v42 = vld [vmem:[#allocation6 + $0x68] ss:$16 sps:$4 sm:$0xff]   ;;  %v6654_v53 = vld [vmem:[#allocation6 + $0x544] ss:$16 sps:$4 sm:$0xff]  }
 0x463   :  { %4202 = vmatpush1.bf16.msra.mxu1 %v6586_v22  ;;  %v2597_v8 = vmax.f32 %v2449_v38, %v2565_v6  ;;  %v2548_v43 = vpop.permute.xlu0 %2547  ;;  %v6606_v38 = vld [vmem:[#allocation6 + $0x444] ss:$16 sps:$4 sm:$0xff]   ;;  %v6616_v22 = vld [vmem:[#allocation6 + $0x400] ss:$16 sps:$4 sm:$0xff]   ;;  %v6627_v6 = vld [vmem:[#allocation6 + $0xec] ss:$16 sps:$4 sm:$0xff]  }
 0x464   :  { %4243 = vmatpush1.bf16.msra.mxu0 %v6589_v20  ;;  %4203 = vmatprep.subr.bf16.mxu1 %v6594_v37  ;;  %v6624_v37 = vld [vmem:[#allocation6 + $0x5e4] ss:$16 sps:$4 sm:$0xff]   ;;  %v6657_v62 = vld [vmem:[#allocation6 + $0x4c] ss:$16 sps:$4 sm:$0xff]  }
 0x465   :  { %4244 = vmatprep.subr.bf16.mxu0 %v6597_v58  ;;  %2614 = vst.msk [vmem:[#allocation5 + $0x68] sm:$0xff] %vm2600_vm8, %v2597_v8  ;;  %v2550_v4 = vpop.permute.xlu1 %2549  ;;  %v6622_v8 = vld [vmem:[#allocation6 + $0x5e0] ss:$16 sps:$4 sm:$0xff]   ;;  %v2694_v59 = vld [vmem:[#allocation5 + $0x9] ss:$16 sm:$0xc] }
 0x466   :  { %v2567_v29 = vsel %vm2551_vm6, %v2548_v43, %v2550_v4  ;;  %v6633_v43 = vld [vmem:[#allocation6 + $0xcc] ss:$16 sps:$4 sm:$0xff]   ;;  %v6628_v4 = vld [vmem:[#allocation6 + $0x5c0] ss:$16 sps:$4 sm:$0xff]  }
 0x467   :  { %4204 = vmatpush1.bf16.msra.mxu1 %v6592_v44  ;;  %v2599_v30 = vmax.f32 %v2453_v16, %v2567_v29  ;;  %v2720_v16 = vld [vmem:[#allocation5 + $0xc] ss:$16 sm:$0xc]  ;;  %v6631_v29 = vld [vmem:[#allocation6 + $0xc8] ss:$16 sps:$4 sm:$0xff]  }
 0x468   :  { %4245 = vmatpush1.bf16.msra.mxu0 %v6595_v3  ;;  %4205 = vmatprep.subr.bf16.mxu1 %v6600_v40  ;;  %v2705_v26 = vld [vmem:[#allocation5 + $0xa] ss:$16 sm:$0x30]  ;;  %v2713_v36 = vld [vmem:[#allocation5 + $0xb] ss:$16 sm:$0x30]  ;;  %v2721_v28 = vor.u32 %v2720_v16, %v2719_v41 }
 0x469   :  { %4246 = vmatprep.subr.bf16.mxu0 %v6603_v55  ;;  %2616 = vst.msk [vmem:[#allocation5 + $0x78] sm:$0xff] %vm2600_vm8, %v2599_v30  ;;  %v2722_v50 = vld [vmem:[#allocation5 + $0xc] ss:$16 sm:$0x30]  ;;  %v2706_v45 = vor.u32 %v2705_v26, %v2704_v24  ;;  %v2714_v9 = vor.u32 %v2713_v36, %v2712_v32  ;;  %v6625_v40 = vld [vmem:[#allocation6 + $0xe8] ss:$16 sps:$4 sm:$0xff]  }
 0x46a   :  { %v2730_v7 = vld [vmem:[#allocation5 + $0xd] ss:$16 sm:$0x30]  ;;  %v2723_v21 = vor.u32 %v2722_v50, %v2721_v28  ;;  %v6630_v55 = vld [vmem:[#allocation6 + $0x5c4] ss:$16 sps:$4 sm:$0xff]  }
 0x46b   :  { %4206 = vmatpush1.bf16.msra.mxu1 %v6598_v56  ;;  %v2731_v14 = vor.u32 %v2730_v7, %v2729_v54  ;;  %v6636_v56 = vld [vmem:[#allocation6 + $0x5a4] ss:$16 sps:$4 sm:$0xff]   ;;  %v6639_v30 = vld [vmem:[#allocation6 + $0xac] ss:$16 sps:$4 sm:$0xff]   ;;  %v6652_v41 = vld [vmem:[#allocation6 + $0x540] ss:$16 sps:$4 sm:$0xff]  }
 0x46c   :  { %4247 = vmatpush1.bf16.msra.mxu0 %v6601_v61  ;;  %4207 = vmatprep.subr.bf16.mxu1 %v6606_v38  ;;  %v6634_v61 = vld [vmem:[#allocation6 + $0x5a0] ss:$16 sps:$4 sm:$0xff]   ;;  %v6637_v38 = vld [vmem:[#allocation6 + $0xa8] ss:$16 sps:$4 sm:$0xff]   ;;  %v6660_v50 = vld [vmem:[#allocation6 + $0x524] ss:$16 sps:$4 sm:$0xff]  }
 0x46d   :  { %4248 = vmatprep.subr.bf16.mxu0 %v6609_v33  ;;  %v6642_v33 = vld [vmem:[#allocation6 + $0x584] ss:$16 sps:$4 sm:$0xff]   ;;  %v2686_v16 = vld [vmem:[#allocation5 + $0x8] ss:$16 sm:$0xc] }
 0x46e   :  { %v2685_v48 = vld [vmem:[#allocation5 + $0x8] ss:$16 sm:$0x3]  ;;  %v2693_v26 = vld [vmem:[#allocation5 + $0x9] ss:$16 sm:$0x3] }
 0x46f   :  { %4208 = vmatpush1.bf16.msra.mxu1 %v6604_v31  ;;  %v6645_v31 = vld [vmem:[#allocation6 + $0x8c] ss:$16 sps:$4 sm:$0xff]   ;;  %v2688_v36 = vld [vmem:[#allocation5 + $0x8] ss:$16 sm:$0x30]  ;;  %v2695_v28 = vor.u32 %v2694_v59, %v2693_v26 }
 0x470   :  { %4249 = vmatpush1.bf16.msra.mxu0 %v6607_v23  ;;  %4209 = vmatprep.subr.bf16.mxu1 %v6612_v27  ;;  %v2707_v18 = vld [vmem:[#allocation5 + $0xa] ss:$16 sm:$0xc0]  ;;  %v2715_v11 = vld [vmem:[#allocation5 + $0xb] ss:$16 sm:$0xc0] }
 0x471   :  { %4250 = vmatprep.subr.bf16.mxu0 %v6615_v34  ;;  %v2708_v52 = vor.u32 %v2707_v18, %v2706_v45  ;;  %v2716_v35 = vor.u32 %v2715_v11, %v2714_v9  ;;  %v2724_v63 = vld [vmem:[#allocation5 + $0xc] ss:$16 sm:$0xc0]  ;;  %v2732_v25 = vld [vmem:[#allocation5 + $0xd] ss:$16 sm:$0xc0] }
 0x472   :  { %v2725_v57 = vor.u32 %v2724_v63, %v2723_v21  ;;  %v2733_v20 = vor.u32 %v2732_v25, %v2731_v14  ;;  %v6640_v23 = vld [vmem:[#allocation6 + $0x580] ss:$16 sps:$4 sm:$0xff]   ;;  %v6643_v27 = vld [vmem:[#allocation6 + $0x88] ss:$16 sps:$4 sm:$0xff]   ;;  %v6648_v34 = vld [vmem:[#allocation6 + $0x564] ss:$16 sps:$4 sm:$0xff]  }
 0x473   :  { %4210 = vmatpush1.bf16.msra.mxu1 %v6610_v10  ;;  %v2717_v58 = vmax.f32 %v2708_v52, %v2716_v35  ;;  %v2696_v24 = vld [vmem:[#allocation5 + $0x9] ss:$16 sm:$0x30]  ;;  %v6663_v7 = vld [vmem:[#allocation6 + $0x2c] ss:$16 sps:$4 sm:$0xff]   ;;  %v2687_v10 = vor.u32 %v2686_v16, %v2685_v48 }
 0x474   :  { %4251 = vmatpush1.bf16.msra.mxu0 %v6613_v47  ;;  %4211 = vmatprep.subr.bf16.mxu1 %v6618_v46  ;;  %v2734_v2 = vmax.f32 %v2725_v57, %v2733_v20  ;;  %v6655_v32 = vld [vmem:[#allocation6 + $0x48] ss:$16 sps:$4 sm:$0xff]   ;;  %v6658_v45 = vld [vmem:[#allocation6 + $0x520] ss:$16 sps:$4 sm:$0xff]   ;;  %v6666_v18 = vld [vmem:[#allocation6 + $0x504] ss:$16 sps:$4 sm:$0xff]  }
 0x475   :  { %4252 = vmatprep.subr.bf16.mxu0 %v6621_v1  ;;  %v8537_v44 = vpack.c.bf16 %v2717_v58, %v2717_v58  ;;  %v2690_v54 = vld [vmem:[#allocation5 + $0x8] ss:$16 sm:$0xc0]  ;;  %v2698_v47 = vld [vmem:[#allocation5 + $0x9] ss:$16 sm:$0xc0]  ;;  %v2689_v46 = vor.u32 %v2688_v36, %v2687_v10  ;;  %v2697_v1 = vor.u32 %v2696_v24, %v2695_v28 }
 0x476   :  { %v8539_v3 = vpack.c.bf16 %v2734_v2, %v2734_v2  ;;  %v6661_v9 = vld [vmem:[#allocation6 + $0x28] ss:$16 sps:$4 sm:$0xff]   ;;  %v6669_v14 = vld [vmem:[#allocation6 + $0xc] ss:$16 sps:$4 sm:$0xff]   ;;  %v6664_v52 = vld [vmem:[#allocation6 + $0x500] ss:$16 sps:$4 sm:$0xff]  }
 0x477   :  { %4212 = vmatpush1.bf16.msra.mxu1 %v6616_v22  ;;  %6123 = vmatprep.mubr.msk.bf16.mxu1 %vm8491_vm9, %v8537_v44  ;;  %v2691_v11 = vor.u32 %v2690_v54, %v2689_v46  ;;  %v2699_v21 = vor.u32 %v2698_v47, %v2697_v1  ;;  %v6667_v35 = vld [vmem:[#allocation6 + $0x8] ss:$16 sps:$4 sm:$0xff]   ;;  %v6675_v25 = vld [vmem:[#allocation6 + $0x2ec] ss:$16 sps:$4 sm:$0xff]  }
 0x478   :  { %4253 = vmatpush1.bf16.msra.mxu0 %v6619_v39  ;;  %4213 = vmatprep.subr.bf16.mxu1 %v6624_v37  ;;  %v6672_v22 = vld [vmem:[#allocation6 + $0x1ec] ss:$16 sps:$4 sm:$0xff]   ;;  %v6673_v57 = vld [vmem:[#allocation6 + $0x2e8] ss:$16 sps:$4 sm:$0xff]  }
 0x479   :  { %4279 = vmatprep.subr.bf16.mxu0 %v6627_v6  ;;  %v2700_v63 = vmax.f32 %v2691_v11, %v2699_v21  ;;  %v6670_v39 = vld [vmem:[#allocation6 + $0x1e8] ss:$16 sps:$4 sm:$0xff]   ;;  %v6681_v37 = vld [vmem:[#allocation6 + $0x2cc] ss:$16 sps:$4 sm:$0xff]  }
 0x47a   :  { %v6678_v58 = vld [vmem:[#allocation6 + $0x1cc] ss:$16 sps:$4 sm:$0xff]   ;;  %v6679_v2 = vld [vmem:[#allocation6 + $0x2c8] ss:$16 sps:$4 sm:$0xff]  }
 0x47b   :  { %6129 = vmatmul.mubr.msk.bf16.vlgmr.msra.gmra.mxu0 %vm8491_vm9, %v8539_v3  ;;  %4214 = vmatpush2.bf16.msra.mxu1 %v6622_v8  ;;  %v8550_v20 = vpack.c.bf16 %v2700_v63, %v2700_v63  ;;  %v6676_v6 = vld [vmem:[#allocation6 + $0x1c8] ss:$16 sps:$4 sm:$0xff]   ;;  %v6687_v8 = vld [vmem:[#allocation6 + $0x2ac] ss:$16 sps:$4 sm:$0xff]  }
 0x47c   :  { %4280 = vmatpush1.bf16.msra.mxu0 %v6625_v40  ;;  %6132 = vmatprep.mubr.msk.bf16.mxu0 %vm8491_vm9, %v8496_v51  ;;  %v6651_v51 = vld [vmem:[#allocation6 + $0x6c] ss:$16 sps:$4 sm:$0xff]   ;;  %v6715_v16 = vld [vmem:[#allocation6 + $0x208] ss:$16 sps:$4 sm:$0xff]  }
 0x47d   :  { %4215 = vmatprep.subr.bf16.mxu1 %v6630_v55  ;;  %4281 = vmatprep.subr.bf16.mxu0 %v6633_v43  ;;  %v6684_v40 = vld [vmem:[#allocation6 + $0x1ac] ss:$16 sps:$4 sm:$0xff]   ;;  %v6685_v55 = vld [vmem:[#allocation6 + $0x2a8] ss:$16 sps:$4 sm:$0xff]  }
 0x47e   :  { %v6682_v43 = vld [vmem:[#allocation6 + $0x1a8] ss:$16 sps:$4 sm:$0xff]   ;;  %v6720_v48 = vld [vmem:[#allocation6 + $0x3ec] ss:$16 sps:$4 sm:$0xff]  }
 0x47f   :  { %4216 = vmatpush2.bf16.msra.mxu1 %v6628_v4  ;;  %v6693_v4 = vld [vmem:[#allocation6 + $0x28c] ss:$16 sps:$4 sm:$0xff]   ;;  %v6712_v59 = vld [vmem:[#allocation6 + $0x108] ss:$16 sps:$4 sm:$0xff]  }
 0x480   :  { %4282 = vmatpush1.bf16.msra.mxu0 %v6631_v29  ;;  %4217 = vmatprep.subr.bf16.mxu1 %v6636_v56  ;;  %v6690_v29 = vld [vmem:[#allocation6 + $0x18c] ss:$16 sps:$4 sm:$0xff]   ;;  %v6691_v56 = vld [vmem:[#allocation6 + $0x288] ss:$16 sps:$4 sm:$0xff]  }
 0x481   :  { %4283 = vmatprep.subr.bf16.mxu0 %v6639_v30  ;;  %v6688_v30 = vld [vmem:[#allocation6 + $0x188] ss:$16 sps:$4 sm:$0xff]   ;;  %v6723_v26 = vld [vmem:[#allocation6 + $0x4ec] ss:$16 sps:$4 sm:$0xff]  }
 0x482   :  { %v6718_v36 = vld [vmem:[#allocation6 + $0x3e8] ss:$16 sps:$4 sm:$0xff]   ;;  %v6732_v28 = vld [vmem:[#allocation6 + $0x3ac] ss:$16 sps:$4 sm:$0xff]  }
 0x483   :  { %4218 = vmatpush2.bf16.msra.mxu1 %v6634_v61  ;;  %v6696_v61 = vld [vmem:[#allocation6 + $0x16c] ss:$16 sps:$4 sm:$0xff]   ;;  %v6721_v24 = vld [vmem:[#allocation6 + $0x4e8] ss:$16 sps:$4 sm:$0xff]  }
 0x484   :  { %4284 = vmatpush1.bf16.msra.mxu0 %v6637_v38  ;;  %4219 = vmatprep.subr.bf16.mxu1 %v6642_v33  ;;  %v6697_v38 = vld [vmem:[#allocation6 + $0x268] ss:$16 sps:$4 sm:$0xff]   ;;  %v6735_v54 = vld [vmem:[#allocation6 + $0x4ac] ss:$16 sps:$4 sm:$0xff]  }
 0x485   :  { %4285 = vmatprep.subr.bf16.mxu0 %v6645_v31  ;;  %v6694_v33 = vld [vmem:[#allocation6 + $0x168] ss:$16 sps:$4 sm:$0xff]   ;;  %v6705_v31 = vld [vmem:[#allocation6 + $0x24c] ss:$16 sps:$4 sm:$0xff]  }
 0x486   :  { %v6727_v10 = vld [vmem:[#allocation6 + $0x4c8] ss:$16 sps:$4 sm:$0xff]   ;;  %v6738_v1 = vld [vmem:[#allocation6 + $0x38c] ss:$16 sps:$4 sm:$0xff]  }
 0x487   :  { %4220 = vmatpush2.bf16.msra.mxu1 %v6640_v23  ;;  %v6702_v23 = vld [vmem:[#allocation6 + $0x14c] ss:$16 sps:$4 sm:$0xff]   ;;  %v6730_v47 = vld [vmem:[#allocation6 + $0x3a8] ss:$16 sps:$4 sm:$0xff]  }
 0x488   :  { %4286 = vmatpush1.bf16.msra.mxu0 %v6643_v27  ;;  %4221 = vmatprep.subr.bf16.mxu1 %v6648_v34  ;;  %v6703_v27 = vld [vmem:[#allocation6 + $0x248] ss:$16 sps:$4 sm:$0xff]  }
 0x489   :  { %4287 = vmatprep.subr.bf16.mxu0 %v6651_v51  ;;  %v6700_v34 = vld [vmem:[#allocation6 + $0x148] ss:$16 sps:$4 sm:$0xff]   ;;  %v6711_v51 = vld [vmem:[#allocation6 + $0x22c] ss:$16 sps:$4 sm:$0xff]  }
 0x48a   :  { %v6733_v46 = vld [vmem:[#allocation6 + $0x4a8] ss:$16 sps:$4 sm:$0xff]  }
 0x48b   :  { %4222 = vmatpush2.bf16.msra.mxu1 %v6646_v0  ;;  %v6708_v0 = vld [vmem:[#allocation6 + $0x12c] ss:$16 sps:$4 sm:$0xff]   ;;  %v6742_v11 = vld [vmem:[#allocation6 + $0x368] ss:$16 sps:$4 sm:$0xff]  }
 0x48c   :  { %4288 = vmatpush1.bf16.msra.mxu0 %v6649_v42  ;;  %4223 = vmatprep.subr.bf16.mxu1 %v6654_v53  ;;  %v6709_v42 = vld [vmem:[#allocation6 + $0x228] ss:$16 sps:$4 sm:$0xff]  }
 0x48d   :  { %4289 = vmatprep.subr.bf16.mxu0 %v6657_v62  ;;  %v6706_v53 = vld [vmem:[#allocation6 + $0x128] ss:$16 sps:$4 sm:$0xff]   ;;  %v6717_v62 = vld [vmem:[#allocation6 + $0x20c] ss:$16 sps:$4 sm:$0xff]  }
 0x48e   :  { %v6745_v21 = vld [vmem:[#allocation6 + $0x468] ss:$16 sps:$4 sm:$0xff]  }
 0x48f   :  { %4224 = vmatpush2.bf16.msra.mxu1 %v6652_v41  ;;  %v6714_v41 = vld [vmem:[#allocation6 + $0x10c] ss:$16 sps:$4 sm:$0xff]   ;;  %v6751_v63 = vld [vmem:[#allocation6 + $0x448] ss:$16 sps:$4 sm:$0xff]  }
 0x490   :  { %4290 = vmatpush1.bf16.msra.mxu0 %v6655_v32  ;;  %4225 = vmatprep.subr.bf16.mxu1 %v6660_v50  ;;  %v6726_v32 = vld [vmem:[#allocation6 + $0x3cc] ss:$16 sps:$4 sm:$0xff]  }
 0x491   :  { %4291 = vmatprep.subr.bf16.mxu0 %v6663_v7  ;;  %v6729_v50 = vld [vmem:[#allocation6 + $0x4cc] ss:$16 sps:$4 sm:$0xff]   ;;  %v6724_v7 = vld [vmem:[#allocation6 + $0x3c8] ss:$16 sps:$4 sm:$0xff]  }
 0x493   :  { %4226 = vmatpush2.bf16.msra.mxu1 %v6658_v45  ;;  %v6736_v45 = vld [vmem:[#allocation6 + $0x388] ss:$16 sps:$4 sm:$0xff]  }
 0x494   :  { %4292 = vmatpush1.bf16.msra.mxu0 %v6661_v9  ;;  %4227 = vmatprep.subr.bf16.mxu1 %v6666_v18  ;;  %v6739_v9 = vld [vmem:[#allocation6 + $0x488] ss:$16 sps:$4 sm:$0xff]   ;;  %v6744_v18 = vld [vmem:[#allocation6 + $0x36c] ss:$16 sps:$4 sm:$0xff]  }
 0x495   :  { %4293 = vmatprep.subr.bf16.mxu0 %v6669_v14  ;;  %v6750_v14 = vld [vmem:[#allocation6 + $0x34c] ss:$16 sps:$4 sm:$0xff]  }
 0x497   :  { %4228 = vmatpush2.bf16.msra.mxu1 %v6664_v52  ;;  %v6753_v52 = vld [vmem:[#allocation6 + $0x44c] ss:$16 sps:$4 sm:$0xff]  }
 0x498   :  { %4294 = vmatpush1.bf16.msra.mxu0 %v6667_v35  ;;  %4320 = vmatprep.subr.bf16.mxu1 %v6675_v25  ;;  %v6748_v35 = vld [vmem:[#allocation6 + $0x348] ss:$16 sps:$4 sm:$0xff]   ;;  %v6756_v25 = vld [vmem:[#allocation6 + $0x32c] ss:$16 sps:$4 sm:$0xff]  }
 0x499   :  { %4295 = vmatprep.subr.bf16.mxu0 %v6672_v22  ;;  %v6759_v22 = vld [vmem:[#allocation6 + $0x42c] ss:$16 sps:$4 sm:$0xff]  }
 0x49a   :  { %6126 = vmatmul.mubr.msk.bf16.vlgmr.msra.gmra.mxu1 %vm8491_vm9, %v8550_v20 }
 0x49b   :  { %4321 = vmatpush1.bf16.msra.mxu1 %v6673_v57  ;;  %6138 = vmatprep.mubr.msk.bf16.mxu1 %vm8491_vm9, %v8499_v49  ;;  %v6699_v49 = vld [vmem:[#allocation6 + $0x26c] ss:$16 sps:$4 sm:$0xff]   ;;  %v6754_v57 = vld [vmem:[#allocation6 + $0x328] ss:$16 sps:$4 sm:$0xff]  }
 0x49c   :  { %4296 = vmatpush2.bf16.msra.mxu0 %v6670_v39  ;;  %4322 = vmatprep.subr.bf16.mxu1 %v6681_v37  ;;  %v6757_v39 = vld [vmem:[#allocation6 + $0x428] ss:$16 sps:$4 sm:$0xff]   ;;  %v6762_v37 = vld [vmem:[#allocation6 + $0x30c] ss:$16 sps:$4 sm:$0xff]  }
 0x49d   :  { %4297 = vmatprep.subr.bf16.mxu0 %v6678_v58  ;;  %v6765_v58 = vld [vmem:[#allocation6 + $0x40c] ss:$16 sps:$4 sm:$0xff]  }
 0x49f   :  { %4323 = vmatpush1.bf16.msra.mxu1 %v6679_v2  ;;  %v6760_v2 = vld [vmem:[#allocation6 + $0x308] ss:$16 sps:$4 sm:$0xff]  }
 0x4a0   :  { %4298 = vmatpush2.bf16.msra.mxu0 %v6676_v6  ;;  %4324 = vmatprep.subr.bf16.mxu1 %v6687_v8  ;;  %v6763_v6 = vld [vmem:[#allocation6 + $0x408] ss:$16 sps:$4 sm:$0xff]   ;;  %v6771_v8 = vld [vmem:[#allocation6 + $0x6ec] ss:$16 sps:$4 sm:$0xff]  }
 0x4a1   :  { %4299 = vmatprep.subr.bf16.mxu0 %v6684_v40  ;;  %v6768_v40 = vld [vmem:[#allocation6 + $0x5ec] ss:$16 sps:$4 sm:$0xff]  }
 0x4a3   :  { %4325 = vmatpush1.bf16.msra.mxu1 %v6685_v55  ;;  %v6769_v55 = vld [vmem:[#allocation6 + $0x6e8] ss:$16 sps:$4 sm:$0xff]  }
 0x4a4   :  { %4300 = vmatpush2.bf16.msra.mxu0 %v6682_v43  ;;  %4326 = vmatprep.subr.bf16.mxu1 %v6693_v4  ;;  %v6766_v43 = vld [vmem:[#allocation6 + $0x5e8] ss:$16 sps:$4 sm:$0xff]   ;;  %v6777_v4 = vld [vmem:[#allocation6 + $0x6cc] ss:$16 sps:$4 sm:$0xff]  }
 0x4a5   :  { %4301 = vmatprep.subr.bf16.mxu0 %v6690_v29  ;;  %v6774_v29 = vld [vmem:[#allocation6 + $0x5cc] ss:$16 sps:$4 sm:$0xff]  }
 0x4a7   :  { %4327 = vmatpush1.bf16.msra.mxu1 %v6691_v56  ;;  %v6775_v56 = vld [vmem:[#allocation6 + $0x6c8] ss:$16 sps:$4 sm:$0xff]  }
 0x4a8   :  { %4302 = vmatpush2.bf16.msra.mxu0 %v6688_v30  ;;  %4328 = vmatprep.subr.bf16.mxu1 %v6699_v49  ;;  %v6772_v30 = vld [vmem:[#allocation6 + $0x5c8] ss:$16 sps:$4 sm:$0xff]   ;;  %v6783_v49 = vld [vmem:[#allocation6 + $0x6ac] ss:$16 sps:$4 sm:$0xff]  }
 0x4a9   :  { %4303 = vmatprep.subr.bf16.mxu0 %v6696_v61  ;;  %v6780_v61 = vld [vmem:[#allocation6 + $0x5ac] ss:$16 sps:$4 sm:$0xff]  }
 0x4ab   :  { %4329 = vmatpush1.bf16.msra.mxu1 %v6697_v38  ;;  %v6781_v38 = vld [vmem:[#allocation6 + $0x6a8] ss:$16 sps:$4 sm:$0xff]  }
 0x4ac   :  { %4304 = vmatpush2.bf16.msra.mxu0 %v6694_v33  ;;  %4330 = vmatprep.subr.bf16.mxu1 %v6705_v31  ;;  %v6778_v33 = vld [vmem:[#allocation6 + $0x5a8] ss:$16 sps:$4 sm:$0xff]   ;;  %v6789_v31 = vld [vmem:[#allocation6 + $0x68c] ss:$16 sps:$4 sm:$0xff]  }
 0x4ad   :  { %4305 = vmatprep.subr.bf16.mxu0 %v6702_v23  ;;  %v6786_v23 = vld [vmem:[#allocation6 + $0x58c] ss:$16 sps:$4 sm:$0xff]  }
 0x4af   :  { %4331 = vmatpush1.bf16.msra.mxu1 %v6703_v27  ;;  %v6784_v27 = vld [vmem:[#allocation6 + $0x588] ss:$16 sps:$4 sm:$0xff]  }
 0x4b0   :  { %4306 = vmatpush2.bf16.msra.mxu0 %v6700_v34  ;;  %4332 = vmatprep.subr.bf16.mxu1 %v6711_v51  ;;  %v6792_v34 = vld [vmem:[#allocation6 + $0x56c] ss:$16 sps:$4 sm:$0xff]   ;;  %v6793_v51 = vld [vmem:[#allocation6 + $0x668] ss:$16 sps:$4 sm:$0xff]  }
 0x4b1   :  { %4307 = vmatprep.subr.bf16.mxu0 %v6708_v0  ;;  %v6790_v0 = vld [vmem:[#allocation6 + $0x568] ss:$16 sps:$4 sm:$0xff]  }
 0x4b3   :  { %4333 = vmatpush1.bf16.msra.mxu1 %v6709_v42  ;;  %v6801_v42 = vld [vmem:[#allocation6 + $0x64c] ss:$16 sps:$4 sm:$0xff]  }
 0x4b4   :  { %4308 = vmatpush2.bf16.msra.mxu0 %v6706_v53  ;;  %4334 = vmatprep.subr.bf16.mxu1 %v6717_v62  ;;  %v6798_v53 = vld [vmem:[#allocation6 + $0x54c] ss:$16 sps:$4 sm:$0xff]   ;;  %v6799_v62 = vld [vmem:[#allocation6 + $0x648] ss:$16 sps:$4 sm:$0xff]  }
 0x4b5   :  { %4309 = vmatprep.subr.bf16.mxu0 %v6714_v41  ;;  %v6796_v41 = vld [vmem:[#allocation6 + $0x548] ss:$16 sps:$4 sm:$0xff]  }
 0x4b7   :  { %4335 = vmatpush1.bf16.msra.mxu1 %v6715_v16  ;;  %v6807_v16 = vld [vmem:[#allocation6 + $0x62c] ss:$16 sps:$4 sm:$0xff]  }
 0x4b8   :  { %4310 = vmatpush2.bf16.msra.mxu0 %v6712_v59  ;;  %4336 = vmatprep.subr.bf16.mxu1 %v6720_v48  ;;  %v6804_v59 = vld [vmem:[#allocation6 + $0x52c] ss:$16 sps:$4 sm:$0xff]   ;;  %v6805_v48 = vld [vmem:[#allocation6 + $0x628] ss:$16 sps:$4 sm:$0xff]  }
 0x4b9   :  { %4361 = vmatprep.subr.bf16.mxu0 %v6723_v26  ;;  %v6802_v26 = vld [vmem:[#allocation6 + $0x528] ss:$16 sps:$4 sm:$0xff]  }
 0x4bb   :  { %6135 = vmatmul.mubr.msk.bf16.vlgmr.msra.gmra.mxu0 %vm8491_vm9, %v8506_v60  ;;  %4337 = vmatpush2.bf16.msra.mxu1 %v6718_v36  ;;  %v6741_v60 = vld [vmem:[#allocation6 + $0x48c] ss:$16 sps:$4 sm:$0xff]  }
 0x4bc   :  { %4362 = vmatpush1.bf16.msra.mxu0 %v6721_v24  ;;  %6144 = vmatprep.mubr.msk.bf16.mxu0 %vm8491_vm9, %v8537_v44  ;;  %v6747_v44 = vld [vmem:[#allocation6 + $0x46c] ss:$16 sps:$4 sm:$0xff]  }
 0x4bd   :  { %4338 = vmatprep.subr.bf16.mxu1 %v6726_v32  ;;  %4363 = vmatprep.subr.bf16.mxu0 %v6729_v50  ;;  %v6813_v36 = vld [vmem:[#allocation6 + $0x60c] ss:$16 sps:$4 sm:$0xff]   ;;  %v6811_v32 = vld [vmem:[#allocation6 + $0x608] ss:$16 sps:$4 sm:$0xff]  }
 0x4be   :  { %v6810_v24 = vld [vmem:[#allocation6 + $0x50c] ss:$16 sps:$4 sm:$0xff]   ;;  %v6808_v50 = vld [vmem:[#allocation6 + $0x508] ss:$16 sps:$4 sm:$0xff]  }
 0x4bf   :  { %4339 = vmatpush2.bf16.msra.mxu1 %v6724_v7  ;;  %v6816_v7 = vld [vmem:[%s9017_s7 + $0xe4] ss:$16 sps:$4 sm:$0xff]  }
 0x4c0   :  { %4364 = vmatpush1.bf16.msra.mxu0 %v6727_v10  ;;  %4340 = vmatprep.subr.bf16.mxu1 %v6732_v28  ;;  %v6814_v10 = vld [vmem:[%s9017_s7 + $0xe0] ss:$16 sps:$4 sm:$0xff]   ;;  %v6819_v28 = vld [vmem:[%s9017_s7 + $0xc4] ss:$16 sps:$4 sm:$0xff]  }
 0x4c1   :  { %4365 = vmatprep.subr.bf16.mxu0 %v6735_v54  ;;  %v6817_v54 = vld [vmem:[%s9017_s7 + $0xc0] ss:$16 sps:$4 sm:$0xff]  }
 0x4c3   :  { %4341 = vmatpush2.bf16.msra.mxu1 %v6730_v47  ;;  %v6822_v47 = vld [vmem:[%s9017_s7 + $0xa4] ss:$16 sps:$4 sm:$0xff]  }
 0x4c4   :  { %4366 = vmatpush1.bf16.msra.mxu0 %v6733_v46  ;;  %4342 = vmatprep.subr.bf16.mxu1 %v6738_v1  ;;  %v6820_v46 = vld [vmem:[%s9017_s7 + $0xa0] ss:$16 sps:$4 sm:$0xff]   ;;  %v6888_v1 = vld [vmem:[%s9017_s7 + $0x2e4] ss:$16 sps:$4 sm:$0xff]  }
 0x4c5   :  { %4367 = vmatprep.subr.bf16.mxu0 %v6741_v60  ;;  %v6828_v60 = vld [vmem:[%s9017_s7 + $0x64] ss:$16 sps:$4 sm:$0xff]  }
 0x4c7   :  { %4343 = vmatpush2.bf16.msra.mxu1 %v6736_v45  ;;  %v6826_v45 = vld [vmem:[%s9017_s7 + $0x60] ss:$16 sps:$4 sm:$0xff]  }
 0x4c8   :  { %4368 = vmatpush1.bf16.msra.mxu0 %v6739_v9  ;;  %4344 = vmatprep.subr.bf16.mxu1 %v6744_v18  ;;  %v6892_v9 = vld [vmem:[%s9017_s7 + $0x2c0] ss:$16 sps:$4 sm:$0xff]   ;;  %v6894_v18 = vld [vmem:[%s9017_s7 + $0x2c4] ss:$16 sps:$4 sm:$0xff]  }
 0x4c9   :  { %4369 = vmatprep.subr.bf16.mxu0 %v6747_v44  ;;  %v6831_v44 = vld [vmem:[%s9017_s7 + $0x44] ss:$16 sps:$4 sm:$0xff]  }
 0x4cb   :  { %4345 = vmatpush2.bf16.msra.mxu1 %v6742_v11  ;;  %v6829_v11 = vld [vmem:[%s9017_s7 + $0x40] ss:$16 sps:$4 sm:$0xff]  }
 0x4cc   :  { %4370 = vmatpush1.bf16.msra.mxu0 %v6745_v21  ;;  %4346 = vmatprep.subr.bf16.mxu1 %v6750_v14  ;;  %v6898_v21 = vld [vmem:[%s9017_s7 + $0x2a0] ss:$16 sps:$4 sm:$0xff]   ;;  %v6900_v14 = vld [vmem:[%s9017_s7 + $0x2a4] ss:$16 sps:$4 sm:$0xff]  }
 0x4cd   :  { %4371 = vmatprep.subr.bf16.mxu0 %v6753_v52  ;;  %v6834_v52 = vld [vmem:[%s9017_s7 + $0x24] ss:$16 sps:$4 sm:$0xff]  }
 0x4cf   :  { %4347 = vmatpush2.bf16.msra.mxu1 %v6748_v35  ;;  %v6832_v35 = vld [vmem:[%s9017_s7 + $0x20] ss:$16 sps:$4 sm:$0xff]  }
 0x4d0   :  { %4372 = vmatpush1.bf16.msra.mxu0 %v6751_v63  ;;  %4348 = vmatprep.subr.bf16.mxu1 %v6756_v25  ;;  %v6904_v63 = vld [vmem:[%s9017_s7 + $0x280] ss:$16 sps:$4 sm:$0xff]   ;;  %v6906_v25 = vld [vmem:[%s9017_s7 + $0x284] ss:$16 sps:$4 sm:$0xff]  }
 0x4d1   :  { %4373 = vmatprep.subr.bf16.mxu0 %v6759_v22  ;;  %v6837_v22 = vld [vmem:[%s9017_s7 + $0x4] ss:$16 sps:$4 sm:$0xff]  }
 0x4d3   :  { %4349 = vmatpush2.bf16.msra.mxu1 %v6754_v57  ;;  %v6835_v57 = vld [vmem:[%s9017_s7] ss:$16 sps:$4 sm:$0xff]  }
 0x4d4   :  { %4374 = vmatpush1.bf16.msra.mxu0 %v6757_v39  ;;  %4350 = vmatprep.subr.bf16.mxu1 %v6762_v37  ;;  %v6910_v39 = vld [vmem:[%s9017_s7 + $0x260] ss:$16 sps:$4 sm:$0xff]   ;;  %v6912_v37 = vld [vmem:[%s9017_s7 + $0x264] ss:$16 sps:$4 sm:$0xff]  }
 0x4d5   :  { %4375 = vmatprep.subr.bf16.mxu0 %v6765_v58  ;;  %v6840_v58 = vld [vmem:[%s9017_s7 + $0x1e4] ss:$16 sps:$4 sm:$0xff]  }
 0x4d7   :  { %4351 = vmatpush2.bf16.msra.mxu1 %v6760_v2  ;;  %v6838_v2 = vld [vmem:[%s9017_s7 + $0x1e0] ss:$16 sps:$4 sm:$0xff]  }
 0x4d8   :  { %4376 = vmatpush1.bf16.msra.mxu0 %v6763_v6  ;;  %4402 = vmatprep.subr.bf16.mxu1 %v6771_v8  ;;  %v6916_v6 = vld [vmem:[%s9017_s7 + $0x240] ss:$16 sps:$4 sm:$0xff]   ;;  %v6918_v8 = vld [vmem:[%s9017_s7 + $0x244] ss:$16 sps:$4 sm:$0xff]  }
 0x4d9   :  { %4377 = vmatprep.subr.bf16.mxu0 %v6768_v40  ;;  %v6843_v40 = vld [vmem:[%s9017_s7 + $0x1c4] ss:$16 sps:$4 sm:$0xff]  }
 0x4da   :  { %6141 = vmatmul.mubr.msk.bf16.vlgmr.msra.gmra.mxu1 %vm8491_vm9, %v8511_v17  ;;  %v6787_v17 = vld [vmem:[#allocation6 + $0x688] ss:$16 sps:$4 sm:$0xff]  }
 0x4db   :  { %4403 = vmatpush1.bf16.msra.mxu1 %v6769_v55  ;;  %4434 = vmatprep.mubr.bf16.mxu1 %v9058_v19  ;;  %v6795_v19 = vld [vmem:[#allocation6 + $0x66c] ss:$16 sps:$4 sm:$0xff]  }
 0x4dc   :  { %4378 = vmatpush2.bf16.msra.mxu0 %v6766_v43  ;;  %4404 = vmatprep.subr.bf16.mxu1 %v6777_v4  ;;  %v6841_v4 = vld [vmem:[%s9017_s7 + $0x1c0] ss:$16 sps:$4 sm:$0xff]  }
 0x4dd   :  { %4379 = vmatprep.subr.bf16.mxu0 %v6774_v29 }
 0x4df   :  { %4405 = vmatpush1.bf16.msra.mxu1 %v6775_v56  ;;  %v6846_v56 = vld [vmem:[%s9017_s7 + $0x1a4] ss:$16 sps:$4 sm:$0xff]  }
 0x4e0   :  { %4380 = vmatpush2.bf16.msra.mxu0 %v6772_v30  ;;  %4406 = vmatprep.subr.bf16.mxu1 %v6783_v49  ;;  %v6922_v49 = vld [vmem:[%s9017_s7 + $0x220] ss:$16 sps:$4 sm:$0xff]  }
 0x4e1   :  { %4381 = vmatprep.subr.bf16.mxu0 %v6780_v61  ;;  %v6924_v61 = vld [vmem:[%s9017_s7 + $0x224] ss:$16 sps:$4 sm:$0xff]  }
 0x4e3   :  { %4407 = vmatpush1.bf16.msra.mxu1 %v6781_v38 }
 0x4e4   :  { %4382 = vmatpush2.bf16.msra.mxu0 %v6778_v33  ;;  %4408 = vmatprep.subr.bf16.mxu1 %v6789_v31  ;;  %v6844_v31 = vld [vmem:[%s9017_s7 + $0x1a0] ss:$16 sps:$4 sm:$0xff]  }
 0x4e5   :  { %4383 = vmatprep.subr.bf16.mxu0 %v6786_v23 }
 0x4e7   :  { %4409 = vmatpush1.bf16.msra.mxu1 %v6787_v17  ;;  %v6849_v17 = vld [vmem:[%s9017_s7 + $0x184] ss:$16 sps:$4 sm:$0xff]  }
 0x4e8   :  { %4384 = vmatpush2.bf16.msra.mxu0 %v6784_v27  ;;  %4410 = vmatprep.subr.bf16.mxu1 %v6795_v19  ;;  %v6928_v27 = vld [vmem:[%s9017_s7 + $0x200] ss:$16 sps:$4 sm:$0xff]   ;;  %v6930_v19 = vld [vmem:[%s9017_s7 + $0x204] ss:$16 sps:$4 sm:$0xff]  }
 0x4e9   :  { %4385 = vmatprep.subr.bf16.mxu0 %v6792_v34 }
 0x4eb   :  { %4411 = vmatpush1.bf16.msra.mxu1 %v6793_v51  ;;  %v6847_v51 = vld [vmem:[%s9017_s7 + $0x180] ss:$16 sps:$4 sm:$0xff]  }
 0x4ec   :  { %4386 = vmatpush2.bf16.msra.mxu0 %v6790_v0  ;;  %4412 = vmatprep.subr.bf16.mxu1 %v6801_v42  ;;  %v6936_v0 = vld [vmem:[%s9017_s7 + $0x3e4] ss:$16 sps:$4 sm:$0xff]  }
 0x4ed   :  { %4387 = vmatprep.subr.bf16.mxu0 %v6798_v53  ;;  %v6852_v42 = vld [vmem:[%s9017_s7 + $0x164] ss:$16 sps:$4 sm:$0xff]   ;;  %v6934_v53 = vld [vmem:[%s9017_s7 + $0x3e0] ss:$16 sps:$4 sm:$0xff]  }
 0x4ef   :  { %4413 = vmatpush1.bf16.msra.mxu1 %v6799_v62  ;;  %v6939_v62 = vld [vmem:[%s9017_s7 + $0x3c4] ss:$16 sps:$4 sm:$0xff]  }
 0x4f0   :  { %4388 = vmatpush2.bf16.msra.mxu0 %v6796_v41  ;;  %4414 = vmatprep.subr.bf16.mxu1 %v6807_v16  ;;  %v6850_v41 = vld [vmem:[%s9017_s7 + $0x160] ss:$16 sps:$4 sm:$0xff]   ;;  %v6855_v16 = vld [vmem:[%s9017_s7 + $0x144] ss:$16 sps:$4 sm:$0xff]  }
 0x4f1   :  { %4389 = vmatprep.subr.bf16.mxu0 %v6804_v59  ;;  %v6937_v59 = vld [vmem:[%s9017_s7 + $0x3c0] ss:$16 sps:$4 sm:$0xff]  }
 0x4f3   :  { %4415 = vmatpush1.bf16.msra.mxu1 %v6805_v48  ;;  %v6942_v48 = vld [vmem:[%s9017_s7 + $0x3a4] ss:$16 sps:$4 sm:$0xff]  }
 0x4f4   :  { %4390 = vmatpush2.bf16.msra.mxu0 %v6802_v26  ;;  %4416 = vmatprep.subr.bf16.mxu1 %v6813_v36  ;;  %v6853_v26 = vld [vmem:[%s9017_s7 + $0x140] ss:$16 sps:$4 sm:$0xff]   ;;  %v6858_v36 = vld [vmem:[%s9017_s7 + $0x124] ss:$16 sps:$4 sm:$0xff]  }
 0x4f5   :  { %4391 = vmatprep.subr.bf16.mxu0 %v6810_v24  ;;  %v6940_v24 = vld [vmem:[%s9017_s7 + $0x3a0] ss:$16 sps:$4 sm:$0xff]  }
 0x4f7   :  { %4417 = vmatpush1.bf16.msra.mxu1 %v6811_v32  ;;  %v6945_v32 = vld [vmem:[%s9017_s7 + $0x384] ss:$16 sps:$4 sm:$0xff]  }
 0x4f8   :  { %4392 = vmatpush2.bf16.msra.mxu0 %v6808_v50  ;;  %5241 = vmatprep.subr.bf16.mxu1 %v6816_v7  ;;  %v6856_v50 = vld [vmem:[%s9017_s7 + $0x120] ss:$16 sps:$4 sm:$0xff]   ;;  %v6861_v7 = vld [vmem:[%s9017_s7 + $0x104] ss:$16 sps:$4 sm:$0xff]  }
 0x4f9   :  { %5282 = vmatprep.subr.bf16.mxu0 %v6888_v1 }
 0x4fa   :  { %6150 = vmatmul.mubr.msk.bf16.vlgmr.msra.gmra.mxu1 %vm8491_vm9, %v8539_v3  ;;  %v6823_v3 = vld [vmem:[%s9017_s7 + $0x80] ss:$16 sps:$4 sm:$0xff]  }
 0x4fb   :  { %6147 = vmatmul.mubr.msk.bf16.vlgmr.msra.gmra.mxu0 %vm8491_vm9, %v8550_v20  ;;  %5242 = vmatpush1.bf16.msra.mxu1 %v6814_v10  ;;  %v6886_v20 = vld [vmem:[%s9017_s7 + $0x2e0] ss:$16 sps:$4 sm:$0xff]  }
 0x4fc   :  { %5243 = vmatprep.subr.bf16.mxu1 %v6819_v28  ;;  %5283 = vmatpush1.bf16.msra.mxu0 %v6886_v20  ;;  %v6943_v10 = vld [vmem:[%s9017_s7 + $0x380] ss:$16 sps:$4 sm:$0xff]   ;;  %v6948_v28 = vld [vmem:[%s9017_s7 + $0x364] ss:$16 sps:$4 sm:$0xff]  }
 0x4fd   :  { %5284 = vmatprep.subr.bf16.mxu0 %v6894_v18 }
 0x4ff   :  { %5244 = vmatpush1.bf16.msra.mxu1 %v6817_v54  ;;  %v6859_v54 = vld [vmem:[%s9017_s7 + $0x100] ss:$16 sps:$4 sm:$0xff]  }
 0x500   :  { %5245 = vmatprep.subr.bf16.mxu1 %v6822_v47  ;;  %5285 = vmatpush1.bf16.msra.mxu0 %v6892_v9  ;;  %v6864_v47 = vld [vmem:[%s9017_s7 + $0xec] ss:$16 sps:$4 sm:$0xff]  }
 0x501   :  { %5286 = vmatprep.subr.bf16.mxu0 %v6900_v14  ;;  %v8783_v14 = vld [vmem:[%s9016_s6] sm:$0xf] }
 0x503   :  { %5246 = vmatpush1.bf16.msra.mxu1 %v6820_v46  ;;  %v6946_v46 = vld [vmem:[%s9017_s7 + $0x360] ss:$16 sps:$4 sm:$0xff]  }
 0x504   :  { %5247 = vmatprep.subr.bf16.mxu1 %v6825_v5  ;;  %5287 = vmatpush1.bf16.msra.mxu0 %v6898_v21  ;;  %v6951_v5 = vld [vmem:[%s9017_s7 + $0x344] ss:$16 sps:$4 sm:$0xff]   ;;  %v6960_v21 = vld [vmem:[%s9017_s7 + $0x2ec] ss:$16 sps:$4 sm:$0xff]  }
 0x505   :  { %5288 = vmatprep.subr.bf16.mxu0 %v6906_v25 }
 0x507   :  { %5248 = vmatpush1.bf16.msra.mxu1 %v6823_v3  ;;  %v6949_v3 = vld [vmem:[%s9017_s7 + $0x340] ss:$16 sps:$4 sm:$0xff]  }
 0x508   :  { %5249 = vmatprep.subr.bf16.mxu1 %v6828_v60  ;;  %5289 = vmatpush1.bf16.msra.mxu0 %v6904_v63  ;;  %v6954_v60 = vld [vmem:[%s9017_s7 + $0x324] ss:$16 sps:$4 sm:$0xff]  }
 0x509   :  { %5290 = vmatprep.subr.bf16.mxu0 %v6912_v37 }
 0x50b   :  { %5250 = vmatpush1.bf16.msra.mxu1 %v6826_v45  ;;  %v6952_v45 = vld [vmem:[%s9017_s7 + $0x320] ss:$16 sps:$4 sm:$0xff]  }
 0x50c   :  { %5251 = vmatprep.subr.bf16.mxu1 %v6831_v44  ;;  %5291 = vmatpush1.bf16.msra.mxu0 %v6910_v39  ;;  %v6957_v44 = vld [vmem:[%s9017_s7 + $0x304] ss:$16 sps:$4 sm:$0xff]  }
 0x50d   :  { %5292 = vmatprep.subr.bf16.mxu0 %v6918_v8 }
 0x50f   :  { %5252 = vmatpush1.bf16.msra.mxu1 %v6829_v11  ;;  %v6955_v11 = vld [vmem:[%s9017_s7 + $0x300] ss:$16 sps:$4 sm:$0xff]  }
 0x510   :  { %5253 = vmatprep.subr.bf16.mxu1 %v6834_v52  ;;  %5293 = vmatpush1.bf16.msra.mxu0 %v6916_v6  ;;  %v2978_v52 = vrot.slane %v8783_v14, %v7492_v13 }
 0x511   :  { %5294 = vmatprep.subr.bf16.mxu0 %v6924_v61 }
 0x513   :  { %5254 = vmatpush1.bf16.msra.mxu1 %v6832_v35  ;;  %v2982_v35 = vrot.slane %v8783_v14, %v7498_v15 }
 0x514   :  { %5255 = vmatprep.subr.bf16.mxu1 %v6837_v22  ;;  %5295 = vmatpush1.bf16.msra.mxu0 %v6922_v49 }
 0x515   :  { %5296 = vmatprep.subr.bf16.mxu0 %v6930_v19  ;;  %v6879_v19 = vld [vmem:[%s9017_s7 + $0x4c] ss:$16 sps:$4 sm:$0xff]  }
 0x517   :  { %5256 = vmatpush1.bf16.msra.mxu1 %v6835_v57 }
 0x518   :  { %5257 = vmatprep.subr.bf16.mxu1 %v6840_v58  ;;  %5297 = vmatpush1.bf16.msra.mxu0 %v6928_v27  ;;  %v6874_v27 = vld [vmem:[%s9017_s7 + $0x68] ss:$16 sps:$4 sm:$0xff]  }
 0x519   :  { %5298 = vmatprep.subr.bf16.mxu0 %v6936_v0 }
 0x51a   :  { %v8667_v55 = vpop.f32.mrf.mxu1 }
 0x51b   :  { %v8669_v43 = vpop.f32.mrf.mxu0  ;;  %5258 = vmatpush2.bf16.msra.mxu1 %v6838_v2  ;;  %v4150_v63 = vadd.f32 %v8667_v55, %v2978_v52  ;;  %v6862_v55 = vld [vmem:[%s9017_s7 + $0xe8] ss:$16 sps:$4 sm:$0xff]  }
 0x51c   :  { %v8674_v29 = vpop.f32.mrf.mxu1  ;;  %5259 = vmatprep.subr.bf16.mxu1 %v6843_v40  ;;  %5299 = vmatpush2.bf16.msra.mxu0 %v6934_v53  ;;  %v6885_v53 = vld [vmem:[%s9017_s7 + $0xc] ss:$16 sps:$4 sm:$0xff]  }
 0x51d   :  { %v8679_v30 = vpop.f32.mrf.mxu0  ;;  %5300 = vmatprep.subr.bf16.mxu0 %v6939_v62  ;;  %v4152_v25 = vadd.f32 %v8674_v29, %v2982_v35  ;;  %v4191_v22 = vadd.f32 %v8669_v43, %v4150_v63  ;;  %v6867_v43 = vld [vmem:[%s9017_s7 + $0xcc] ss:$16 sps:$4 sm:$0xff]  }
 0x51e   :  { %v4153_v38 = vpop.f32.mrf.mxu1 }
 0x51f   :  { %v4194_v33 = vpop.f32.mrf.mxu0  ;;  %5260 = vmatpush2.bf16.msra.mxu1 %v6841_v4  ;;  %v4193_v39 = vadd.f32 %v8679_v30, %v4152_v25  ;;  %v6865_v30 = vld [vmem:[%s9017_s7 + $0xc8] ss:$16 sps:$4 sm:$0xff]   ;;  %v6870_v38 = vld [vmem:[%s9017_s7 + $0xac] ss:$16 sps:$4 sm:$0xff]  }
 0x520   :  { %v4154_v23 = vpop.f32.mrf.mxu1  ;;  %5261 = vmatprep.subr.bf16.mxu1 %v6846_v56  ;;  %5301 = vmatpush2.bf16.msra.mxu0 %v6937_v59  ;;  %v6868_v33 = vld [vmem:[%s9017_s7 + $0xa8] ss:$16 sps:$4 sm:$0xff]   ;;  %v6891_v59 = vld [vmem:[%s9017_s7 + $0x1ec] ss:$16 sps:$4 sm:$0xff]  }
 0x521   :  { %v4195_v34 = vpop.f32.mrf.mxu0  ;;  %5302 = vmatprep.subr.bf16.mxu0 %v6942_v48  ;;  %v6871_v23 = vld [vmem:[%s9017_s7 + $0x88] ss:$16 sps:$4 sm:$0xff]  }
 0x522   :  { %v6877_v34 = vld [vmem:[%s9017_s7 + $0x48] ss:$16 sps:$4 sm:$0xff]  }
 0x523   :  { %5262 = vmatpush2.bf16.msra.mxu1 %v6844_v31  ;;  %v6873_v31 = vld [vmem:[%s9017_s7 + $0x8c] ss:$16 sps:$4 sm:$0xff]  }
 0x524   :  { %5263 = vmatprep.subr.bf16.mxu1 %v6849_v17  ;;  %5303 = vmatpush2.bf16.msra.mxu0 %v6940_v24  ;;  %v6876_v17 = vld [vmem:[%s9017_s7 + $0x6c] ss:$16 sps:$4 sm:$0xff]   ;;  %v6895_v24 = vld [vmem:[%s9017_s7 + $0x1c8] ss:$16 sps:$4 sm:$0xff]  }
 0x525   :  { %5304 = vmatprep.subr.bf16.mxu0 %v6945_v32  ;;  %v6903_v32 = vld [vmem:[%s9017_s7 + $0x1ac] ss:$16 sps:$4 sm:$0xff]  }
 0x527   :  { %5264 = vmatpush2.bf16.msra.mxu1 %v6847_v51  ;;  %v6882_v51 = vld [vmem:[%s9017_s7 + $0x2c] ss:$16 sps:$4 sm:$0xff]  }
 0x528   :  { %5265 = vmatprep.subr.bf16.mxu1 %v6852_v42  ;;  %5305 = vmatpush2.bf16.msra.mxu0 %v6943_v10  ;;  %v6880_v42 = vld [vmem:[%s9017_s7 + $0x28] ss:$16 sps:$4 sm:$0xff]  }
 0x529   :  { %5306 = vmatprep.subr.bf16.mxu0 %v6948_v28  ;;  %v6907_v10 = vld [vmem:[%s9017_s7 + $0x188] ss:$16 sps:$4 sm:$0xff]   ;;  %v6915_v28 = vld [vmem:[%s9017_s7 + $0x16c] ss:$16 sps:$4 sm:$0xff]  }
 0x52b   :  { %5266 = vmatpush2.bf16.msra.mxu1 %v6850_v41 }
 0x52c   :  { %5267 = vmatprep.subr.bf16.mxu1 %v6855_v16  ;;  %5307 = vmatpush2.bf16.msra.mxu0 %v6946_v46  ;;  %v6883_v16 = vld [vmem:[%s9017_s7 + $0x8] ss:$16 sps:$4 sm:$0xff]  }
 0x52d   :  { %5308 = vmatprep.subr.bf16.mxu0 %v6951_v5  ;;  %v6919_v46 = vld [vmem:[%s9017_s7 + $0x148] ss:$16 sps:$4 sm:$0xff]   ;;  %v6927_v5 = vld [vmem:[%s9017_s7 + $0x12c] ss:$16 sps:$4 sm:$0xff]  }
 0x52f   :  { %5268 = vmatpush2.bf16.msra.mxu1 %v6853_v26  ;;  %v6889_v26 = vld [vmem:[%s9017_s7 + $0x1e8] ss:$16 sps:$4 sm:$0xff]  }
 0x530   :  { %5269 = vmatprep.subr.bf16.mxu1 %v6858_v36  ;;  %5309 = vmatpush2.bf16.msra.mxu0 %v6949_v3  ;;  %v6897_v36 = vld [vmem:[%s9017_s7 + $0x1cc] ss:$16 sps:$4 sm:$0xff]  }
 0x531   :  { %5310 = vmatprep.subr.bf16.mxu0 %v6954_v60  ;;  %v6933_v60 = vld [vmem:[%s9017_s7 + $0x10c] ss:$16 sps:$4 sm:$0xff]  }
 0x533   :  { %5270 = vmatpush2.bf16.msra.mxu1 %v6856_v50  ;;  %v6901_v50 = vld [vmem:[%s9017_s7 + $0x1a8] ss:$16 sps:$4 sm:$0xff]  }
 0x534   :  { %5271 = vmatprep.subr.bf16.mxu1 %v6861_v7  ;;  %5311 = vmatpush2.bf16.msra.mxu0 %v6952_v45  ;;  %v6909_v7 = vld [vmem:[%s9017_s7 + $0x18c] ss:$16 sps:$4 sm:$0xff]  }
 0x535   :  { %5312 = vmatprep.subr.bf16.mxu0 %v6957_v44  ;;  %v2985_v44 = vsub.s32 2, %v7489_v12 }
 0x537   :  { %5272 = vmatpush2.bf16.msra.mxu1 %v6859_v54  ;;  %v6913_v54 = vld [vmem:[%s9017_s7 + $0x168] ss:$16 sps:$4 sm:$0xff]  }
 0x538   :  { %5323 = vmatprep.subr.bf16.mxu1 %v6864_v47  ;;  %5313 = vmatpush2.bf16.msra.mxu0 %v6955_v11  ;;  %v6921_v47 = vld [vmem:[%s9017_s7 + $0x14c] ss:$16 sps:$4 sm:$0xff]   ;;  %v2989_v11 = vsub.s32 3, %v7489_v12 }
 0x539   :  { %5364 = vmatprep.subr.bf16.mxu0 %v6960_v21  ;;  %v2986_v21 = vrot.slane %v8783_v14, %v2985_v44 }
 0x53a   :  { %v2990_v52 = vrot.slane %v8783_v14, %v2989_v11  ;;  %v6958_v14 = vld [vmem:[%s9017_s7 + $0x2e8] ss:$16 sps:$4 sm:$0xff]  }
 0x53b   :  { %v4272_v20 = vpop.f32.mrf.mxu0 }
 0x53d   :  { %v4274_v1 = vpop.f32.mrf.mxu0 }
 0x53f   :  { %v4276_v9 = vpop.f32.mrf.mxu0 }
 0x540   :  { %v6931_v9 = vld [vmem:[%s9017_s7 + $0x108] ss:$16 sps:$4 sm:$0xff]  }
 0x541   :  { %v4277_v18 = vpop.f32.mrf.mxu0 }
 0x55a   :  { %v4231_v57 = vpop.f32.mrf.mxu1 }
 0x55b   :  { %v4232_v37 = vadd.f32 %v4231_v57, %v4191_v22 }
 0x55c   :  { %v4233_v58 = vpop.f32.mrf.mxu1 }
 0x55d   :  { %v4273_v2 = vadd.f32 %v4272_v20, %v4232_v37  ;;  %v4234_v6 = vadd.f32 %v4233_v58, %v4193_v39  ;;  %v6925_v20 = vld [vmem:[%s9017_s7 + $0x128] ss:$16 sps:$4 sm:$0xff]  }
 0x55e   :  { %v4235_v8 = vpop.f32.mrf.mxu1 }
 0x55f   :  { %v4275_v40 = vadd.f32 %v4274_v1, %v4234_v6  ;;  %v4443_v4 = vmax.f32 %v4273_v2, 0.0 }
 0x560   :  { %v4236_v56 = vpop.f32.mrf.mxu1 }
 0x561   :  { %v4444_v49 = vmax.f32 %v4275_v40, 0.0  ;;  %v8796_v29 = vpack.c.bf16 %v4443_v4, %v4443_v4 }
 0x563   :  { %v4448_v61 = vpack.c.bf16 %v4444_v49, %v4444_v49 }
 0x565   :  { %5273 = vmatprep.mubr.bf16.mxu1 %v4448_v61 }
 0x566   :  { %5274 = vmatmul.mubr.bf16.vlgmr.msra.gmra.mxu1 %v8796_v29 }
 0x567   :  { %5324 = vmatpush1.bf16.msra.mxu1 %v6862_v55  ;;  %5355 = vmatprep.mubr.bf16.mxu1 %v4448_v61 }
 0x568   :  { %5325 = vmatprep.subr.bf16.mxu1 %v6867_v43 }
 0x56b   :  { %5326 = vmatpush1.bf16.msra.mxu1 %v6865_v30 }
 0x56c   :  { %5327 = vmatprep.subr.bf16.mxu1 %v6870_v38  ;;  %v6963_v38 = vld [vmem:[%s9017_s7 + $0x2cc] ss:$16 sps:$4 sm:$0xff]  }
 0x56f   :  { %5328 = vmatpush1.bf16.msra.mxu1 %v6868_v33  ;;  %v6961_v33 = vld [vmem:[%s9017_s7 + $0x2c8] ss:$16 sps:$4 sm:$0xff]  }
 0x570   :  { %5329 = vmatprep.subr.bf16.mxu1 %v6873_v31  ;;  %v6966_v31 = vld [vmem:[%s9017_s7 + $0x2ac] ss:$16 sps:$4 sm:$0xff]  }
 0x573   :  { %5330 = vmatpush1.bf16.msra.mxu1 %v6871_v23  ;;  %v6964_v23 = vld [vmem:[%s9017_s7 + $0x2a8] ss:$16 sps:$4 sm:$0xff]  }
 0x574   :  { %5331 = vmatprep.subr.bf16.mxu1 %v6876_v17  ;;  %v6969_v17 = vld [vmem:[%s9017_s7 + $0x28c] ss:$16 sps:$4 sm:$0xff]  }
 0x577   :  { %5332 = vmatpush1.bf16.msra.mxu1 %v6874_v27  ;;  %v6967_v27 = vld [vmem:[%s9017_s7 + $0x288] ss:$16 sps:$4 sm:$0xff]  }
 0x578   :  { %5333 = vmatprep.subr.bf16.mxu1 %v6879_v19  ;;  %v6972_v19 = vld [vmem:[%s9017_s7 + $0x26c] ss:$16 sps:$4 sm:$0xff]  }
 0x57b   :  { %v4313_v0 = vpop.f32.mrf.mxu0  ;;  %5334 = vmatpush1.bf16.msra.mxu1 %v6877_v34  ;;  %v6970_v34 = vld [vmem:[%s9017_s7 + $0x268] ss:$16 sps:$4 sm:$0xff]  }
 0x57c   :  { %5335 = vmatprep.subr.bf16.mxu1 %v6882_v51  ;;  %v4314_v35 = vadd.f32 %v4313_v0, %v2986_v21  ;;  %v6975_v51 = vld [vmem:[%s9017_s7 + $0x24c] ss:$16 sps:$4 sm:$0xff]   ;;  %v6973_v0 = vld [vmem:[%s9017_s7 + $0x248] ss:$16 sps:$4 sm:$0xff]  }
 0x57d   :  { %v4315_v62 = vpop.f32.mrf.mxu0  ;;  %v7015_v21 = vld [vmem:[#allocation8 + $0x18] sm:$0xff]  }
 0x57e   :  { %v4316_v63 = vadd.f32 %v4315_v62, %v2990_v52  ;;  %v6981_v62 = vld [vmem:[%s9017_s7 + $0x20c] ss:$16 sps:$4 sm:$0xff]   ;;  %v7000_v52 = vld [vmem:[%s9017_s7 + $0x328] ss:$16 sps:$4 sm:$0xff]  }
 0x57f   :  { %v4317_v41 = vpop.f32.mrf.mxu0  ;;  %5336 = vmatpush1.bf16.msra.mxu1 %v6880_v42  ;;  %v6978_v42 = vld [vmem:[%s9017_s7 + $0x22c] ss:$16 sps:$4 sm:$0xff]  }
 0x580   :  { %5337 = vmatprep.subr.bf16.mxu1 %v6885_v53  ;;  %v6976_v53 = vld [vmem:[%s9017_s7 + $0x228] ss:$16 sps:$4 sm:$0xff]  }
 0x581   :  { %v4318_v48 = vpop.f32.mrf.mxu0  ;;  %v6979_v41 = vld [vmem:[%s9017_s7 + $0x208] ss:$16 sps:$4 sm:$0xff]  }
 0x582   :  { %v6987_v48 = vld [vmem:[%s9017_s7 + $0x3cc] ss:$16 sps:$4 sm:$0xff]  }
 0x583   :  { %5338 = vmatpush1.bf16.msra.mxu1 %v6883_v16  ;;  %v6984_v16 = vld [vmem:[%s9017_s7 + $0x3ec] ss:$16 sps:$4 sm:$0xff]  }
 0x584   :  { %5339 = vmatprep.subr.bf16.mxu1 %v6891_v59  ;;  %v6982_v59 = vld [vmem:[%s9017_s7 + $0x3e8] ss:$16 sps:$4 sm:$0xff]  }
 0x587   :  { %5340 = vmatpush2.bf16.msra.mxu1 %v6889_v26  ;;  %v6985_v26 = vld [vmem:[%s9017_s7 + $0x3c8] ss:$16 sps:$4 sm:$0xff]  }
 0x588   :  { %5341 = vmatprep.subr.bf16.mxu1 %v6897_v36  ;;  %v6990_v36 = vld [vmem:[%s9017_s7 + $0x3ac] ss:$16 sps:$4 sm:$0xff]  }
 0x58b   :  { %5342 = vmatpush2.bf16.msra.mxu1 %v6895_v24  ;;  %v6988_v24 = vld [vmem:[%s9017_s7 + $0x3a8] ss:$16 sps:$4 sm:$0xff]  }
 0x58c   :  { %5343 = vmatprep.subr.bf16.mxu1 %v6903_v32  ;;  %v7006_v32 = vld [vmem:[#allocation8 + $0x78] sm:$0xff]  }
 0x58f   :  { %5344 = vmatpush2.bf16.msra.mxu1 %v6901_v50  ;;  %v7007_v50 = vld [vmem:[#allocation8 + $0x38] sm:$0xff]  }
 0x590   :  { %5345 = vmatprep.subr.bf16.mxu1 %v6909_v7  ;;  %v7008_v7 = vld [vmem:[#allocation8 + $0x70] sm:$0xff]  }
 0x593   :  { %5346 = vmatpush2.bf16.msra.mxu1 %v6907_v10  ;;  %v6993_v10 = vld [vmem:[%s9017_s7 + $0x38c] ss:$16 sps:$4 sm:$0xff]  }
 0x594   :  { %5347 = vmatprep.subr.bf16.mxu1 %v6915_v28  ;;  %v7009_v28 = vld [vmem:[#allocation8 + $0x30] sm:$0xff]  }
 0x597   :  { %5348 = vmatpush2.bf16.msra.mxu1 %v6913_v54  ;;  %v6991_v54 = vld [vmem:[%s9017_s7 + $0x388] ss:$16 sps:$4 sm:$0xff]  }
 0x598   :  { %5349 = vmatprep.subr.bf16.mxu1 %v6921_v47  ;;  %v7010_v47 = vld [vmem:[#allocation8 + $0x68] sm:$0xff]  }
 0x59a   :  { %v4354_v3 = vpop.f32.mrf.mxu1 }
 0x59b   :  { %5350 = vmatpush2.bf16.msra.mxu1 %v6919_v46  ;;  %v4355_v25 = vadd.f32 %v4354_v3, %v4314_v35  ;;  %v6996_v46 = vld [vmem:[%s9017_s7 + $0x36c] ss:$16 sps:$4 sm:$0xff]   ;;  %v6994_v3 = vld [vmem:[%s9017_s7 + $0x368] ss:$16 sps:$4 sm:$0xff]  }
 0x59c   :  { %v4356_v1 = vpop.f32.mrf.mxu1  ;;  %5351 = vmatprep.subr.bf16.mxu1 %v6927_v5  ;;  %v7011_v5 = vld [vmem:[#allocation8 + $0x28] sm:$0xff]   ;;  %v7016_v35 = vld [vmem:[#allocation8 + $0x50] sm:$0xff]  }
 0x59d   :  { %v4357_v39 = vadd.f32 %v4356_v1, %v4316_v63  ;;  %v6999_v1 = vld [vmem:[%s9017_s7 + $0x34c] ss:$16 sps:$4 sm:$0xff]  }
 0x59e   :  { %v4358_v45 = vpop.f32.mrf.mxu1  ;;  %v7005_v63 = vld [vmem:[%s9017_s7 + $0x30c] ss:$16 sps:$4 sm:$0xff]  }
 0x59f   :  { %5352 = vmatpush2.bf16.msra.mxu1 %v6925_v20  ;;  %v7012_v20 = vld [vmem:[#allocation8 + $0x60] sm:$0xff]   ;;  %v6997_v45 = vld [vmem:[%s9017_s7 + $0x348] ss:$16 sps:$4 sm:$0xff]  }
 0x5a0   :  { %v4359_v18 = vpop.f32.mrf.mxu1  ;;  %5353 = vmatprep.subr.bf16.mxu1 %v6933_v60  ;;  %v7013_v60 = vld [vmem:[#allocation8 + $0x20] sm:$0xff]  }
 0x5a1   :  { %v7002_v18 = vld [vmem:[%s9017_s7 + $0x32c] ss:$16 sps:$4 sm:$0xff]  }
 0x5a3   :  { %5354 = vmatpush2.bf16.msra.mxu1 %v6931_v9  ;;  %v7014_v9 = vld [vmem:[#allocation8 + $0x58] sm:$0xff]  }
 0x5a4   :  { %6328 = vmatprep.subr.bf16.mxu1 %v7006_v32 }
 0x5a6   :  { %5356 = vmatmul.mubr.bf16.vlgmr.msra.gmra.mxu1 %v8796_v29 }
 0x5a7   :  { %6329 = vmatpush3.bf16.msra.mxu1 %v7007_v50 }
 0x5a8   :  { %6330 = vmatprep.subr.bf16.mxu1 %v7008_v7 }
 0x5ab   :  { %6331 = vmatpush3.bf16.msra.mxu1 %v7009_v28 }
 0x5ac   :  { %6332 = vmatprep.subr.bf16.mxu1 %v7010_v47 }
 0x5af   :  { %6333 = vmatpush3.bf16.msra.mxu1 %v7011_v5 }
 0x5b0   :  { %6334 = vmatprep.subr.bf16.mxu1 %v7012_v20 }
 0x5b3   :  { %6335 = vmatpush3.bf16.msra.mxu1 %v7013_v60 }
 0x5b4   :  { %6336 = vmatprep.subr.bf16.mxu1 %v7014_v9 }
 0x5b7   :  { %6337 = vmatpush3.bf16.msra.mxu1 %v7015_v21 }
 0x5b8   :  { %6338 = vmatprep.subr.bf16.mxu1 %v7016_v35 }
 0x5ba   :  { %v4436_v22 = vpop.f32.mrf.mxu1 }
 0x5bb   :  { %v4395_v57 = vpop.f32.mrf.mxu0 }
 0x5bc   :  { %v4396_v37 = vadd.f32 %v4395_v57, %v4355_v25  ;;  %v4438_v58 = vpop.f32.mrf.mxu1  ;;  %v7017_v25 = vld [vmem:[#allocation8 + $0x10] sm:$0xff]   ;;  %v7018_v57 = vld [vmem:[#allocation8 + $0x48] sm:$0xff]  }
 0x5bd   :  { %v4397_v2 = vpop.f32.mrf.mxu0  ;;  %6339 = vmatpush3.bf16.msra.mxu1 %v7017_v25 }
 0x5be   :  { %v4437_v6 = vadd.f32 %v4436_v22, %v4396_v37  ;;  %v4398_v8 = vadd.f32 %v4397_v2, %v4357_v39  ;;  %v4440_v40 = vpop.f32.mrf.mxu1  ;;  %v7003_v22 = vld [vmem:[%s9017_s7 + $0x308] ss:$16 sps:$4 sm:$0xff]   ;;  %6340 = vmatprep.subr.bf16.mxu1 %v7018_v57  ;;  %v7020_v37 = vld [vmem:[#allocation8 + $0x40] sm:$0xff]  }
 0x5bf   :  { %v4399_v4 = vpop.f32.mrf.mxu0  ;;  %v7019_v39 = vld [vmem:[#allocation8 + $0x8] sm:$0xff]   ;;  %v7022_v2 = vld [vmem:[#allocation8 + $0xf8] sm:$0xff]   ;;  %v7025_v40 = vld [vmem:[#allocation8 + $0xb0] sm:$0xff]  }
 0x5c0   :  { %v4439_v56 = vadd.f32 %v4438_v58, %v4398_v8  ;;  %v4441_v49 = vpop.f32.mrf.mxu1  ;;  %v4445_v61 = vmax.f32 %v4437_v6, 0.0  ;;  %v7021_v58 = vld [vmem:[#allocation8] sm:$0xff]   ;;  %v7023_v6 = vld [vmem:[#allocation8 + $0xb8] sm:$0xff]   ;;  %v7024_v8 = vld [vmem:[#allocation8 + $0xf0] sm:$0xff]  }
 0x5c1   :  { %v4400_v55 = vpop.f32.mrf.mxu0  ;;  %6341 = vmatpush3.bf16.msra.mxu1 %v7019_v39  ;;  %v7026_v4 = vld [vmem:[#allocation8 + $0xe8] sm:$0xff]   ;;  %v7028_v49 = vld [vmem:[#allocation8 + $0xe0] sm:$0xff]  }
 0x5c2   :  { %v4446_v29 = vmax.f32 %v4439_v56, 0.0  ;;  %v8901_v30 = vpack.c.bf16 %v4445_v61, %v4445_v61  ;;  %6342 = vmatprep.subr.bf16.mxu1 %v7020_v37  ;;  %v7027_v56 = vld [vmem:[#allocation8 + $0xa8] sm:$0xff]   ;;  %v7029_v61 = vld [vmem:[#allocation8 + $0xa0] sm:$0xff]   ;;  %v7030_v55 = vld [vmem:[#allocation8 + $0xd8] sm:$0xff]  }
 0x5c4   :  { %v4450_v43 = vpack.c.bf16 %v4446_v29, %v4446_v29  ;;  %v7031_v29 = vld [vmem:[#allocation8 + $0x98] sm:$0xff]  }
 0x5c5   :  { %6343 = vmatpush3.bf16.msra.mxu1 %v7021_v58 }
 0x5c6   :  { %5314 = vmatprep.mubr.bf16.mxu0 %v4450_v43 }
 0x5c7   :  { %5315 = vmatmul.mubr.bf16.vlgmr.msra.gmra.mxu0 %v8901_v30 }
 0x5c8   :  { %5365 = vmatpush1.bf16.msra.mxu0 %v6958_v14  ;;  %5396 = vmatprep.mubr.bf16.mxu0 %v4450_v43  ;;  %v7032_v43 = vld [vmem:[#allocation8 + $0xd0] sm:$0xff]  }
 0x5c9   :  { %5366 = vmatprep.subr.bf16.mxu0 %v6963_v38  ;;  %v7033_v14 = vld [vmem:[#allocation8 + $0x90] sm:$0xff]  }
 0x5cc   :  { %5367 = vmatpush1.bf16.msra.mxu0 %v6961_v33 }
 0x5cd   :  { %5368 = vmatprep.subr.bf16.mxu0 %v6966_v31 }
 0x5d0   :  { %5369 = vmatpush1.bf16.msra.mxu0 %v6964_v23  ;;  %v7034_v23 = vld [vmem:[#allocation8 + $0xc8] sm:$0xff]  }
 0x5d1   :  { %5370 = vmatprep.subr.bf16.mxu0 %v6969_v17  ;;  %v7035_v17 = vld [vmem:[#allocation8 + $0x88] sm:$0xff]  }
 0x5d4   :  { %5371 = vmatpush1.bf16.msra.mxu0 %v6967_v27  ;;  %v7036_v27 = vld [vmem:[#allocation8 + $0xc0] sm:$0xff]  }
 0x5d5   :  { %5372 = vmatprep.subr.bf16.mxu0 %v6972_v19  ;;  %v7037_v19 = vld [vmem:[#allocation8 + $0x80] sm:$0xff]  }
 0x5d8   :  { %5373 = vmatpush1.bf16.msra.mxu0 %v6970_v34 }
 0x5d9   :  { %5374 = vmatprep.subr.bf16.mxu0 %v6975_v51 }
 0x5dc   :  { %5375 = vmatpush1.bf16.msra.mxu0 %v6973_v0 }
 0x5dd   :  { %5376 = vmatprep.subr.bf16.mxu0 %v6978_v42 }
 0x5e0   :  { %5377 = vmatpush1.bf16.msra.mxu0 %v6976_v53  ;;  %v4579_v53 = vld [vmem:[%s9018_s8] sm:$0xf] }
 0x5e1   :  { %5378 = vmatprep.subr.bf16.mxu0 %v6981_v62  ;;  %v4584_v62 = vrot.slane %v4579_v53, %v7492_v13  ;;  %v4592_v47 = vrot.slane %v4579_v53, %v2985_v44  ;;  %v4596_v13 = vrot.slane %v4579_v53, %v2989_v11  ;;  %v6279_v11 = vld [vmem:[%s9020_s10] ss:$0 sm:$0xff] }
 0x5e4   :  { %5379 = vmatpush1.bf16.msra.mxu0 %v6979_v41  ;;  %v4588_v41 = vrot.slane %v4579_v53, %v7498_v15 }
 0x5e5   :  { %5380 = vmatprep.subr.bf16.mxu0 %v6984_v16 }
 0x5e8   :  { %5381 = vmatpush2.bf16.msra.mxu0 %v6982_v59 }
 0x5e9   :  { %5382 = vmatprep.subr.bf16.mxu0 %v6987_v48 }
 0x5ec   :  { %5383 = vmatpush2.bf16.msra.mxu0 %v6985_v26 }
 0x5ed   :  { %5384 = vmatprep.subr.bf16.mxu0 %v6990_v36 }
 0x5f0   :  { %5385 = vmatpush2.bf16.msra.mxu0 %v6988_v24 }
 0x5f1   :  { %5386 = vmatprep.subr.bf16.mxu0 %v6993_v10 }
 0x5f4   :  { %5387 = vmatpush2.bf16.msra.mxu0 %v6991_v54 }
 0x5f5   :  { %5388 = vmatprep.subr.bf16.mxu0 %v6996_v46 }
 0x5f8   :  { %5389 = vmatpush2.bf16.msra.mxu0 %v6994_v3 }
 0x5f9   :  { %5390 = vmatprep.subr.bf16.mxu0 %v6999_v1 }
 0x5fc   :  { %5391 = vmatpush2.bf16.msra.mxu0 %v6997_v45 }
 0x5fd   :  { %5392 = vmatprep.subr.bf16.mxu0 %v7002_v18 }
 0x600   :  { %5393 = vmatpush2.bf16.msra.mxu0 %v7000_v52 }
 0x601   :  { %5394 = vmatprep.subr.bf16.mxu0 %v7005_v63 }
 0x604   :  { %5395 = vmatpush2.bf16.msra.mxu0 %v7003_v22 }
 0x605   :  { %6350 = vmatprep.subr.bf16.mxu0 %v7022_v2 }
 0x607   :  { %5397 = vmatmul.mubr.bf16.vlgmr.msra.gmra.mxu0 %v8901_v30 }
 0x608   :  { %6351 = vmatpush3.bf16.msra.mxu0 %v7023_v6 }
 0x609   :  { %6352 = vmatprep.subr.bf16.mxu0 %v7024_v8 }
 0x60c   :  { %6353 = vmatpush3.bf16.msra.mxu0 %v7025_v40 }
 0x60d   :  { %6354 = vmatprep.subr.bf16.mxu0 %v7026_v4 }
 0x610   :  { %6355 = vmatpush3.bf16.msra.mxu0 %v7027_v56 }
 0x611   :  { %6356 = vmatprep.subr.bf16.mxu0 %v7028_v49 }
 0x614   :  { %6357 = vmatpush3.bf16.msra.mxu0 %v7029_v61 }
 0x615   :  { %6358 = vmatprep.subr.bf16.mxu0 %v7030_v55 }
 0x618   :  { %6359 = vmatpush3.bf16.msra.mxu0 %v7031_v29 }
 0x619   :  { %6360 = vmatprep.subr.bf16.mxu0 %v7032_v43 }
 0x61c   :  { %6361 = vmatpush3.bf16.msra.mxu0 %v7033_v14 }
 0x61d   :  { %6362 = vmatprep.subr.bf16.mxu0 %v7034_v23 }
 0x620   :  { %6363 = vmatpush3.bf16.msra.mxu0 %v7035_v17 }
 0x621   :  { %6364 = vmatprep.subr.bf16.mxu0 %v7036_v27 }
 0x624   :  { %6365 = vmatpush3.bf16.msra.mxu0 %v7037_v19 }
 0x626   :  { %v5275_v30 = vpop.f32.mrf.mxu1 }
 0x627   :  { %v5276_v16 = vadd.f32 %v5275_v30, %v4584_v62 }
 0x628   :  { %v5277_v38 = vpop.f32.mrf.mxu1 }
 0x629   :  { %v5278_v48 = vadd.f32 %v5277_v38, %v4588_v41 }
 0x62a   :  { %v5279_v33 = vpop.f32.mrf.mxu1 }
 0x62c   :  { %v5280_v31 = vpop.f32.mrf.mxu1 }
 0x666   :  { %v5357_v34 = vpop.f32.mrf.mxu1 }
 0x667   :  { %v5358_v15 = vadd.f32 %v5357_v34, %v4592_v47 }
 0x668   :  { %v5359_v51 = vpop.f32.mrf.mxu1 }
 0x669   :  { %v5360_v5 = vadd.f32 %v5359_v51, %v4596_v13 }
 0x66a   :  { %v5361_v0 = vpop.f32.mrf.mxu1 }
 0x66c   :  { %v5362_v42 = vpop.f32.mrf.mxu1 }
 0x687   :  { %v5316_v59 = vpop.f32.mrf.mxu0 }
 0x688   :  { %v5317_v26 = vadd.f32 %v5316_v59, %v5276_v16 }
 0x689   :  { %v5318_v36 = vpop.f32.mrf.mxu0 }
 0x68a   :  { %v5319_v24 = vadd.f32 %v5318_v36, %v5278_v48  ;;  %v5405_v32 = vmax.f32 %v5317_v26, 0.0 }
 0x68b   :  { %v5320_v50 = vpop.f32.mrf.mxu0 }
 0x68c   :  { %v5406_v7 = vmax.f32 %v5319_v24, 0.0  ;;  %v5409_v54 = vpack.c.bf16 %v5405_v32, %v5405_v32 }
 0x68d   :  { %v5321_v10 = vpop.f32.mrf.mxu0 }
 0x68e   :  { %v5410_v28 = vpack.c.bf16 %v5406_v7, %v5406_v7 }
 0x690   :  { %5708 = vmatprep.mubr.bf16.mxu1 %v5410_v28 }
 0x691   :  { %5709 = vmatmul.mubr.bf16.vlgmr.msra.gmra.mxu1 %v5409_v54 }
 0x6c7   :  { %v5398_v46 = vpop.f32.mrf.mxu0 }
 0x6c8   :  { %v5399_v3 = vadd.f32 %v5398_v46, %v5358_v15 }
 0x6c9   :  { %v5400_v20 = vpop.f32.mrf.mxu0 }
 0x6ca   :  { %v5401_v1 = vadd.f32 %v5400_v20, %v5360_v5  ;;  %v5407_v60 = vmax.f32 %v5399_v3, 0.0 }
 0x6cb   :  { %v5402_v45 = vpop.f32.mrf.mxu0 }
 0x6cc   :  { %v5408_v9 = vmax.f32 %v5401_v1, 0.0  ;;  %v5411_v52 = vpack.c.bf16 %v5407_v60, %v5407_v60 }
 0x6cd   :  { %v5403_v18 = vpop.f32.mrf.mxu0 }
 0x6ce   :  { %v5412_v21 = vpack.c.bf16 %v5408_v9, %v5408_v9 }
 0x6d0   :  { %5748 = vmatprep.mubr.bf16.mxu0 %v5412_v21 }
 0x6d1   :  { %5749 = vmatmul.mubr.bf16.vlgmr.msra.gmra.mxu0 %v5411_v52 }
 0x751   :  { %v6344_v35 = vpop.f32.mrf.mxu1 }
 0x753   :  { %v6345_v63 = vpop.f32.mrf.mxu1 }
 0x754   :  { %v6346_v12 = vadd.f32 %v6345_v63, %v6344_v35 }
 0x755   :  { %v6347_v44 = vpop.f32.mrf.mxu1 }
 0x756   :  { %v5711_v39 = vadd.f32 %v6346_v12, %v6279_v11 }
 0x757   :  { %v6348_v25 = vpop.f32.mrf.mxu1 }
 0x791   :  { %v6366_v22 = vpop.f32.mrf.mxu0 }
 0x793   :  { %v6367_v57 = vpop.f32.mrf.mxu0 }
 0x794   :  { %v6368_v37 = vadd.f32 %v6367_v57, %v6366_v22 }
 0x795   :  { %v6369_v58 = vpop.f32.mrf.mxu0 }
 0x796   :  { %v5751_v2 = vadd.f32 %v6368_v37, %v5711_v39 }
 0x797   :  { %v6370_v6 = vpop.f32.mrf.mxu0 }
 0x798   :  { %5756 = vst [vmem:[%s9021_s11] sm:$0xff] %v5751_v2 }
 0x799   :  { %5761 = vsyncpa [#allocation7], 1 }
 0x79a   :  { %5762 = vsyncpa [#allocation9], 1 }

</bundles_post_ra>
